<compile_context>
chip_gen: v5e
topology: v5e:2x2
jax: 0.10.0
libtpu: 0.0.40
codegen_flags: <defaults>
</compile_context>

<pallas_src>
import functools
import math

import jax
import jax.numpy as jnp
import numpy as np
from jax import lax
from jax.experimental import pallas as pl
from jax.experimental.pallas import tpu as pltpu


def _layernorm(x, g, b, eps=1e-5):
    mu = jnp.mean(x, axis=-1, keepdims=True)
    var = jnp.mean((x - mu) ** 2, axis=-1, keepdims=True)
    return (x - mu) * lax.rsqrt(var + eps) * g + b


def _gelu_exact(x):
    # PyTorch nn.GELU() default: exact erf-based GELU.
    return 0.5 * x * (1.0 + lax.erf(x * (1.0 / math.sqrt(2.0))))


def block_kernel(heads, dim_head, bt, n, dim,
                 x_ref,
                 n1g, n1b,
                 wqf, bqf, wkf, bkf, wvf, bvf,
                 wof, bof,
                 n2g, n2b,
                 w1, b1, w2, b2,
                 o_ref):
    f32 = jnp.float32
    bf16 = jnp.bfloat16
    E = heads * dim_head

    x = x_ref[...]                                    # (bt*n, dim) f32

    # ---- attention branch: to_out(MHA(to_q/k/v(norm1(x)))) + x ----
    h = _layernorm(x, n1g[...], n1b[...])
    hb = h.astype(bf16)
    # Fused (to_q ∘ in_proj_q) etc.; 1/sqrt(dim_head) folded into wqf/bqf.
    qp = (jnp.dot(hb, wqf[...], preferred_element_type=f32) + bqf[...]).astype(bf16)
    kp = (jnp.dot(hb, wkf[...], preferred_element_type=f32) + bkf[...]).astype(bf16)
    vp = (jnp.dot(hb, wvf[...], preferred_element_type=f32) + bvf[...]).astype(bf16)

    # Split the leading (row) dim only — cheap; batch the attention matmuls
    # over the bt axis with dot_general batch dims instead of a Python loop.
    q3 = qp.reshape(bt, n, E)
    k3 = kp.reshape(bt, n, E)
    v3 = vp.reshape(bt, n, E)

    head_outs = []
    for hh in range(heads):                           # static, small loop
        c = slice(hh * dim_head, (hh + 1) * dim_head)
        qh = q3[:, :, c]                              # (bt, n, dh) bf16
        kh = k3[:, :, c]
        vh = v3[:, :, c]
        s = jnp.einsum('bqd,bkd->bqk', qh, kh,
                       preferred_element_type=f32)    # (bt, n, n) f32
        s = s - jnp.max(s, axis=-1, keepdims=True)
        p = jnp.exp(s)
        p = p * pl.reciprocal(jnp.sum(p, axis=-1, keepdims=True), approx=True)
        oh = jnp.einsum('bqk,bkd->bqd', p.astype(bf16), vh,
                        preferred_element_type=f32)   # (bt, n, dh) f32
        head_outs.append(oh)

    o_heads = jnp.concatenate(head_outs, axis=-1) if heads > 1 else head_outs[0]
    o_flat = o_heads.reshape(bt * n, E).astype(bf16)  # merge rows, one cast
    # Single fused output projection (K = E), bias chain folded in wrapper.
    attn = jnp.dot(o_flat, wof[...], preferred_element_type=f32) + bof[...]
    x1 = attn + x

    # ---- MLP branch: mlp(norm2(x1)) + x1 ----
    h2 = _layernorm(x1, n2g[...], n2b[...])
    m = jnp.dot(h2.astype(bf16), w1[...], preferred_element_type=f32) + b1[...]
    m = _gelu_exact(m)
    m = jnp.dot(m.astype(bf16), w2[...], preferred_element_type=f32) + b2[...]
    o_ref[...] = (x1 + m).astype(o_ref.dtype)


FUSED_ORDER = ["n1g", "n1b", "wqf", "bqf", "wkf", "bkf", "wvf", "bvf",
               "wof", "bof", "n2g", "n2b", "w1", "b1", "w2", "b2"]


def _fuse_params(p, heads, dim_head):
    """Algebraic fusion of chained Linears; heavy weights cast to bf16."""
    scale = 1.0 / math.sqrt(dim_head)
    bf16 = jnp.bfloat16
    wqf = (p["wq"] @ p["wqi"]) * scale
    bqf = p["bqi"] * scale
    wkf = p["wk"] @ p["wki"]
    wvf = p["wv"] @ p["wvi"]
    wof = p["wo"] @ p["wout"]
    bof = p["bo"] @ p["wout"] + p["bout"]
    return dict(
        n1g=p["n1g"], n1b=p["n1b"],
        wqf=wqf.astype(bf16), bqf=bqf,
        wkf=wkf.astype(bf16), bkf=p["bki"],
        wvf=wvf.astype(bf16), bvf=p["bvi"],
        wof=wof.astype(bf16), bof=bof,
        n2g=p["n2g"], n2b=p["n2b"],
        w1=p["w1"].astype(bf16), b1=p["b1"],
        w2=p["w2"].astype(bf16), b2=p["b2"],
    )


def _pick_vmem_limit_bytes():
    """~75% of physical VMEM, capped at 100 MiB (128 MiB v5e/v6e -> 96 MiB,
    64 MiB v7x -> 48 MiB)."""
    cap = 128 * 1024 * 1024
    try:
        cap = int(pltpu.get_tpu_info().vmem_capacity_bytes)
    except Exception:
        pass
    return int(min(cap * 3 // 4, 100 * 1024 * 1024))


def _auto_batch_tile(B, N, D, E, mlp_dim, vmem_limit_bytes, weight_bytes):
    """Largest divisor of B giving >= 2 grid steps that fits the VMEM budget;
    fall back to any fitting divisor (grid of 1) only when unavoidable."""
    # Rough per-row working set: f32 x/out, q/k/v, attn out, MLP hidden,
    # plus bf16 copies; x2 slack for double-buffered I/O blocks + temporaries.
    row_bytes = 4 * (2 * D + 4 * E + mlp_dim) + 2 * (D + 4 * E + mlp_dim)
    budget = max(vmem_limit_bytes // 2 - 2 * weight_bytes, row_bytes * N)
    max_rows = max(budget // (2 * row_bytes), N)

    divisors = [bt for bt in range(1, B + 1) if B % bt == 0]
    two_step = [bt for bt in divisors if bt <= max(B // 2, 1) and bt * N <= max_rows]
    if two_step:
        return max(two_step)
    fitting = [bt for bt in divisors if bt * N <= max_rows]
    return max(fitting) if fitting else 1


def process_attention_block(x, params, *, heads, dim_head,
                            batch_tile=None, vmem_limit_bytes=None):
    B, N, D = x.shape
    E = heads * dim_head

    fused = _fuse_params(params, heads, dim_head)
    weights = [fused[k] for k in FUSED_ORDER]
    weight_bytes = sum(int(w.size) * w.dtype.itemsize for w in weights)
    mlp_dim = fused["w1"].shape[1]

    if vmem_limit_bytes is None:
        vmem_limit_bytes = _pick_vmem_limit_bytes()
    bt = (batch_tile if batch_tile is not None
          else _auto_batch_tile(B, N, D, E, mlp_dim, vmem_limit_bytes, weight_bytes))
    assert B % bt == 0, "batch_tile must divide batch"

    x_flat = x.reshape(B * N, D)                      # flat rows, contiguous I/O
    kern = functools.partial(block_kernel, heads, dim_head, bt, N, D)

    def build_and_run(single_buffer_weights):
        if single_buffer_weights:
            def wspec(shape):                          # grid-invariant weights
                return pl.BlockSpec(shape, lambda i: (0, 0),
                                    pipeline_mode=pl.Buffered(1))
        else:
            def wspec(shape):
                return pl.BlockSpec(shape, lambda i: (0, 0))

        in_specs = [pl.BlockSpec((bt * N, D), lambda i: (i, 0))]
        in_specs += [wspec(w.shape) for w in weights]
        return pl.pallas_call(
            kern,
            out_shape=jax.ShapeDtypeStruct((B * N, D), x.dtype),
            grid=(B // bt,),
            in_specs=in_specs,
            out_specs=pl.BlockSpec((bt * N, D), lambda i: (i, 0)),
            compiler_params=pltpu.CompilerParams(
                dimension_semantics=("parallel",),
                vmem_limit_bytes=int(vmem_limit_bytes)),
        )(x_flat, *weights)

    try:
        out = build_and_run(True)
    except Exception:
        # Some builds may reject pipeline_mode=Buffered(1); semantics are
        # identical with default buffering, so just retry.
        out = build_and_run(False)
    return out.reshape(B, N, D)


def reference(x, p, *, heads, dim_head):
    """Pure-JAX f32 reference: original unfused two-matmul projection path."""
    def ln(z, g, b):
        mu = jnp.mean(z, axis=-1, keepdims=True)
        var = jnp.mean((z - mu) ** 2, axis=-1, keepdims=True)
        return (z - mu) / jnp.sqrt(var + 1e-5) * g + b

    B, N, D = x.shape
    E = heads * dim_head
    h = ln(x, p["n1g"], p["n1b"])
    q = h @ p["wq"]
    k = h @ p["wk"]
    v = h @ p["wv"]
    qp = q @ p["wqi"] + p["bqi"]
    kp = k @ p["wki"] + p["bki"]
    vp = v @ p["wvi"] + p["bvi"]

    def split(z):
        return z.reshape(B, N, heads, dim_head).transpose(0, 2, 1, 3)

    qh, kh, vh = split(qp), split(kp), split(vp)
    s = jnp.einsum("bhqd,bhkd->bhqk", qh, kh) / math.sqrt(dim_head)
    pmat = jax.nn.softmax(s, axis=-1)
    o = jnp.einsum("bhqk,bhkd->bhqd", pmat, vh)
    o = o.transpose(0, 2, 1, 3).reshape(B, N, E)
    o = o @ p["wo"] + p["bo"]
    o = o @ p["wout"] + p["bout"]
    x1 = o + x

    h2 = ln(x1, p["n2g"], p["n2b"])
    m = h2 @ p["w1"] + p["b1"]
    m = 0.5 * m * (1.0 + jax.scipy.special.erf(m / math.sqrt(2.0)))
    m = m @ p["w2"] + p["b2"]
    return x1 + m


def make_params(key, dim, heads, dim_head, mlp_dim):
    E = heads * dim_head
    keys = iter(jax.random.split(key, 32))

    def lin(fan_in, fan_out):
        # stored directly as (in, out) — i.e. already W.T relative to PyTorch.
        return (jax.random.normal(next(keys), (fan_in, fan_out), jnp.float32)
                / math.sqrt(fan_in))

    def bias(n):
        return 0.1 * jax.random.normal(next(keys), (1, n), jnp.float32)

    return {
        "n1g": 1.0 + 0.1 * jax.random.normal(next(keys), (1, dim), jnp.float32),
        "n1b": 0.1 * jax.random.normal(next(keys), (1, dim), jnp.float32),
        "wq": lin(dim, E), "wk": lin(dim, E), "wv": lin(dim, E),   # bias=False
        "wqi": lin(E, E), "bqi": bias(E),      # MHA in_proj (q slice)
        "wki": lin(E, E), "bki": bias(E),      # MHA in_proj (k slice)
        "wvi": lin(E, E), "bvi": bias(E),      # MHA in_proj (v slice)
        "wo": lin(E, E), "bo": bias(E),        # MHA out_proj
        "wout": lin(E, dim), "bout": bias(dim),  # ProcessAttention.to_out
        "n2g": 1.0 + 0.1 * jax.random.normal(next(keys), (1, dim), jnp.float32),
        "n2b": 0.1 * jax.random.normal(next(keys), (1, dim), jnp.float32),
        "w1": lin(dim, mlp_dim), "b1": bias(mlp_dim),
        "w2": lin(mlp_dim, dim), "b2": bias(dim),
    }


if __name__ == "__main__":
    B, N = 4, 8
    dim, heads, dim_head, mlp_dim = 32, 4, 8, 64

    key = jax.random.PRNGKey(0)
    kx, kp = jax.random.split(key)
    x = jax.random.normal(kx, (B, N, dim), jnp.float32)
    params = make_params(kp, dim, heads, dim_head, mlp_dim)

    # batch_tile left to the auto-heuristic: picks bt=2 -> grid=(2,) so both
    # v7x TensorCores get work, while fitting the per-generation VMEM budget.
    out = process_attention_block(x, params, heads=heads, dim_head=dim_head)
    out = jax.block_until_ready(out)

    ref = reference(x, params, heads=heads, dim_head=dim_head)
    # bf16 matmul inputs + fused weights + approx reciprocal -> looser tol.
    np.testing.assert_allclose(np.asarray(out), np.asarray(ref),
                               rtol=3e-2, atol=3e-2)
    print("KERNEL_OK")
</pallas_src>

<mosaic_0001>
module attributes {stable_mosaic.version = 11 : i64} {
  func.func @block_kernel(%arg0: i32, %arg1: memref<16x32xf32, #tpu.memory_space<vmem>>, %arg2: memref<1x32xf32, #tpu.memory_space<vmem>>, %arg3: memref<1x32xf32, #tpu.memory_space<vmem>>, %arg4: memref<32x32xbf16, #tpu.memory_space<vmem>>, %arg5: memref<1x32xf32, #tpu.memory_space<vmem>>, %arg6: memref<32x32xbf16, #tpu.memory_space<vmem>>, %arg7: memref<1x32xf32, #tpu.memory_space<vmem>>, %arg8: memref<32x32xbf16, #tpu.memory_space<vmem>>, %arg9: memref<1x32xf32, #tpu.memory_space<vmem>>, %arg10: memref<32x32xbf16, #tpu.memory_space<vmem>>, %arg11: memref<1x32xf32, #tpu.memory_space<vmem>>, %arg12: memref<1x32xf32, #tpu.memory_space<vmem>>, %arg13: memref<1x32xf32, #tpu.memory_space<vmem>>, %arg14: memref<32x64xbf16, #tpu.memory_space<vmem>>, %arg15: memref<1x64xf32, #tpu.memory_space<vmem>>, %arg16: memref<64x32xbf16, #tpu.memory_space<vmem>>, %arg17: memref<1x32xf32, #tpu.memory_space<vmem>>, %arg18: memref<16x32xf32, #tpu.memory_space<vmem>>) attributes {dimension_semantics = [#tpu.dimension_semantics<parallel>], iteration_bounds = array<i64: 2>, scalar_prefetch = 0 : i64, scratch_operands = 0 : i64, tpu.core_type = #tpu.core_type<tc>, window_params = [{transform_indices = @transform_0, window_bounds = array<i64: 16, 32>}, {pipeline_mode = #tpu.pipeline_mode<synchronous>, transform_indices = @transform_1, window_bounds = array<i64: 1, 32>}, {pipeline_mode = #tpu.pipeline_mode<synchronous>, transform_indices = @transform_2, window_bounds = array<i64: 1, 32>}, {pipeline_mode = #tpu.pipeline_mode<synchronous>, transform_indices = @transform_3, window_bounds = array<i64: 32, 32>}, {pipeline_mode = #tpu.pipeline_mode<synchronous>, transform_indices = @transform_4, window_bounds = array<i64: 1, 32>}, {pipeline_mode = #tpu.pipeline_mode<synchronous>, transform_indices = @transform_5, window_bounds = array<i64: 32, 32>}, {pipeline_mode = #tpu.pipeline_mode<synchronous>, transform_indices = @transform_6, window_bounds = array<i64: 1, 32>}, {pipeline_mode = #tpu.pipeline_mode<synchronous>, transform_indices = @transform_7, window_bounds = array<i64: 32, 32>}, {pipeline_mode = #tpu.pipeline_mode<synchronous>, transform_indices = @transform_8, window_bounds = array<i64: 1, 32>}, {pipeline_mode = #tpu.pipeline_mode<synchronous>, transform_indices = @transform_9, window_bounds = array<i64: 32, 32>}, {pipeline_mode = #tpu.pipeline_mode<synchronous>, transform_indices = @transform_10, window_bounds = array<i64: 1, 32>}, {pipeline_mode = #tpu.pipeline_mode<synchronous>, transform_indices = @transform_11, window_bounds = array<i64: 1, 32>}, {pipeline_mode = #tpu.pipeline_mode<synchronous>, transform_indices = @transform_12, window_bounds = array<i64: 1, 32>}, {pipeline_mode = #tpu.pipeline_mode<synchronous>, transform_indices = @transform_13, window_bounds = array<i64: 32, 64>}, {pipeline_mode = #tpu.pipeline_mode<synchronous>, transform_indices = @transform_14, window_bounds = array<i64: 1, 64>}, {pipeline_mode = #tpu.pipeline_mode<synchronous>, transform_indices = @transform_15, window_bounds = array<i64: 64, 32>}, {pipeline_mode = #tpu.pipeline_mode<synchronous>, transform_indices = @transform_16, window_bounds = array<i64: 1, 32>}, {transform_indices = @transform_17, window_bounds = array<i64: 16, 32>}]} {
    %c0 = arith.constant 0 : index
    %c0_0 = arith.constant 0 : index
    %0 = vector.load %arg1[%c0, %c0_0] : memref<16x32xf32, #tpu.memory_space<vmem>>, vector<16x32xf32>
    %c0_1 = arith.constant 0 : index
    %c0_2 = arith.constant 0 : index
    %1 = vector.load %arg2[%c0_1, %c0_2] : memref<1x32xf32, #tpu.memory_space<vmem>>, vector<1x32xf32>
    %c0_3 = arith.constant 0 : index
    %c0_4 = arith.constant 0 : index
    %2 = vector.load %arg3[%c0_3, %c0_4] : memref<1x32xf32, #tpu.memory_space<vmem>>, vector<1x32xf32>
    %cst = arith.constant dense<0.000000e+00> : vector<16xf32>
    %3 = vector.multi_reduction <add>, %0, %cst [1] : vector<16x32xf32> to vector<16xf32>
    %4 = vector.shape_cast %3 : vector<16xf32> to vector<16x1xf32>
    %cst_5 = arith.constant 3.200000e+01 : f32
    %5 = vector.broadcast %cst_5 : f32 to vector<16x1xf32>
    %6 = arith.divf %4, %5 : vector<16x1xf32>
    %7 = vector.broadcast %6 : vector<16x1xf32> to vector<16x32xf32>
    %8 = arith.subf %0, %7 : vector<16x32xf32>
    %9 = arith.mulf %8, %8 : vector<16x32xf32>
    %cst_6 = arith.constant dense<0.000000e+00> : vector<16xf32>
    %10 = vector.multi_reduction <add>, %9, %cst_6 [1] : vector<16x32xf32> to vector<16xf32>
    %11 = vector.shape_cast %10 : vector<16xf32> to vector<16x1xf32>
    %cst_7 = arith.constant 3.200000e+01 : f32
    %12 = vector.broadcast %cst_7 : f32 to vector<16x1xf32>
    %13 = arith.divf %11, %12 : vector<16x1xf32>
    %14 = vector.broadcast %6 : vector<16x1xf32> to vector<16x32xf32>
    %15 = arith.subf %0, %14 : vector<16x32xf32>
    %cst_8 = arith.constant 9.99999974E-6 : f32
    %16 = vector.broadcast %cst_8 : f32 to vector<16x1xf32>
    %17 = arith.addf %13, %16 : vector<16x1xf32>
    %18 = math.rsqrt %17 : vector<16x1xf32>
    %19 = vector.broadcast %18 : vector<16x1xf32> to vector<16x32xf32>
    %20 = arith.mulf %15, %19 : vector<16x32xf32>
    %21 = vector.broadcast %1 : vector<1x32xf32> to vector<16x32xf32>
    %22 = arith.mulf %20, %21 : vector<16x32xf32>
    %23 = vector.broadcast %2 : vector<1x32xf32> to vector<16x32xf32>
    %24 = arith.addf %22, %23 : vector<16x32xf32>
    %25 = arith.truncf %24 : vector<16x32xf32> to vector<16x32xbf16>
    %c0_9 = arith.constant 0 : index
    %c0_10 = arith.constant 0 : index
    %26 = vector.load %arg4[%c0_9, %c0_10] : memref<32x32xbf16, #tpu.memory_space<vmem>>, vector<32x32xbf16>
    %cst_11 = arith.constant dense<0.000000e+00> : vector<16x32xf32>
    %27 = tpu.matmul %25, %26, %cst_11 {dimension_numbers = #tpu.dot_dimension_numbers<[1], [0], [0], [1], [0, 0, 1, 1], [], []>} : vector<16x32xbf16>, vector<32x32xbf16>, vector<16x32xf32> -> vector<16x32xf32>
    %c0_12 = arith.constant 0 : index
    %c0_13 = arith.constant 0 : index
    %28 = vector.load %arg5[%c0_12, %c0_13] : memref<1x32xf32, #tpu.memory_space<vmem>>, vector<1x32xf32>
    %29 = vector.broadcast %28 : vector<1x32xf32> to vector<16x32xf32>
    %30 = arith.addf %27, %29 : vector<16x32xf32>
    %31 = arith.truncf %30 : vector<16x32xf32> to vector<16x32xbf16>
    %c0_14 = arith.constant 0 : index
    %c0_15 = arith.constant 0 : index
    %32 = vector.load %arg6[%c0_14, %c0_15] : memref<32x32xbf16, #tpu.memory_space<vmem>>, vector<32x32xbf16>
    %cst_16 = arith.constant dense<0.000000e+00> : vector<16x32xf32>
    %33 = tpu.matmul %25, %32, %cst_16 {dimension_numbers = #tpu.dot_dimension_numbers<[1], [0], [0], [1], [0, 0, 1, 1], [], []>} : vector<16x32xbf16>, vector<32x32xbf16>, vector<16x32xf32> -> vector<16x32xf32>
    %c0_17 = arith.constant 0 : index
    %c0_18 = arith.constant 0 : index
    %34 = vector.load %arg7[%c0_17, %c0_18] : memref<1x32xf32, #tpu.memory_space<vmem>>, vector<1x32xf32>
    %35 = vector.broadcast %34 : vector<1x32xf32> to vector<16x32xf32>
    %36 = arith.addf %33, %35 : vector<16x32xf32>
    %37 = arith.truncf %36 : vector<16x32xf32> to vector<16x32xbf16>
    %c0_19 = arith.constant 0 : index
    %c0_20 = arith.constant 0 : index
    %38 = vector.load %arg8[%c0_19, %c0_20] : memref<32x32xbf16, #tpu.memory_space<vmem>>, vector<32x32xbf16>
    %cst_21 = arith.constant dense<0.000000e+00> : vector<16x32xf32>
    %39 = tpu.matmul %25, %38, %cst_21 {dimension_numbers = #tpu.dot_dimension_numbers<[1], [0], [0], [1], [0, 0, 1, 1], [], []>} : vector<16x32xbf16>, vector<32x32xbf16>, vector<16x32xf32> -> vector<16x32xf32>
    %c0_22 = arith.constant 0 : index
    %c0_23 = arith.constant 0 : index
    %40 = vector.load %arg9[%c0_22, %c0_23] : memref<1x32xf32, #tpu.memory_space<vmem>>, vector<1x32xf32>
    %41 = vector.broadcast %40 : vector<1x32xf32> to vector<16x32xf32>
    %42 = arith.addf %39, %41 : vector<16x32xf32>
    %43 = arith.truncf %42 : vector<16x32xf32> to vector<16x32xbf16>
    %44 = vector.shape_cast %31 : vector<16x32xbf16> to vector<2x8x32xbf16>
    %45 = vector.shape_cast %37 : vector<16x32xbf16> to vector<2x8x32xbf16>
    %46 = vector.shape_cast %43 : vector<16x32xbf16> to vector<2x8x32xbf16>
    %47 = vector.extract_strided_slice %44 {offsets = [0, 0, 0], sizes = [2, 8, 8], strides = [1, 1, 1]} : vector<2x8x32xbf16> to vector<2x8x8xbf16>
    %48 = vector.extract_strided_slice %45 {offsets = [0, 0, 0], sizes = [2, 8, 8], strides = [1, 1, 1]} : vector<2x8x32xbf16> to vector<2x8x8xbf16>
    %49 = vector.extract_strided_slice %46 {offsets = [0, 0, 0], sizes = [2, 8, 8], strides = [1, 1, 1]} : vector<2x8x32xbf16> to vector<2x8x8xbf16>
    "tpu.trace_start"() <{level = 10 : i32, message = "bqd,bkd->bqk"}> : () -> ()
    %cst_24 = arith.constant dense<0.000000e+00> : vector<2x8x8xf32>
    %50 = tpu.matmul %47, %48, %cst_24 {dimension_numbers = #tpu.dot_dimension_numbers<[2], [2], [1], [1], [0, 0, 0, 1, 1, 1], [0], [0]>} : vector<2x8x8xbf16>, vector<2x8x8xbf16>, vector<2x8x8xf32> -> vector<2x8x8xf32>
    "tpu.trace_stop"() : () -> ()
    %cst_25 = arith.constant dense<0xFF800000> : vector<2x8xf32>
    %51 = vector.multi_reduction <maximumf>, %50, %cst_25 [2] : vector<2x8x8xf32> to vector<2x8xf32>
    %52 = vector.shape_cast %51 : vector<2x8xf32> to vector<2x8x1xf32>
    %53 = vector.broadcast %52 : vector<2x8x1xf32> to vector<2x8x8xf32>
    %54 = arith.subf %50, %53 : vector<2x8x8xf32>
    %55 = math.exp %54 : vector<2x8x8xf32>
    %cst_26 = arith.constant dense<0.000000e+00> : vector<2x8xf32>
    %56 = vector.multi_reduction <add>, %55, %cst_26 [2] : vector<2x8x8xf32> to vector<2x8xf32>
    %57 = vector.shape_cast %56 : vector<2x8xf32> to vector<2x8x1xf32>
    %58 = tpu.reciprocal %57 {approx = true} : vector<2x8x1xf32> -> vector<2x8x1xf32>
    %59 = vector.broadcast %58 : vector<2x8x1xf32> to vector<2x8x8xf32>
    %60 = arith.mulf %55, %59 : vector<2x8x8xf32>
    %61 = arith.truncf %60 : vector<2x8x8xf32> to vector<2x8x8xbf16>
    "tpu.trace_start"() <{level = 10 : i32, message = "bqk,bkd->bqd"}> : () -> ()
    %cst_27 = arith.constant dense<0.000000e+00> : vector<2x8x8xf32>
    %62 = tpu.matmul %61, %49, %cst_27 {dimension_numbers = #tpu.dot_dimension_numbers<[2], [1], [1], [2], [0, 0, 0, 1, 1, 2], [0], [0]>} : vector<2x8x8xbf16>, vector<2x8x8xbf16>, vector<2x8x8xf32> -> vector<2x8x8xf32>
    "tpu.trace_stop"() : () -> ()
    %63 = vector.extract_strided_slice %44 {offsets = [0, 0, 8], sizes = [2, 8, 8], strides = [1, 1, 1]} : vector<2x8x32xbf16> to vector<2x8x8xbf16>
    %64 = vector.extract_strided_slice %45 {offsets = [0, 0, 8], sizes = [2, 8, 8], strides = [1, 1, 1]} : vector<2x8x32xbf16> to vector<2x8x8xbf16>
    %65 = vector.extract_strided_slice %46 {offsets = [0, 0, 8], sizes = [2, 8, 8], strides = [1, 1, 1]} : vector<2x8x32xbf16> to vector<2x8x8xbf16>
    "tpu.trace_start"() <{level = 10 : i32, message = "bqd,bkd->bqk"}> : () -> ()
    %cst_28 = arith.constant dense<0.000000e+00> : vector<2x8x8xf32>
    %66 = tpu.matmul %63, %64, %cst_28 {dimension_numbers = #tpu.dot_dimension_numbers<[2], [2], [1], [1], [0, 0, 0, 1, 1, 1], [0], [0]>} : vector<2x8x8xbf16>, vector<2x8x8xbf16>, vector<2x8x8xf32> -> vector<2x8x8xf32>
    "tpu.trace_stop"() : () -> ()
    %cst_29 = arith.constant dense<0xFF800000> : vector<2x8xf32>
    %67 = vector.multi_reduction <maximumf>, %66, %cst_29 [2] : vector<2x8x8xf32> to vector<2x8xf32>
    %68 = vector.shape_cast %67 : vector<2x8xf32> to vector<2x8x1xf32>
    %69 = vector.broadcast %68 : vector<2x8x1xf32> to vector<2x8x8xf32>
    %70 = arith.subf %66, %69 : vector<2x8x8xf32>
    %71 = math.exp %70 : vector<2x8x8xf32>
    %cst_30 = arith.constant dense<0.000000e+00> : vector<2x8xf32>
    %72 = vector.multi_reduction <add>, %71, %cst_30 [2] : vector<2x8x8xf32> to vector<2x8xf32>
    %73 = vector.shape_cast %72 : vector<2x8xf32> to vector<2x8x1xf32>
    %74 = tpu.reciprocal %73 {approx = true} : vector<2x8x1xf32> -> vector<2x8x1xf32>
    %75 = vector.broadcast %74 : vector<2x8x1xf32> to vector<2x8x8xf32>
    %76 = arith.mulf %71, %75 : vector<2x8x8xf32>
    %77 = arith.truncf %76 : vector<2x8x8xf32> to vector<2x8x8xbf16>
    "tpu.trace_start"() <{level = 10 : i32, message = "bqk,bkd->bqd"}> : () -> ()
    %cst_31 = arith.constant dense<0.000000e+00> : vector<2x8x8xf32>
    %78 = tpu.matmul %77, %65, %cst_31 {dimension_numbers = #tpu.dot_dimension_numbers<[2], [1], [1], [2], [0, 0, 0, 1, 1, 2], [0], [0]>} : vector<2x8x8xbf16>, vector<2x8x8xbf16>, vector<2x8x8xf32> -> vector<2x8x8xf32>
    "tpu.trace_stop"() : () -> ()
    %79 = vector.extract_strided_slice %44 {offsets = [0, 0, 16], sizes = [2, 8, 8], strides = [1, 1, 1]} : vector<2x8x32xbf16> to vector<2x8x8xbf16>
    %80 = vector.extract_strided_slice %45 {offsets = [0, 0, 16], sizes = [2, 8, 8], strides = [1, 1, 1]} : vector<2x8x32xbf16> to vector<2x8x8xbf16>
    %81 = vector.extract_strided_slice %46 {offsets = [0, 0, 16], sizes = [2, 8, 8], strides = [1, 1, 1]} : vector<2x8x32xbf16> to vector<2x8x8xbf16>
    "tpu.trace_start"() <{level = 10 : i32, message = "bqd,bkd->bqk"}> : () -> ()
    %cst_32 = arith.constant dense<0.000000e+00> : vector<2x8x8xf32>
    %82 = tpu.matmul %79, %80, %cst_32 {dimension_numbers = #tpu.dot_dimension_numbers<[2], [2], [1], [1], [0, 0, 0, 1, 1, 1], [0], [0]>} : vector<2x8x8xbf16>, vector<2x8x8xbf16>, vector<2x8x8xf32> -> vector<2x8x8xf32>
    "tpu.trace_stop"() : () -> ()
    %cst_33 = arith.constant dense<0xFF800000> : vector<2x8xf32>
    %83 = vector.multi_reduction <maximumf>, %82, %cst_33 [2] : vector<2x8x8xf32> to vector<2x8xf32>
    %84 = vector.shape_cast %83 : vector<2x8xf32> to vector<2x8x1xf32>
    %85 = vector.broadcast %84 : vector<2x8x1xf32> to vector<2x8x8xf32>
    %86 = arith.subf %82, %85 : vector<2x8x8xf32>
    %87 = math.exp %86 : vector<2x8x8xf32>
    %cst_34 = arith.constant dense<0.000000e+00> : vector<2x8xf32>
    %88 = vector.multi_reduction <add>, %87, %cst_34 [2] : vector<2x8x8xf32> to vector<2x8xf32>
    %89 = vector.shape_cast %88 : vector<2x8xf32> to vector<2x8x1xf32>
    %90 = tpu.reciprocal %89 {approx = true} : vector<2x8x1xf32> -> vector<2x8x1xf32>
    %91 = vector.broadcast %90 : vector<2x8x1xf32> to vector<2x8x8xf32>
    %92 = arith.mulf %87, %91 : vector<2x8x8xf32>
    %93 = arith.truncf %92 : vector<2x8x8xf32> to vector<2x8x8xbf16>
    "tpu.trace_start"() <{level = 10 : i32, message = "bqk,bkd->bqd"}> : () -> ()
    %cst_35 = arith.constant dense<0.000000e+00> : vector<2x8x8xf32>
    %94 = tpu.matmul %93, %81, %cst_35 {dimension_numbers = #tpu.dot_dimension_numbers<[2], [1], [1], [2], [0, 0, 0, 1, 1, 2], [0], [0]>} : vector<2x8x8xbf16>, vector<2x8x8xbf16>, vector<2x8x8xf32> -> vector<2x8x8xf32>
    "tpu.trace_stop"() : () -> ()
    %95 = vector.extract_strided_slice %44 {offsets = [0, 0, 24], sizes = [2, 8, 8], strides = [1, 1, 1]} : vector<2x8x32xbf16> to vector<2x8x8xbf16>
    %96 = vector.extract_strided_slice %45 {offsets = [0, 0, 24], sizes = [2, 8, 8], strides = [1, 1, 1]} : vector<2x8x32xbf16> to vector<2x8x8xbf16>
    %97 = vector.extract_strided_slice %46 {offsets = [0, 0, 24], sizes = [2, 8, 8], strides = [1, 1, 1]} : vector<2x8x32xbf16> to vector<2x8x8xbf16>
    "tpu.trace_start"() <{level = 10 : i32, message = "bqd,bkd->bqk"}> : () -> ()
    %cst_36 = arith.constant dense<0.000000e+00> : vector<2x8x8xf32>
    %98 = tpu.matmul %95, %96, %cst_36 {dimension_numbers = #tpu.dot_dimension_numbers<[2], [2], [1], [1], [0, 0, 0, 1, 1, 1], [0], [0]>} : vector<2x8x8xbf16>, vector<2x8x8xbf16>, vector<2x8x8xf32> -> vector<2x8x8xf32>
    "tpu.trace_stop"() : () -> ()
    %cst_37 = arith.constant dense<0xFF800000> : vector<2x8xf32>
    %99 = vector.multi_reduction <maximumf>, %98, %cst_37 [2] : vector<2x8x8xf32> to vector<2x8xf32>
    %100 = vector.shape_cast %99 : vector<2x8xf32> to vector<2x8x1xf32>
    %101 = vector.broadcast %100 : vector<2x8x1xf32> to vector<2x8x8xf32>
    %102 = arith.subf %98, %101 : vector<2x8x8xf32>
    %103 = math.exp %102 : vector<2x8x8xf32>
    %cst_38 = arith.constant dense<0.000000e+00> : vector<2x8xf32>
    %104 = vector.multi_reduction <add>, %103, %cst_38 [2] : vector<2x8x8xf32> to vector<2x8xf32>
    %105 = vector.shape_cast %104 : vector<2x8xf32> to vector<2x8x1xf32>
    %106 = tpu.reciprocal %105 {approx = true} : vector<2x8x1xf32> -> vector<2x8x1xf32>
    %107 = vector.broadcast %106 : vector<2x8x1xf32> to vector<2x8x8xf32>
    %108 = arith.mulf %103, %107 : vector<2x8x8xf32>
    %109 = arith.truncf %108 : vector<2x8x8xf32> to vector<2x8x8xbf16>
    "tpu.trace_start"() <{level = 10 : i32, message = "bqk,bkd->bqd"}> : () -> ()
    %cst_39 = arith.constant dense<0.000000e+00> : vector<2x8x8xf32>
    %110 = tpu.matmul %109, %97, %cst_39 {dimension_numbers = #tpu.dot_dimension_numbers<[2], [1], [1], [2], [0, 0, 0, 1, 1, 2], [0], [0]>} : vector<2x8x8xbf16>, vector<2x8x8xbf16>, vector<2x8x8xf32> -> vector<2x8x8xf32>
    "tpu.trace_stop"() : () -> ()
    %111 = tpu.concatenate %62, %78, %94, %110 in 2 : vector<2x8x8xf32>, vector<2x8x8xf32>, vector<2x8x8xf32>, vector<2x8x8xf32> -> vector<2x8x32xf32>
    %112 = vector.shape_cast %111 : vector<2x8x32xf32> to vector<16x32xf32>
    %113 = arith.truncf %112 : vector<16x32xf32> to vector<16x32xbf16>
    %c0_40 = arith.constant 0 : index
    %c0_41 = arith.constant 0 : index
    %114 = vector.load %arg10[%c0_40, %c0_41] : memref<32x32xbf16, #tpu.memory_space<vmem>>, vector<32x32xbf16>
    %cst_42 = arith.constant dense<0.000000e+00> : vector<16x32xf32>
    %115 = tpu.matmul %113, %114, %cst_42 {dimension_numbers = #tpu.dot_dimension_numbers<[1], [0], [0], [1], [0, 0, 1, 1], [], []>} : vector<16x32xbf16>, vector<32x32xbf16>, vector<16x32xf32> -> vector<16x32xf32>
    %c0_43 = arith.constant 0 : index
    %c0_44 = arith.constant 0 : index
    %116 = vector.load %arg11[%c0_43, %c0_44] : memref<1x32xf32, #tpu.memory_space<vmem>>, vector<1x32xf32>
    %117 = vector.broadcast %116 : vector<1x32xf32> to vector<16x32xf32>
    %118 = arith.addf %115, %117 : vector<16x32xf32>
    %119 = arith.addf %118, %0 : vector<16x32xf32>
    %c0_45 = arith.constant 0 : index
    %c0_46 = arith.constant 0 : index
    %120 = vector.load %arg12[%c0_45, %c0_46] : memref<1x32xf32, #tpu.memory_space<vmem>>, vector<1x32xf32>
    %c0_47 = arith.constant 0 : index
    %c0_48 = arith.constant 0 : index
    %121 = vector.load %arg13[%c0_47, %c0_48] : memref<1x32xf32, #tpu.memory_space<vmem>>, vector<1x32xf32>
    %cst_49 = arith.constant dense<0.000000e+00> : vector<16xf32>
    %122 = vector.multi_reduction <add>, %119, %cst_49 [1] : vector<16x32xf32> to vector<16xf32>
    %123 = vector.shape_cast %122 : vector<16xf32> to vector<16x1xf32>
    %cst_50 = arith.constant 3.200000e+01 : f32
    %124 = vector.broadcast %cst_50 : f32 to vector<16x1xf32>
    %125 = arith.divf %123, %124 : vector<16x1xf32>
    %126 = vector.broadcast %125 : vector<16x1xf32> to vector<16x32xf32>
    %127 = arith.subf %119, %126 : vector<16x32xf32>
    %128 = arith.mulf %127, %127 : vector<16x32xf32>
    %cst_51 = arith.constant dense<0.000000e+00> : vector<16xf32>
    %129 = vector.multi_reduction <add>, %128, %cst_51 [1] : vector<16x32xf32> to vector<16xf32>
    %130 = vector.shape_cast %129 : vector<16xf32> to vector<16x1xf32>
    %cst_52 = arith.constant 3.200000e+01 : f32
    %131 = vector.broadcast %cst_52 : f32 to vector<16x1xf32>
    %132 = arith.divf %130, %131 : vector<16x1xf32>
    %133 = vector.broadcast %125 : vector<16x1xf32> to vector<16x32xf32>
    %134 = arith.subf %119, %133 : vector<16x32xf32>
    %cst_53 = arith.constant 9.99999974E-6 : f32
    %135 = vector.broadcast %cst_53 : f32 to vector<16x1xf32>
    %136 = arith.addf %132, %135 : vector<16x1xf32>
    %137 = math.rsqrt %136 : vector<16x1xf32>
    %138 = vector.broadcast %137 : vector<16x1xf32> to vector<16x32xf32>
    %139 = arith.mulf %134, %138 : vector<16x32xf32>
    %140 = vector.broadcast %120 : vector<1x32xf32> to vector<16x32xf32>
    %141 = arith.mulf %139, %140 : vector<16x32xf32>
    %142 = vector.broadcast %121 : vector<1x32xf32> to vector<16x32xf32>
    %143 = arith.addf %141, %142 : vector<16x32xf32>
    %144 = arith.truncf %143 : vector<16x32xf32> to vector<16x32xbf16>
    %c0_54 = arith.constant 0 : index
    %c0_55 = arith.constant 0 : index
    %145 = vector.load %arg14[%c0_54, %c0_55] : memref<32x64xbf16, #tpu.memory_space<vmem>>, vector<32x64xbf16>
    %cst_56 = arith.constant dense<0.000000e+00> : vector<16x64xf32>
    %146 = tpu.matmul %144, %145, %cst_56 {dimension_numbers = #tpu.dot_dimension_numbers<[1], [0], [0], [1], [0, 0, 1, 1], [], []>} : vector<16x32xbf16>, vector<32x64xbf16>, vector<16x64xf32> -> vector<16x64xf32>
    %c0_57 = arith.constant 0 : index
    %c0_58 = arith.constant 0 : index
    %147 = vector.load %arg15[%c0_57, %c0_58] : memref<1x64xf32, #tpu.memory_space<vmem>>, vector<1x64xf32>
    %148 = vector.broadcast %147 : vector<1x64xf32> to vector<16x64xf32>
    %149 = arith.addf %146, %148 : vector<16x64xf32>
    %cst_59 = arith.constant 5.000000e-01 : f32
    %150 = vector.broadcast %cst_59 : f32 to vector<16x64xf32>
    %151 = arith.mulf %150, %149 : vector<16x64xf32>
    %cst_60 = arith.constant 0.707106769 : f32
    %152 = vector.broadcast %cst_60 : f32 to vector<16x64xf32>
    %153 = arith.mulf %149, %152 : vector<16x64xf32>
    %154 = math.erf %153 : vector<16x64xf32>
    %cst_61 = arith.constant 1.000000e+00 : f32
    %155 = vector.broadcast %cst_61 : f32 to vector<16x64xf32>
    %156 = arith.addf %155, %154 : vector<16x64xf32>
    %157 = arith.mulf %151, %156 : vector<16x64xf32>
    %158 = arith.truncf %157 : vector<16x64xf32> to vector<16x64xbf16>
    %c0_62 = arith.constant 0 : index
    %c0_63 = arith.constant 0 : index
    %159 = vector.load %arg16[%c0_62, %c0_63] : memref<64x32xbf16, #tpu.memory_space<vmem>>, vector<64x32xbf16>
    %cst_64 = arith.constant dense<0.000000e+00> : vector<16x32xf32>
    %160 = tpu.matmul %158, %159, %cst_64 {dimension_numbers = #tpu.dot_dimension_numbers<[1], [0], [0], [1], [0, 0, 1, 1], [], []>} : vector<16x64xbf16>, vector<64x32xbf16>, vector<16x32xf32> -> vector<16x32xf32>
    %c0_65 = arith.constant 0 : index
    %c0_66 = arith.constant 0 : index
    %161 = vector.load %arg17[%c0_65, %c0_66] : memref<1x32xf32, #tpu.memory_space<vmem>>, vector<1x32xf32>
    %162 = vector.broadcast %161 : vector<1x32xf32> to vector<16x32xf32>
    %163 = arith.addf %160, %162 : vector<16x32xf32>
    %164 = arith.addf %119, %163 : vector<16x32xf32>
    %c0_67 = arith.constant 0 : index
    %c0_68 = arith.constant 0 : index
    %165 = vector.load %arg18[%c0_67, %c0_68] : memref<16x32xf32, #tpu.memory_space<vmem>>, vector<16x32xf32>
    tpu.vector_store %arg18[%c0_67, %c0_68], %164 {strides = array<i32>} : memref<16x32xf32, #tpu.memory_space<vmem>>, vector<16x32xf32>,
    return
  }
  func.func @transform_0(%arg0: i32) -> (i32, i32) {
    %c0_i32 = arith.constant 0 : i32
    %c0_i32_0 = arith.constant 0 : i32
    return %arg0, %c0_i32 : i32, i32
  }
  func.func @transform_1(%arg0: i32) -> (i32, i32) {
    %c0_i32 = arith.constant 0 : i32
    %c0_i32_0 = arith.constant 0 : i32
    %c0_i32_1 = arith.constant 0 : i32
    return %c0_i32, %c0_i32_0 : i32, i32
  }
  func.func @transform_2(%arg0: i32) -> (i32, i32) {
    %c0_i32 = arith.constant 0 : i32
    %c0_i32_0 = arith.constant 0 : i32
    %c0_i32_1 = arith.constant 0 : i32
    return %c0_i32, %c0_i32_0 : i32, i32
  }
  func.func @transform_3(%arg0: i32) -> (i32, i32) {
    %c0_i32 = arith.constant 0 : i32
    %c0_i32_0 = arith.constant 0 : i32
    %c0_i32_1 = arith.constant 0 : i32
    return %c0_i32, %c0_i32_0 : i32, i32
  }
  func.func @transform_4(%arg0: i32) -> (i32, i32) {
    %c0_i32 = arith.constant 0 : i32
    %c0_i32_0 = arith.constant 0 : i32
    %c0_i32_1 = arith.constant 0 : i32
    return %c0_i32, %c0_i32_0 : i32, i32
  }
  func.func @transform_5(%arg0: i32) -> (i32, i32) {
    %c0_i32 = arith.constant 0 : i32
    %c0_i32_0 = arith.constant 0 : i32
    %c0_i32_1 = arith.constant 0 : i32
    return %c0_i32, %c0_i32_0 : i32, i32
  }
  func.func @transform_6(%arg0: i32) -> (i32, i32) {
    %c0_i32 = arith.constant 0 : i32
    %c0_i32_0 = arith.constant 0 : i32
    %c0_i32_1 = arith.constant 0 : i32
    return %c0_i32, %c0_i32_0 : i32, i32
  }
  func.func @transform_7(%arg0: i32) -> (i32, i32) {
    %c0_i32 = arith.constant 0 : i32
    %c0_i32_0 = arith.constant 0 : i32
    %c0_i32_1 = arith.constant 0 : i32
    return %c0_i32, %c0_i32_0 : i32, i32
  }
  func.func @transform_8(%arg0: i32) -> (i32, i32) {
    %c0_i32 = arith.constant 0 : i32
    %c0_i32_0 = arith.constant 0 : i32
    %c0_i32_1 = arith.constant 0 : i32
    return %c0_i32, %c0_i32_0 : i32, i32
  }
  func.func @transform_9(%arg0: i32) -> (i32, i32) {
    %c0_i32 = arith.constant 0 : i32
    %c0_i32_0 = arith.constant 0 : i32
    %c0_i32_1 = arith.constant 0 : i32
    return %c0_i32, %c0_i32_0 : i32, i32
  }
  func.func @transform_10(%arg0: i32) -> (i32, i32) {
    %c0_i32 = arith.constant 0 : i32
    %c0_i32_0 = arith.constant 0 : i32
    %c0_i32_1 = arith.constant 0 : i32
    return %c0_i32, %c0_i32_0 : i32, i32
  }
  func.func @transform_11(%arg0: i32) -> (i32, i32) {
    %c0_i32 = arith.constant 0 : i32
    %c0_i32_0 = arith.constant 0 : i32
    %c0_i32_1 = arith.constant 0 : i32
    return %c0_i32, %c0_i32_0 : i32, i32
  }
  func.func @transform_12(%arg0: i32) -> (i32, i32) {
    %c0_i32 = arith.constant 0 : i32
    %c0_i32_0 = arith.constant 0 : i32
    %c0_i32_1 = arith.constant 0 : i32
    return %c0_i32, %c0_i32_0 : i32, i32
  }
  func.func @transform_13(%arg0: i32) -> (i32, i32) {
    %c0_i32 = arith.constant 0 : i32
    %c0_i32_0 = arith.constant 0 : i32
    %c0_i32_1 = arith.constant 0 : i32
    return %c0_i32, %c0_i32_0 : i32, i32
  }
  func.func @transform_14(%arg0: i32) -> (i32, i32) {
    %c0_i32 = arith.constant 0 : i32
    %c0_i32_0 = arith.constant 0 : i32
    %c0_i32_1 = arith.constant 0 : i32
    return %c0_i32, %c0_i32_0 : i32, i32
  }
  func.func @transform_15(%arg0: i32) -> (i32, i32) {
    %c0_i32 = arith.constant 0 : i32
    %c0_i32_0 = arith.constant 0 : i32
    %c0_i32_1 = arith.constant 0 : i32
    return %c0_i32, %c0_i32_0 : i32, i32
  }
  func.func @transform_16(%arg0: i32) -> (i32, i32) {
    %c0_i32 = arith.constant 0 : i32
    %c0_i32_0 = arith.constant 0 : i32
    %c0_i32_1 = arith.constant 0 : i32
    return %c0_i32, %c0_i32_0 : i32, i32
  }
  func.func @transform_17(%arg0: i32) -> (i32, i32) {
    %c0_i32 = arith.constant 0 : i32
    %c0_i32_0 = arith.constant 0 : i32
    return %arg0, %c0_i32 : i32, i32
  }
}

module attributes {stable_mosaic.version = 11 : i64} {
  func.func @block_kernel(%arg0: i32, %arg1: memref<16x32xf32, #tpu.memory_space<vmem>>, %arg2: memref<1x32xf32, #tpu.memory_space<vmem>>, %arg3: memref<1x32xf32, #tpu.memory_space<vmem>>, %arg4: memref<32x32xbf16, #tpu.memory_space<vmem>>, %arg5: memref<1x32xf32, #tpu.memory_space<vmem>>, %arg6: memref<32x32xbf16, #tpu.memory_space<vmem>>, %arg7: memref<1x32xf32, #tpu.memory_space<vmem>>, %arg8: memref<32x32xbf16, #tpu.memory_space<vmem>>, %arg9: memref<1x32xf32, #tpu.memory_space<vmem>>, %arg10: memref<32x32xbf16, #tpu.memory_space<vmem>>, %arg11: memref<1x32xf32, #tpu.memory_space<vmem>>, %arg12: memref<1x32xf32, #tpu.memory_space<vmem>>, %arg13: memref<1x32xf32, #tpu.memory_space<vmem>>, %arg14: memref<32x64xbf16, #tpu.memory_space<vmem>>, %arg15: memref<1x64xf32, #tpu.memory_space<vmem>>, %arg16: memref<64x32xbf16, #tpu.memory_space<vmem>>, %arg17: memref<1x32xf32, #tpu.memory_space<vmem>>, %arg18: memref<16x32xf32, #tpu.memory_space<vmem>>) attributes {dimension_semantics = [#tpu.dimension_semantics<parallel>], iteration_bounds = array<i64: 2>, scalar_prefetch = 0 : i64, scratch_operands = 0 : i64, tpu.core_type = #tpu.core_type<tc>, window_params = [{transform_indices = @transform_0, window_bounds = array<i64: 16, 32>}, {pipeline_mode = #tpu.pipeline_mode<synchronous>, transform_indices = @transform_1, window_bounds = array<i64: 1, 32>}, {pipeline_mode = #tpu.pipeline_mode<synchronous>, transform_indices = @transform_2, window_bounds = array<i64: 1, 32>}, {pipeline_mode = #tpu.pipeline_mode<synchronous>, transform_indices = @transform_3, window_bounds = array<i64: 32, 32>}, {pipeline_mode = #tpu.pipeline_mode<synchronous>, transform_indices = @transform_4, window_bounds = array<i64: 1, 32>}, {pipeline_mode = #tpu.pipeline_mode<synchronous>, transform_indices = @transform_5, window_bounds = array<i64: 32, 32>}, {pipeline_mode = #tpu.pipeline_mode<synchronous>, transform_indices = @transform_6, window_bounds = array<i64: 1, 32>}, {pipeline_mode = #tpu.pipeline_mode<synchronous>, transform_indices = @transform_7, window_bounds = array<i64: 32, 32>}, {pipeline_mode = #tpu.pipeline_mode<synchronous>, transform_indices = @transform_8, window_bounds = array<i64: 1, 32>}, {pipeline_mode = #tpu.pipeline_mode<synchronous>, transform_indices = @transform_9, window_bounds = array<i64: 32, 32>}, {pipeline_mode = #tpu.pipeline_mode<synchronous>, transform_indices = @transform_10, window_bounds = array<i64: 1, 32>}, {pipeline_mode = #tpu.pipeline_mode<synchronous>, transform_indices = @transform_11, window_bounds = array<i64: 1, 32>}, {pipeline_mode = #tpu.pipeline_mode<synchronous>, transform_indices = @transform_12, window_bounds = array<i64: 1, 32>}, {pipeline_mode = #tpu.pipeline_mode<synchronous>, transform_indices = @transform_13, window_bounds = array<i64: 32, 64>}, {pipeline_mode = #tpu.pipeline_mode<synchronous>, transform_indices = @transform_14, window_bounds = array<i64: 1, 64>}, {pipeline_mode = #tpu.pipeline_mode<synchronous>, transform_indices = @transform_15, window_bounds = array<i64: 64, 32>}, {pipeline_mode = #tpu.pipeline_mode<synchronous>, transform_indices = @transform_16, window_bounds = array<i64: 1, 32>}, {transform_indices = @transform_17, window_bounds = array<i64: 16, 32>}]} {
    %c0 = arith.constant 0 : index
    %c0_0 = arith.constant 0 : index
    %0 = vector.load %arg1[%c0, %c0_0] : memref<16x32xf32, #tpu.memory_space<vmem>>, vector<16x32xf32>
    %c0_1 = arith.constant 0 : index
    %c0_2 = arith.constant 0 : index
    %1 = vector.load %arg2[%c0_1, %c0_2] : memref<1x32xf32, #tpu.memory_space<vmem>>, vector<1x32xf32>
    %c0_3 = arith.constant 0 : index
    %c0_4 = arith.constant 0 : index
    %2 = vector.load %arg3[%c0_3, %c0_4] : memref<1x32xf32, #tpu.memory_space<vmem>>, vector<1x32xf32>
    %cst = arith.constant dense<0.000000e+00> : vector<16xf32>
    %3 = vector.multi_reduction <add>, %0, %cst [1] : vector<16x32xf32> to vector<16xf32>
    %4 = vector.shape_cast %3 : vector<16xf32> to vector<16x1xf32>
    %cst_5 = arith.constant 3.200000e+01 : f32
    %5 = vector.broadcast %cst_5 : f32 to vector<16x1xf32>
    %6 = arith.divf %4, %5 : vector<16x1xf32>
    %7 = vector.broadcast %6 : vector<16x1xf32> to vector<16x32xf32>
    %8 = arith.subf %0, %7 : vector<16x32xf32>
    %9 = arith.mulf %8, %8 : vector<16x32xf32>
    %cst_6 = arith.constant dense<0.000000e+00> : vector<16xf32>
    %10 = vector.multi_reduction <add>, %9, %cst_6 [1] : vector<16x32xf32> to vector<16xf32>
    %11 = vector.shape_cast %10 : vector<16xf32> to vector<16x1xf32>
    %cst_7 = arith.constant 3.200000e+01 : f32
    %12 = vector.broadcast %cst_7 : f32 to vector<16x1xf32>
    %13 = arith.divf %11, %12 : vector<16x1xf32>
    %14 = vector.broadcast %6 : vector<16x1xf32> to vector<16x32xf32>
    %15 = arith.subf %0, %14 : vector<16x32xf32>
    %cst_8 = arith.constant 9.99999974E-6 : f32
    %16 = vector.broadcast %cst_8 : f32 to vector<16x1xf32>
    %17 = arith.addf %13, %16 : vector<16x1xf32>
    %18 = math.rsqrt %17 : vector<16x1xf32>
    %19 = vector.broadcast %18 : vector<16x1xf32> to vector<16x32xf32>
    %20 = arith.mulf %15, %19 : vector<16x32xf32>
    %21 = vector.broadcast %1 : vector<1x32xf32> to vector<16x32xf32>
    %22 = arith.mulf %20, %21 : vector<16x32xf32>
    %23 = vector.broadcast %2 : vector<1x32xf32> to vector<16x32xf32>
    %24 = arith.addf %22, %23 : vector<16x32xf32>
    %25 = arith.truncf %24 : vector<16x32xf32> to vector<16x32xbf16>
    %c0_9 = arith.constant 0 : index
    %c0_10 = arith.constant 0 : index
    %26 = vector.load %arg4[%c0_9, %c0_10] : memref<32x32xbf16, #tpu.memory_space<vmem>>, vector<32x32xbf16>
    %cst_11 = arith.constant dense<0.000000e+00> : vector<16x32xf32>
    %27 = tpu.matmul %25, %26, %cst_11 {dimension_numbers = #tpu.dot_dimension_numbers<[1], [0], [0], [1], [0, 0, 1, 1], [], []>} : vector<16x32xbf16>, vector<32x32xbf16>, vector<16x32xf32> -> vector<16x32xf32>
    %c0_12 = arith.constant 0 : index
    %c0_13 = arith.constant 0 : index
    %28 = vector.load %arg5[%c0_12, %c0_13] : memref<1x32xf32, #tpu.memory_space<vmem>>, vector<1x32xf32>
    %29 = vector.broadcast %28 : vector<1x32xf32> to vector<16x32xf32>
    %30 = arith.addf %27, %29 : vector<16x32xf32>
    %31 = arith.truncf %30 : vector<16x32xf32> to vector<16x32xbf16>
    %c0_14 = arith.constant 0 : index
    %c0_15 = arith.constant 0 : index
    %32 = vector.load %arg6[%c0_14, %c0_15] : memref<32x32xbf16, #tpu.memory_space<vmem>>, vector<32x32xbf16>
    %cst_16 = arith.constant dense<0.000000e+00> : vector<16x32xf32>
    %33 = tpu.matmul %25, %32, %cst_16 {dimension_numbers = #tpu.dot_dimension_numbers<[1], [0], [0], [1], [0, 0, 1, 1], [], []>} : vector<16x32xbf16>, vector<32x32xbf16>, vector<16x32xf32> -> vector<16x32xf32>
    %c0_17 = arith.constant 0 : index
    %c0_18 = arith.constant 0 : index
    %34 = vector.load %arg7[%c0_17, %c0_18] : memref<1x32xf32, #tpu.memory_space<vmem>>, vector<1x32xf32>
    %35 = vector.broadcast %34 : vector<1x32xf32> to vector<16x32xf32>
    %36 = arith.addf %33, %35 : vector<16x32xf32>
    %37 = arith.truncf %36 : vector<16x32xf32> to vector<16x32xbf16>
    %c0_19 = arith.constant 0 : index
    %c0_20 = arith.constant 0 : index
    %38 = vector.load %arg8[%c0_19, %c0_20] : memref<32x32xbf16, #tpu.memory_space<vmem>>, vector<32x32xbf16>
    %cst_21 = arith.constant dense<0.000000e+00> : vector<16x32xf32>
    %39 = tpu.matmul %25, %38, %cst_21 {dimension_numbers = #tpu.dot_dimension_numbers<[1], [0], [0], [1], [0, 0, 1, 1], [], []>} : vector<16x32xbf16>, vector<32x32xbf16>, vector<16x32xf32> -> vector<16x32xf32>
    %c0_22 = arith.constant 0 : index
    %c0_23 = arith.constant 0 : index
    %40 = vector.load %arg9[%c0_22, %c0_23] : memref<1x32xf32, #tpu.memory_space<vmem>>, vector<1x32xf32>
    %41 = vector.broadcast %40 : vector<1x32xf32> to vector<16x32xf32>
    %42 = arith.addf %39, %41 : vector<16x32xf32>
    %43 = arith.truncf %42 : vector<16x32xf32> to vector<16x32xbf16>
    %44 = vector.shape_cast %31 : vector<16x32xbf16> to vector<2x8x32xbf16>
    %45 = vector.shape_cast %37 : vector<16x32xbf16> to vector<2x8x32xbf16>
    %46 = vector.shape_cast %43 : vector<16x32xbf16> to vector<2x8x32xbf16>
    %47 = vector.extract_strided_slice %44 {offsets = [0, 0, 0], sizes = [2, 8, 8], strides = [1, 1, 1]} : vector<2x8x32xbf16> to vector<2x8x8xbf16>
    %48 = vector.extract_strided_slice %45 {offsets = [0, 0, 0], sizes = [2, 8, 8], strides = [1, 1, 1]} : vector<2x8x32xbf16> to vector<2x8x8xbf16>
    %49 = vector.extract_strided_slice %46 {offsets = [0, 0, 0], sizes = [2, 8, 8], strides = [1, 1, 1]} : vector<2x8x32xbf16> to vector<2x8x8xbf16>
    "tpu.trace_start"() <{level = 10 : i32, message = "bqd,bkd->bqk"}> : () -> ()
    %cst_24 = arith.constant dense<0.000000e+00> : vector<2x8x8xf32>
    %50 = tpu.matmul %47, %48, %cst_24 {dimension_numbers = #tpu.dot_dimension_numbers<[2], [2], [1], [1], [0, 0, 0, 1, 1, 1], [0], [0]>} : vector<2x8x8xbf16>, vector<2x8x8xbf16>, vector<2x8x8xf32> -> vector<2x8x8xf32>
    "tpu.trace_stop"() : () -> ()
    %cst_25 = arith.constant dense<0xFF800000> : vector<2x8xf32>
    %51 = vector.multi_reduction <maximumf>, %50, %cst_25 [2] : vector<2x8x8xf32> to vector<2x8xf32>
    %52 = vector.shape_cast %51 : vector<2x8xf32> to vector<2x8x1xf32>
    %53 = vector.broadcast %52 : vector<2x8x1xf32> to vector<2x8x8xf32>
    %54 = arith.subf %50, %53 : vector<2x8x8xf32>
    %55 = math.exp %54 : vector<2x8x8xf32>
    %cst_26 = arith.constant dense<0.000000e+00> : vector<2x8xf32>
    %56 = vector.multi_reduction <add>, %55, %cst_26 [2] : vector<2x8x8xf32> to vector<2x8xf32>
    %57 = vector.shape_cast %56 : vector<2x8xf32> to vector<2x8x1xf32>
    %58 = tpu.reciprocal %57 {approx = true} : vector<2x8x1xf32> -> vector<2x8x1xf32>
    %59 = vector.broadcast %58 : vector<2x8x1xf32> to vector<2x8x8xf32>
    %60 = arith.mulf %55, %59 : vector<2x8x8xf32>
    %61 = arith.truncf %60 : vector<2x8x8xf32> to vector<2x8x8xbf16>
    "tpu.trace_start"() <{level = 10 : i32, message = "bqk,bkd->bqd"}> : () -> ()
    %cst_27 = arith.constant dense<0.000000e+00> : vector<2x8x8xf32>
    %62 = tpu.matmul %61, %49, %cst_27 {dimension_numbers = #tpu.dot_dimension_numbers<[2], [1], [1], [2], [0, 0, 0, 1, 1, 2], [0], [0]>} : vector<2x8x8xbf16>, vector<2x8x8xbf16>, vector<2x8x8xf32> -> vector<2x8x8xf32>
    "tpu.trace_stop"() : () -> ()
    %63 = vector.extract_strided_slice %44 {offsets = [0, 0, 8], sizes = [2, 8, 8], strides = [1, 1, 1]} : vector<2x8x32xbf16> to vector<2x8x8xbf16>
    %64 = vector.extract_strided_slice %45 {offsets = [0, 0, 8], sizes = [2, 8, 8], strides = [1, 1, 1]} : vector<2x8x32xbf16> to vector<2x8x8xbf16>
    %65 = vector.extract_strided_slice %46 {offsets = [0, 0, 8], sizes = [2, 8, 8], strides = [1, 1, 1]} : vector<2x8x32xbf16> to vector<2x8x8xbf16>
    "tpu.trace_start"() <{level = 10 : i32, message = "bqd,bkd->bqk"}> : () -> ()
    %cst_28 = arith.constant dense<0.000000e+00> : vector<2x8x8xf32>
    %66 = tpu.matmul %63, %64, %cst_28 {dimension_numbers = #tpu.dot_dimension_numbers<[2], [2], [1], [1], [0, 0, 0, 1, 1, 1], [0], [0]>} : vector<2x8x8xbf16>, vector<2x8x8xbf16>, vector<2x8x8xf32> -> vector<2x8x8xf32>
    "tpu.trace_stop"() : () -> ()
    %cst_29 = arith.constant dense<0xFF800000> : vector<2x8xf32>
    %67 = vector.multi_reduction <maximumf>, %66, %cst_29 [2] : vector<2x8x8xf32> to vector<2x8xf32>
    %68 = vector.shape_cast %67 : vector<2x8xf32> to vector<2x8x1xf32>
    %69 = vector.broadcast %68 : vector<2x8x1xf32> to vector<2x8x8xf32>
    %70 = arith.subf %66, %69 : vector<2x8x8xf32>
    %71 = math.exp %70 : vector<2x8x8xf32>
    %cst_30 = arith.constant dense<0.000000e+00> : vector<2x8xf32>
    %72 = vector.multi_reduction <add>, %71, %cst_30 [2] : vector<2x8x8xf32> to vector<2x8xf32>
    %73 = vector.shape_cast %72 : vector<2x8xf32> to vector<2x8x1xf32>
    %74 = tpu.reciprocal %73 {approx = true} : vector<2x8x1xf32> -> vector<2x8x1xf32>
    %75 = vector.broadcast %74 : vector<2x8x1xf32> to vector<2x8x8xf32>
    %76 = arith.mulf %71, %75 : vector<2x8x8xf32>
    %77 = arith.truncf %76 : vector<2x8x8xf32> to vector<2x8x8xbf16>
    "tpu.trace_start"() <{level = 10 : i32, message = "bqk,bkd->bqd"}> : () -> ()
    %cst_31 = arith.constant dense<0.000000e+00> : vector<2x8x8xf32>
    %78 = tpu.matmul %77, %65, %cst_31 {dimension_numbers = #tpu.dot_dimension_numbers<[2], [1], [1], [2], [0, 0, 0, 1, 1, 2], [0], [0]>} : vector<2x8x8xbf16>, vector<2x8x8xbf16>, vector<2x8x8xf32> -> vector<2x8x8xf32>
    "tpu.trace_stop"() : () -> ()
    %79 = vector.extract_strided_slice %44 {offsets = [0, 0, 16], sizes = [2, 8, 8], strides = [1, 1, 1]} : vector<2x8x32xbf16> to vector<2x8x8xbf16>
    %80 = vector.extract_strided_slice %45 {offsets = [0, 0, 16], sizes = [2, 8, 8], strides = [1, 1, 1]} : vector<2x8x32xbf16> to vector<2x8x8xbf16>
    %81 = vector.extract_strided_slice %46 {offsets = [0, 0, 16], sizes = [2, 8, 8], strides = [1, 1, 1]} : vector<2x8x32xbf16> to vector<2x8x8xbf16>
    "tpu.trace_start"() <{level = 10 : i32, message = "bqd,bkd->bqk"}> : () -> ()
    %cst_32 = arith.constant dense<0.000000e+00> : vector<2x8x8xf32>
    %82 = tpu.matmul %79, %80, %cst_32 {dimension_numbers = #tpu.dot_dimension_numbers<[2], [2], [1], [1], [0, 0, 0, 1, 1, 1], [0], [0]>} : vector<2x8x8xbf16>, vector<2x8x8xbf16>, vector<2x8x8xf32> -> vector<2x8x8xf32>
    "tpu.trace_stop"() : () -> ()
    %cst_33 = arith.constant dense<0xFF800000> : vector<2x8xf32>
    %83 = vector.multi_reduction <maximumf>, %82, %cst_33 [2] : vector<2x8x8xf32> to vector<2x8xf32>
    %84 = vector.shape_cast %83 : vector<2x8xf32> to vector<2x8x1xf32>
    %85 = vector.broadcast %84 : vector<2x8x1xf32> to vector<2x8x8xf32>
    %86 = arith.subf %82, %85 : vector<2x8x8xf32>
    %87 = math.exp %86 : vector<2x8x8xf32>
    %cst_34 = arith.constant dense<0.000000e+00> : vector<2x8xf32>
    %88 = vector.multi_reduction <add>, %87, %cst_34 [2] : vector<2x8x8xf32> to vector<2x8xf32>
    %89 = vector.shape_cast %88 : vector<2x8xf32> to vector<2x8x1xf32>
    %90 = tpu.reciprocal %89 {approx = true} : vector<2x8x1xf32> -> vector<2x8x1xf32>
    %91 = vector.broadcast %90 : vector<2x8x1xf32> to vector<2x8x8xf32>
    %92 = arith.mulf %87, %91 : vector<2x8x8xf32>
    %93 = arith.truncf %92 : vector<2x8x8xf32> to vector<2x8x8xbf16>
    "tpu.trace_start"() <{level = 10 : i32, message = "bqk,bkd->bqd"}> : () -> ()
    %cst_35 = arith.constant dense<0.000000e+00> : vector<2x8x8xf32>
    %94 = tpu.matmul %93, %81, %cst_35 {dimension_numbers = #tpu.dot_dimension_numbers<[2], [1], [1], [2], [0, 0, 0, 1, 1, 2], [0], [0]>} : vector<2x8x8xbf16>, vector<2x8x8xbf16>, vector<2x8x8xf32> -> vector<2x8x8xf32>
    "tpu.trace_stop"() : () -> ()
    %95 = vector.extract_strided_slice %44 {offsets = [0, 0, 24], sizes = [2, 8, 8], strides = [1, 1, 1]} : vector<2x8x32xbf16> to vector<2x8x8xbf16>
    %96 = vector.extract_strided_slice %45 {offsets = [0, 0, 24], sizes = [2, 8, 8], strides = [1, 1, 1]} : vector<2x8x32xbf16> to vector<2x8x8xbf16>
    %97 = vector.extract_strided_slice %46 {offsets = [0, 0, 24], sizes = [2, 8, 8], strides = [1, 1, 1]} : vector<2x8x32xbf16> to vector<2x8x8xbf16>
    "tpu.trace_start"() <{level = 10 : i32, message = "bqd,bkd->bqk"}> : () -> ()
    %cst_36 = arith.constant dense<0.000000e+00> : vector<2x8x8xf32>
    %98 = tpu.matmul %95, %96, %cst_36 {dimension_numbers = #tpu.dot_dimension_numbers<[2], [2], [1], [1], [0, 0, 0, 1, 1, 1], [0], [0]>} : vector<2x8x8xbf16>, vector<2x8x8xbf16>, vector<2x8x8xf32> -> vector<2x8x8xf32>
    "tpu.trace_stop"() : () -> ()
    %cst_37 = arith.constant dense<0xFF800000> : vector<2x8xf32>
    %99 = vector.multi_reduction <maximumf>, %98, %cst_37 [2] : vector<2x8x8xf32> to vector<2x8xf32>
    %100 = vector.shape_cast %99 : vector<2x8xf32> to vector<2x8x1xf32>
    %101 = vector.broadcast %100 : vector<2x8x1xf32> to vector<2x8x8xf32>
    %102 = arith.subf %98, %101 : vector<2x8x8xf32>
    %103 = math.exp %102 : vector<2x8x8xf32>
    %cst_38 = arith.constant dense<0.000000e+00> : vector<2x8xf32>
    %104 = vector.multi_reduction <add>, %103, %cst_38 [2] : vector<2x8x8xf32> to vector<2x8xf32>
    %105 = vector.shape_cast %104 : vector<2x8xf32> to vector<2x8x1xf32>
    %106 = tpu.reciprocal %105 {approx = true} : vector<2x8x1xf32> -> vector<2x8x1xf32>
    %107 = vector.broadcast %106 : vector<2x8x1xf32> to vector<2x8x8xf32>
    %108 = arith.mulf %103, %107 : vector<2x8x8xf32>
    %109 = arith.truncf %108 : vector<2x8x8xf32> to vector<2x8x8xbf16>
    "tpu.trace_start"() <{level = 10 : i32, message = "bqk,bkd->bqd"}> : () -> ()
    %cst_39 = arith.constant dense<0.000000e+00> : vector<2x8x8xf32>
    %110 = tpu.matmul %109, %97, %cst_39 {dimension_numbers = #tpu.dot_dimension_numbers<[2], [1], [1], [2], [0, 0, 0, 1, 1, 2], [0], [0]>} : vector<2x8x8xbf16>, vector<2x8x8xbf16>, vector<2x8x8xf32> -> vector<2x8x8xf32>
    "tpu.trace_stop"() : () -> ()
    %111 = tpu.concatenate %62, %78, %94, %110 in 2 : vector<2x8x8xf32>, vector<2x8x8xf32>, vector<2x8x8xf32>, vector<2x8x8xf32> -> vector<2x8x32xf32>
    %112 = vector.shape_cast %111 : vector<2x8x32xf32> to vector<16x32xf32>
    %113 = arith.truncf %112 : vector<16x32xf32> to vector<16x32xbf16>
    %c0_40 = arith.constant 0 : index
    %c0_41 = arith.constant 0 : index
    %114 = vector.load %arg10[%c0_40, %c0_41] : memref<32x32xbf16, #tpu.memory_space<vmem>>, vector<32x32xbf16>
    %cst_42 = arith.constant dense<0.000000e+00> : vector<16x32xf32>
    %115 = tpu.matmul %113, %114, %cst_42 {dimension_numbers = #tpu.dot_dimension_numbers<[1], [0], [0], [1], [0, 0, 1, 1], [], []>} : vector<16x32xbf16>, vector<32x32xbf16>, vector<16x32xf32> -> vector<16x32xf32>
    %c0_43 = arith.constant 0 : index
    %c0_44 = arith.constant 0 : index
    %116 = vector.load %arg11[%c0_43, %c0_44] : memref<1x32xf32, #tpu.memory_space<vmem>>, vector<1x32xf32>
    %117 = vector.broadcast %116 : vector<1x32xf32> to vector<16x32xf32>
    %118 = arith.addf %115, %117 : vector<16x32xf32>
    %119 = arith.addf %118, %0 : vector<16x32xf32>
    %c0_45 = arith.constant 0 : index
    %c0_46 = arith.constant 0 : index
    %120 = vector.load %arg12[%c0_45, %c0_46] : memref<1x32xf32, #tpu.memory_space<vmem>>, vector<1x32xf32>
    %c0_47 = arith.constant 0 : index
    %c0_48 = arith.constant 0 : index
    %121 = vector.load %arg13[%c0_47, %c0_48] : memref<1x32xf32, #tpu.memory_space<vmem>>, vector<1x32xf32>
    %cst_49 = arith.constant dense<0.000000e+00> : vector<16xf32>
    %122 = vector.multi_reduction <add>, %119, %cst_49 [1] : vector<16x32xf32> to vector<16xf32>
    %123 = vector.shape_cast %122 : vector<16xf32> to vector<16x1xf32>
    %cst_50 = arith.constant 3.200000e+01 : f32
    %124 = vector.broadcast %cst_50 : f32 to vector<16x1xf32>
    %125 = arith.divf %123, %124 : vector<16x1xf32>
    %126 = vector.broadcast %125 : vector<16x1xf32> to vector<16x32xf32>
    %127 = arith.subf %119, %126 : vector<16x32xf32>
    %128 = arith.mulf %127, %127 : vector<16x32xf32>
    %cst_51 = arith.constant dense<0.000000e+00> : vector<16xf32>
    %129 = vector.multi_reduction <add>, %128, %cst_51 [1] : vector<16x32xf32> to vector<16xf32>
    %130 = vector.shape_cast %129 : vector<16xf32> to vector<16x1xf32>
    %cst_52 = arith.constant 3.200000e+01 : f32
    %131 = vector.broadcast %cst_52 : f32 to vector<16x1xf32>
    %132 = arith.divf %130, %131 : vector<16x1xf32>
    %133 = vector.broadcast %125 : vector<16x1xf32> to vector<16x32xf32>
    %134 = arith.subf %119, %133 : vector<16x32xf32>
    %cst_53 = arith.constant 9.99999974E-6 : f32
    %135 = vector.broadcast %cst_53 : f32 to vector<16x1xf32>
    %136 = arith.addf %132, %135 : vector<16x1xf32>
    %137 = math.rsqrt %136 : vector<16x1xf32>
    %138 = vector.broadcast %137 : vector<16x1xf32> to vector<16x32xf32>
    %139 = arith.mulf %134, %138 : vector<16x32xf32>
    %140 = vector.broadcast %120 : vector<1x32xf32> to vector<16x32xf32>
    %141 = arith.mulf %139, %140 : vector<16x32xf32>
    %142 = vector.broadcast %121 : vector<1x32xf32> to vector<16x32xf32>
    %143 = arith.addf %141, %142 : vector<16x32xf32>
    %144 = arith.truncf %143 : vector<16x32xf32> to vector<16x32xbf16>
    %c0_54 = arith.constant 0 : index
    %c0_55 = arith.constant 0 : index
    %145 = vector.load %arg14[%c0_54, %c0_55] : memref<32x64xbf16, #tpu.memory_space<vmem>>, vector<32x64xbf16>
    %cst_56 = arith.constant dense<0.000000e+00> : vector<16x64xf32>
    %146 = tpu.matmul %144, %145, %cst_56 {dimension_numbers = #tpu.dot_dimension_numbers<[1], [0], [0], [1], [0, 0, 1, 1], [], []>} : vector<16x32xbf16>, vector<32x64xbf16>, vector<16x64xf32> -> vector<16x64xf32>
    %c0_57 = arith.constant 0 : index
    %c0_58 = arith.constant 0 : index
    %147 = vector.load %arg15[%c0_57, %c0_58] : memref<1x64xf32, #tpu.memory_space<vmem>>, vector<1x64xf32>
    %148 = vector.broadcast %147 : vector<1x64xf32> to vector<16x64xf32>
    %149 = arith.addf %146, %148 : vector<16x64xf32>
    %cst_59 = arith.constant 5.000000e-01 : f32
    %150 = vector.broadcast %cst_59 : f32 to vector<16x64xf32>
    %151 = arith.mulf %150, %149 : vector<16x64xf32>
    %cst_60 = arith.constant 0.707106769 : f32
    %152 = vector.broadcast %cst_60 : f32 to vector<16x64xf32>
    %153 = arith.mulf %149, %152 : vector<16x64xf32>
    %154 = math.erf %153 : vector<16x64xf32>
    %cst_61 = arith.constant 1.000000e+00 : f32
    %155 = vector.broadcast %cst_61 : f32 to vector<16x64xf32>
    %156 = arith.addf %155, %154 : vector<16x64xf32>
    %157 = arith.mulf %151, %156 : vector<16x64xf32>
    %158 = arith.truncf %157 : vector<16x64xf32> to vector<16x64xbf16>
    %c0_62 = arith.constant 0 : index
    %c0_63 = arith.constant 0 : index
    %159 = vector.load %arg16[%c0_62, %c0_63] : memref<64x32xbf16, #tpu.memory_space<vmem>>, vector<64x32xbf16>
    %cst_64 = arith.constant dense<0.000000e+00> : vector<16x32xf32>
    %160 = tpu.matmul %158, %159, %cst_64 {dimension_numbers = #tpu.dot_dimension_numbers<[1], [0], [0], [1], [0, 0, 1, 1], [], []>} : vector<16x64xbf16>, vector<64x32xbf16>, vector<16x32xf32> -> vector<16x32xf32>
    %c0_65 = arith.constant 0 : index
    %c0_66 = arith.constant 0 : index
    %161 = vector.load %arg17[%c0_65, %c0_66] : memref<1x32xf32, #tpu.memory_space<vmem>>, vector<1x32xf32>
    %162 = vector.broadcast %161 : vector<1x32xf32> to vector<16x32xf32>
    %163 = arith.addf %160, %162 : vector<16x32xf32>
    %164 = arith.addf %119, %163 : vector<16x32xf32>
    %c0_67 = arith.constant 0 : index
    %c0_68 = arith.constant 0 : index
    %165 = vector.load %arg18[%c0_67, %c0_68] : memref<16x32xf32, #tpu.memory_space<vmem>>, vector<16x32xf32>
    tpu.vector_store %arg18[%c0_67, %c0_68], %164 {strides = array<i32>} : memref<16x32xf32, #tpu.memory_space<vmem>>, vector<16x32xf32>,
    return
  }
  func.func @transform_0(%arg0: i32) -> (i32, i32) {
    %c0_i32 = arith.constant 0 : i32
    %c0_i32_0 = arith.constant 0 : i32
    return %arg0, %c0_i32 : i32, i32
  }
  func.func @transform_1(%arg0: i32) -> (i32, i32) {
    %c0_i32 = arith.constant 0 : i32
    %c0_i32_0 = arith.constant 0 : i32
    %c0_i32_1 = arith.constant 0 : i32
    return %c0_i32, %c0_i32_0 : i32, i32
  }
  func.func @transform_2(%arg0: i32) -> (i32, i32) {
    %c0_i32 = arith.constant 0 : i32
    %c0_i32_0 = arith.constant 0 : i32
    %c0_i32_1 = arith.constant 0 : i32
    return %c0_i32, %c0_i32_0 : i32, i32
  }
  func.func @transform_3(%arg0: i32) -> (i32, i32) {
    %c0_i32 = arith.constant 0 : i32
    %c0_i32_0 = arith.constant 0 : i32
    %c0_i32_1 = arith.constant 0 : i32
    return %c0_i32, %c0_i32_0 : i32, i32
  }
  func.func @transform_4(%arg0: i32) -> (i32, i32) {
    %c0_i32 = arith.constant 0 : i32
    %c0_i32_0 = arith.constant 0 : i32
    %c0_i32_1 = arith.constant 0 : i32
    return %c0_i32, %c0_i32_0 : i32, i32
  }
  func.func @transform_5(%arg0: i32) -> (i32, i32) {
    %c0_i32 = arith.constant 0 : i32
    %c0_i32_0 = arith.constant 0 : i32
    %c0_i32_1 = arith.constant 0 : i32
    return %c0_i32, %c0_i32_0 : i32, i32
  }
  func.func @transform_6(%arg0: i32) -> (i32, i32) {
    %c0_i32 = arith.constant 0 : i32
    %c0_i32_0 = arith.constant 0 : i32
    %c0_i32_1 = arith.constant 0 : i32
    return %c0_i32, %c0_i32_0 : i32, i32
  }
  func.func @transform_7(%arg0: i32) -> (i32, i32) {
    %c0_i32 = arith.constant 0 : i32
    %c0_i32_0 = arith.constant 0 : i32
    %c0_i32_1 = arith.constant 0 : i32
    return %c0_i32, %c0_i32_0 : i32, i32
  }
  func.func @transform_8(%arg0: i32) -> (i32, i32) {
    %c0_i32 = arith.constant 0 : i32
    %c0_i32_0 = arith.constant 0 : i32
    %c0_i32_1 = arith.constant 0 : i32
    return %c0_i32, %c0_i32_0 : i32, i32
  }
  func.func @transform_9(%arg0: i32) -> (i32, i32) {
    %c0_i32 = arith.constant 0 : i32
    %c0_i32_0 = arith.constant 0 : i32
    %c0_i32_1 = arith.constant 0 : i32
    return %c0_i32, %c0_i32_0 : i32, i32
  }
  func.func @transform_10(%arg0: i32) -> (i32, i32) {
    %c0_i32 = arith.constant 0 : i32
    %c0_i32_0 = arith.constant 0 : i32
    %c0_i32_1 = arith.constant 0 : i32
    return %c0_i32, %c0_i32_0 : i32, i32
  }
  func.func @transform_11(%arg0: i32) -> (i32, i32) {
    %c0_i32 = arith.constant 0 : i32
    %c0_i32_0 = arith.constant 0 : i32
    %c0_i32_1 = arith.constant 0 : i32
    return %c0_i32, %c0_i32_0 : i32, i32
  }
  func.func @transform_12(%arg0: i32) -> (i32, i32) {
    %c0_i32 = arith.constant 0 : i32
    %c0_i32_0 = arith.constant 0 : i32
    %c0_i32_1 = arith.constant 0 : i32
    return %c0_i32, %c0_i32_0 : i32, i32
  }
  func.func @transform_13(%arg0: i32) -> (i32, i32) {
    %c0_i32 = arith.constant 0 : i32
    %c0_i32_0 = arith.constant 0 : i32
    %c0_i32_1 = arith.constant 0 : i32
    return %c0_i32, %c0_i32_0 : i32, i32
  }
  func.func @transform_14(%arg0: i32) -> (i32, i32) {
    %c0_i32 = arith.constant 0 : i32
    %c0_i32_0 = arith.constant 0 : i32
    %c0_i32_1 = arith.constant 0 : i32
    return %c0_i32, %c0_i32_0 : i32, i32
  }
  func.func @transform_15(%arg0: i32) -> (i32, i32) {
    %c0_i32 = arith.constant 0 : i32
    %c0_i32_0 = arith.constant 0 : i32
    %c0_i32_1 = arith.constant 0 : i32
    return %c0_i32, %c0_i32_0 : i32, i32
  }
  func.func @transform_16(%arg0: i32) -> (i32, i32) {
    %c0_i32 = arith.constant 0 : i32
    %c0_i32_0 = arith.constant 0 : i32
    %c0_i32_1 = arith.constant 0 : i32
    return %c0_i32, %c0_i32_0 : i32, i32
  }
  func.func @transform_17(%arg0: i32) -> (i32, i32) {
    %c0_i32 = arith.constant 0 : i32
    %c0_i32_0 = arith.constant 0 : i32
    return %arg0, %c0_i32 : i32, i32
  }
}

</mosaic_0001>

<bundles_post_ra>
// kernel: tpu_custom_call.1
= control target key start
LH: loop header
LB: loop body
LE: loop exit
PB: predicated region body
PF: predicated region fallthrough
CT: control target
= control target key end

     0   :  { %s2668_s0 = inlined_call_operand.vmem [shape: f32[32,32], index: 0, kind: input, shape index: {}]   ;;  %s2669_s1 = inlined_call_operand.hbm [shape: f32[1,32], index: 1, kind: input, shape index: {}]   ;;  %s2670_s2 = inlined_call_operand.vmem [shape: f32[1,32], index: 2, kind: input, shape index: {}]   ;;  %s2671_s3 = inlined_call_operand.vmem [shape: bf16[32,32], index: 3, kind: input, shape index: {}]   ;;  %s2672_s4 = inlined_call_operand.vmem [shape: f32[1,32], index: 4, kind: input, shape index: {}]   ;;  %s2673_s5 = inlined_call_operand.hbm [shape: bf16[32,32], index: 5, kind: input, shape index: {}]   ;;  %s2674_s6 = inlined_call_operand.vmem [shape: f32[1,32], index: 6, kind: input, shape index: {}]   ;;  %s2675_s7 = inlined_call_operand.hbm [shape: bf16[32,32], index: 7, kind: input, shape index: {}]   ;;  %s2676_s8 = inlined_call_operand.vmem [shape: f32[1,32], index: 8, kind: input, shape index: {}]   ;;  %s2677_s9 = inlined_call_operand.hbm [shape: bf16[32,32], index: 9, kind: input, shape index: {}]   ;;  %s2678_s10 = inlined_call_operand.vmem [shape: f32[1,32], index: 10, kind: input, shape index: {}]   ;;  %s2679_s11 = inlined_call_operand.vmem [shape: f32[1,32], index: 11, kind: input, shape index: {}]   ;;  %s2680_s12 = inlined_call_operand.vmem [shape: f32[1,32], index: 12, kind: input, shape index: {}]   ;;  %s2681_s13 = inlined_call_operand.hbm [shape: bf16[32,64], index: 13, kind: input, shape index: {}]   ;;  %s2682_s14 = inlined_call_operand.vmem [shape: f32[1,64], index: 14, kind: input, shape index: {}]   ;;  %s2683_s15 = inlined_call_operand.vmem [shape: bf16[64,32], index: 15, kind: input, shape index: {}]   ;;  %s2684_s16 = inlined_call_operand.vmem [shape: f32[1,32], index: 16, kind: input, shape index: {}]   ;;  %s2685_s17 = inlined_call_operand.hbm [shape: f32[32,32], index: 17, kind: output, shape index: {}]  }
   0x1   :  { %2696 = sst [smem:[#allocation24_spill]] %s2668_s0 }
   0x2   :  { %2697 = sst [smem:[#allocation25_spill]] %s2669_s1 }
   0x3   :  { %2698 = sst [smem:[#allocation26_spill]] %s2673_s5 }
   0x4   :  { %2699 = sst [smem:[#allocation27_spill]] %s2677_s9 }
   0x5   :  { %2700 = sst [smem:[#allocation28_spill]] %s2684_s16 }
   0x6   :  { %2701 = sst [smem:[#allocation29_spill]] %s2685_s17 }
   0x7   :  { %22 = vsyncpa [#allocation3], 0 }
   0x8   :  { %23 = vsyncpa [#allocation6], 0 }
   0x9   :  { %24 = vsyncpa [#allocation9], 0 }
   0xa   :  { %25 = vsyncpa [#allocation4], 0 }
   0xb   :  { %27 = vsyncpa [#allocation4 + $0x1], 0  ;;  %s2326_s24 = smov 0   ;;  %s2328_s25 = smov 0  }
   0xc   :  { %s2330_s26 = smov 0   ;;  %s2332_s27 = smov 0  }
   0xd LB: > { %2702 = sst [smem:[#allocation16_spill]] %s2207_s24  ;;  %s2347_s28 = sadd.s32 4294967295, %s2219_s27   ;;  %s2219_s27 = sphi %s2332_s27, %s2726_s27   ;;  %s2215_s26 = sphi %s2330_s26, %s2729_s26   ;;  %s2211_s25 = sphi %s2328_s25, %s2728_s25   ;;  %s2207_s24 = sphi %s2326_s24, %s2727_s24  }
   0xe   : > { %2703 = sst [smem:[#allocation17_spill]] %s2211_s25  ;;  %s1707_s29 = sadd.s32 4294967294, %s2219_s27  }
   0xf   : > { %2704 = sst [smem:[#allocation18_spill]] %s2215_s26  ;;  %s2351_s0 = sadd.s32 1, %s2219_s27  }
  0x10   : > { %2705 = sst [smem:[#allocation19_spill]] %s2219_s27  ;;  %s402_s30 = sadd.s32 1, %s2215_s26 }
  0x11   : > { %2706 = sst [smem:[#allocation20_spill]] %s2351_s0  ;;  %s399_s18 = ssub.s32 %s2219_s27, %s2351_s0 }
  0x12   : > { %p412_p0 = scmp.ne.s32.totalorder %s2215_s26, %s2211_s25  ;;  %p400_p1 = scmp.eq.s32.totalorder %s399_s18, 0 }
  0x13   : > { %p413_p2 = scmp.eq.s32.totalorder %s2347_s28, 1  ;;  %p418_p3 = scmp.ne.s32.totalorder %s2211_s25, %s2207_s24 }
  0x14   : > { %p419_p4 = scmp.eq.s32.totalorder %s1707_s29, 1  ;;  %p1708_p7 = scmp.ge.s32.totalorder %s2219_s27, 1 }
  0x15   : > { %s2362_s19 = scalar_select %p400_p1, %s2215_s26, %s402_s30  }
  0x16   : > { %p2364_p5 = por %p413_p2, %p412_p0  ;;  %p2368_p6 = por %p419_p4, %p418_p3 }
  0x17   : > { %2707 = sst [smem:[#allocation21_spill]] %s2362_s19  ;;  %p426_p8 = scmp.lt.s32.totalorder %s2219_s27, 3 }
  0x18   : > { %s2708_s1 = scalar_select %p2364_p5, 1, 0 }
  0x19   : > { %s2710_s20 = scalar_select %p2368_p6, 1, 0 }
  0x1a   : > { %2709 = sst [smem:[#allocation22_spill]] %s2708_s1  ;;  %p1866_p9 = scmp.eq.s32.totalorder %s2347_s28, 0 }
  0x1b   : > { %2711 = sst [smem:[#allocation23_spill]] %s2710_s20  ;;  %p2375_p10 = pnand %p1708_p7, %p426_p8 }
  0x1c   : > { %s2713_s5 = sld [smem:[#allocation26_spill]]  ;;  %s2221_s30 = smov [#allocation5]  }
  0x1d   : > { %p1846_p11 = pneg %p2375_p10  ;;  %s460_s18 = sshll.u32 %s2221_s30, 4  ;;  %s461_s18 = int_to_ptr.vmem [resolvable:$true] %s460_s18 }
  0x1e   : > { %s2715_s9 = sld [smem:[#allocation27_spill]]  ;;  %s2222_s22 = smov 64  }
  0x1f   : > { %p2386_p12 = pnand %p1866_p9, %p1846_p11  ;;  %s2223_s23 = smov 4  }
  0x20   : > { %s2716_s17 = sld [smem:[#allocation25_spill]]  ;;  %s2225_s16 = smov [#allocation2]  }
  0x21   : > { %s440_s25 = sshll.u32 %s2225_s16, 4  ;;  %s2227_s27 = smov [#allocation10]   ;;  %s441_s25 = int_to_ptr.vmem [resolvable:$true] %s440_s25 }
  0x22   : > { %s458_s29 = sshll.u32 %s2713_s5, 4  ;;  %s2224_s5 = smov [#allocation8]   ;;  %s459_s29 = int_to_ptr.hbm [resolvable:$true] %s458_s29 }
  0x23   : > { %1852 = dma.hbm_to_vmem [thread:$0]  (!%p2386_p12), %s459_s29, 256, %s461_s18, [#allocation6], %s2222_s22, %s2222_s22, %s2223_s23  }
  0x24   : > { %s492_s20 = sshll.u32 %s2715_s9, 4  ;;  %s494_s30 = sshll.u32 %s2224_s5, 4  ;;  %s493_s20 = int_to_ptr.hbm [resolvable:$true] %s492_s20  ;;  %s495_s30 = int_to_ptr.vmem [resolvable:$true] %s494_s30 }
  0x25   : > { %1858 = dma.hbm_to_vmem [thread:$0]  (!%p2386_p12), %s493_s20, 256, %s495_s30, [#allocation9], %s2222_s22, %s2222_s22, %s2223_s23  }
  0x26   : > { %s438_s1 = sshll.u32 %s2716_s17, 4  ;;  %s475_s9 = sshll.u32 %s2675_s7, 4  ;;  %s439_s1 = int_to_ptr.hbm [resolvable:$true] %s438_s1  ;;  %s476_s9 = int_to_ptr.hbm [resolvable:$true] %s475_s9 }
  0x27   : > { %1849 = dma.hbm_to_vmem [thread:$0]  (!%p2386_p12), %s439_s1, 16, %s441_s25, [#allocation3]  }
  0x28   : > { %s2226_s5 = smov [#allocation7]   ;;  %s515_s17 = sshll.u32 %s2681_s13, 4  ;;  %s516_s17 = int_to_ptr.hbm [resolvable:$true] %s515_s17 }
  0x29   : > { %s477_s29 = sshll.u32 %s2226_s5, 4  ;;  %s517_s20 = sshll.u32 %s2227_s27, 4  ;;  %s478_s29 = int_to_ptr.vmem [resolvable:$true] %s477_s29  ;;  %s518_s20 = int_to_ptr.vmem [resolvable:$true] %s517_s20 }
  0x2a   : > { %1855 = dma.hbm_to_vmem [thread:$0]  (!%p2386_p12), %s476_s9, 256, %s478_s29, [#allocation6], %s2222_s22, %s2222_s22, %s2223_s23  }
  0x2b   : > { %1861 = dma.hbm_to_vmem [thread:$0]  (!%p2386_p12), %s516_s17, 256, %s518_s20, [#allocation9], %s2222_s22, %s2222_s22, %s2223_s23  }
  0x2c   : > { %551 = sbr.rel (%p2375_p10) target bundleno = 2010 (0x7da), region = 88 }
  0x31   : > { %2190 = dma.done.wait (%p1866_p9), [#allocation3], 16  }
  0x32   : > { %2192 = vsyncadd (%p1866_p9), [#allocation3], 4294967280 }
  0x33   : > { %2194 = dma.done.wait (%p1866_p9), [#allocation6], 512  }
  0x34   : > { %2196 = vsyncadd (%p1866_p9), [#allocation6], 4294966784 }
  0x35   : > { %2198 = dma.done.wait (%p1866_p9), [#allocation9], 512  }
  0x36   : > { %2200 = vsyncadd (%p1866_p9), [#allocation9], 4294966784  ;;  %s1722_s9 = sshll.u32 %s2347_s28, 1  ;;  %vm636_vm0 = vcmask 261120   ;;  %s2717_s1 = sld [smem:[#allocation24_spill]]  ;;  %v2228_v4 = vmov 32.0  }
  0x37   : > { %p625_p13 = scmp.lt.s32.totalorder %s1722_s9, 3  ;;  %1949 = vrcp.f32 %v2228_v4  ;;  %v1810_v21 = vld [vmem:[%s2671_s3 + $0x8] sm:$0xff]  ;;  %v1814_v23 = vld [vmem:[#allocation7 + $0x8] sm:$0xff]  ;;  %v1813_v28 = vld [vmem:[#allocation7] sm:$0xff]  ;;  %vm810_vm8 = vcmask 64512   ;;  %vm876_vm9 = vcmask 1043456  }
  0x38   : > { %v1812_v22 = vld [vmem:[#allocation5 + $0x8] sm:$0xff]  ;;  %728 = vmatpush.bf16.msra.mxu0 %v1810_v21  ;;  %v1809_v25 = vld [vmem:[%s2671_s3] sm:$0xff]  ;;  %800 = vmatpush.bf16.msra.mxu2 %v1814_v23  ;;  %s2231_s25 = smov 104   ;;  %s2232_s19 = smov 8   ;;  %vm1292_vm10 = vcmask 130048   ;;  %vm1295_vm11 = vcmask 195584  }
  0x39   : > { %s2731_s9 = smov (!%p625_p13, %s1722_s9), 3  ;;  %764 = vmatpush.bf16.msra.mxu1 %v1812_v22  ;;  %v1811_v26 = vld [vmem:[#allocation5] sm:$0xff]  ;;  %v1939_v46 = vld [vmem:[#allocation2] ss:$0 sm:$0xff]  ;;  %s2719_s26 = sld [smem:[#allocation28_spill]] }
  0x3a   : > { %s1723_s16 = sshll.u32 %s2731_s9, 3  ;;  %v1940_v51 = vld [vmem:[%s2670_s2] ss:$0 sm:$0xff]  ;;  %s2229_s9 = smov 120  }
  0x3b   : > { %v1941_v56 = vld [vmem:[%s2672_s4] ss:$0 sm:$0xff]  ;;  %s1823_s5 = sshll.u32 %s2347_s28, 4  ;;  %s2721_s27 = sld [smem:[#allocation29_spill]] }
  0x3c   : > { %s628_s21 = scalar_lea.vmem %s2717_s1, %s1723_s16  ;;  %729 = vmatpush.bf16.msra.mxu0 %v1809_v25  ;;  %801 = vmatpush.bf16.msra.mxu2 %v1813_v28  ;;  %v1942_v57 = vld [vmem:[%s2674_s6] ss:$0 sm:$0xff]  ;;  %s2230_s16 = smov 112  }
  0x3d   : > { %v2430_v0 = vld [vmem:[%s628_s21] sm:$0xff]  ;;  %v2434_v2 = vld [vmem:[%s628_s21 + $0x8] sm:$0xff]  ;;  %v1950_v5 = vpop.eup %1949  ;;  %765 = vmatpush.bf16.msra.mxu1 %v1811_v26  ;;  %s2233_s1 = smov 16   ;;  %s2234_s21 = smov 24  }
  0x3e   : > { %v637_v1 = vsel %vm636_vm0, %v2430_v0, 0.0  ;;  %v640_v3 = vsel %vm636_vm0, %v2434_v2, 0.0  ;;  %v644_v6 = vmul.f32 32.0, %v1950_v5  ;;  %vm648_vm1 = vweird.f32 %v1950_v5 }
  0x3f   : > { %638 = vadd.xlane.f32.xlu0 %v637_v1  ;;  %v1943_v1 = vld [vmem:[%s2676_s8] ss:$0 sm:$0xff] }
  0x40   : > { %v645_v7 = vsub.f32 1.0, %v644_v6 }
  0x41   : > { %s2722_s20 = smov %s2721_s27 }
  0x42   : > { %v646_v8 = vmul.f32 %v1950_v5, %v645_v7 }
  0x44   : > { %v647_v9 = vadd.f32 %v1950_v5, %v646_v8 }
  0x46   : > { %v2438_v10 = vsel %vm648_vm1, %v1950_v5, %v647_v9 }
  0x47   : > { %641 = vadd.xlane.f32.xlu0 %v640_v3 }
  0xb2   : > { %v639_v11 = vpop.xlane.xlu0 %638 }
  0xb3   : > { %v650_v12 = vmul.f32 %v2438_v10, %v639_v11 }
  0xb5   : > { %v652_v13 = vsub.f32 %v2430_v0, %v650_v12 }
  0xb7   : > { %v654_v14 = vmul.f32 %v652_v13, %v652_v13 }
  0xb9   : > { %v656_v15 = vsel %vm636_vm0, %v654_v14, 0.0 }
  0xba   : > { %657 = vadd.xlane.f32.xlu1 %v656_v15  ;;  %v642_v16 = vpop.xlane.xlu0 %641 }
  0xbb   : > { %v651_v17 = vmul.f32 %v2438_v10, %v642_v16 }
  0xbd   : > { %v653_v18 = vsub.f32 %v2434_v2, %v651_v17 }
  0xbf   : > { %v655_v19 = vmul.f32 %v653_v18, %v653_v18 }
  0xc1   : > { %v659_v20 = vsel %vm636_vm0, %v655_v19, 0.0 }
  0xc2   : > { %660 = vadd.xlane.f32.xlu1 %v659_v20 }
 0x12d   : > { %v658_v24 = vpop.xlane.xlu1 %657 }
 0x12e   : > { %v662_v27 = vmul.f32 %v658_v24, %v2438_v10 }
 0x130   : > { %v664_v29 = vadd.f32 1e-05, %v662_v27 }
 0x132   : > { %1951 = vrsqrt.f32 %v664_v29  ;;  %vm672_vm3 = vweird.f32 %v664_v29 }
 0x135   : > { %v661_v30 = vpop.xlane.xlu1 %660 }
 0x136   : > { %v663_v31 = vmul.f32 %v661_v30, %v2438_v10 }
 0x138   : > { %v1952_v32 = vpop.eup %1951  ;;  %v665_v33 = vadd.f32 1e-05, %v663_v31 }
 0x139   : > { %v667_v34 = vmul.f32 %v1952_v32, %v664_v29  ;;  %vm673_vm2 = vweird.f32 %v1952_v32 }
 0x13a   : > { %1953 = vrsqrt.f32 %v665_v33  ;;  %vm674_vm4 = vmor %vm672_vm3, %vm673_vm2  ;;  %vm682_vm6 = vweird.f32 %v665_v33 }
 0x13b   : > { %v668_v35 = vmul.f32 %v1952_v32, %v667_v34 }
 0x13d   : > { %v669_v36 = vmul.f32 0.5, %v668_v35 }
 0x13f   : > { %v670_v37 = vsub.f32 1.5, %v669_v36 }
 0x140   : > { %v1954_v38 = vpop.eup %1953 }
 0x141   : > { %v671_v39 = vmul.f32 %v1952_v32, %v670_v37  ;;  %v677_v40 = vmul.f32 %v1954_v38, %v665_v33  ;;  %vm683_vm5 = vweird.f32 %v1954_v38 }
 0x142   : > { %vm684_vm7 = vmor %vm682_vm6, %vm683_vm5 }
 0x143   : > { %v678_v41 = vmul.f32 %v1954_v38, %v677_v40  ;;  %v675_v42 = vsel %vm674_vm4, %v1952_v32, %v671_v39 }
 0x144   : > { %v686_v45 = vmul.f32 %v675_v42, %v652_v13 }
 0x145   : > { %v679_v43 = vmul.f32 0.5, %v678_v41 }
 0x146   : > { %v691_v50 = vmul.f32 %v1939_v46, %v686_v45 }
 0x147   : > { %v680_v44 = vsub.f32 1.5, %v679_v43 }
 0x148   : > { %v696_v53 = vadd.f32 %v1940_v51, %v691_v50 }
 0x149   : > { %v681_v47 = vmul.f32 %v1954_v38, %v680_v44 }
 0x14b   : > { %v685_v48 = vsel %vm684_vm7, %v1954_v38, %v681_v47 }
 0x14c   : > { %v687_v49 = vmul.f32 %v685_v48, %v653_v18 }
 0x14e   : > { %v692_v52 = vmul.f32 %v1939_v46, %v687_v49 }
 0x150   : > { %v697_v54 = vadd.f32 %v1940_v51, %v692_v52 }
 0x152   : > { %v698_v55 = vpack.c.bf16 %v697_v54, %v696_v53 }
 0x154   : > { %1732 = vmatmul.msk.bf16.vlgmr.msra.gmra.mxu0 %vm636_vm0, %v698_v55  ;;  %1741 = vmatmul.msk.bf16.vlgmr.msra.gmra.mxu1 %vm636_vm0, %v698_v55 }
 0x155   : > { %1750 = vmatmul.msk.bf16.vlgmr.msra.gmra.mxu2 %vm636_vm0, %v698_v55 }
 0x1d1   : > { %v731_v58 = vpop.f32.mrf.mxu0  ;;  %v767_v59 = vpop.f32.mrf.mxu1 }
 0x1d2   : > { %v732_v60 = vadd.f32 %v1941_v56, %v731_v58  ;;  %v768_v61 = vadd.f32 %v1942_v57, %v767_v59 }
 0x1d4   : > { %v736_v62 = vpack.c.bf16 %v732_v60, %v732_v60  ;;  %v772_v63 = vpack.c.bf16 %v768_v61, %v768_v61 }
 0x1d6   : > { %v913_v3 = vunpack.c.l.b16 %v736_v62  ;;  %v918_v4 = vunpack.c.l.b16 %v772_v63  ;;  %v815_v5 = vsel %vm810_vm8, %v772_v63, 0 }
 0x1d7   : > { %824 = vmatpush.bf16.xpose.msra.mxu3 %v815_v5 }
 0x1d8   : > { %v914_v6 = vpack.c.b16 %v913_v3, %v913_v3  ;;  %v919_v7 = vpack.c.b16 %v918_v4, %v918_v4  ;;  %v803_v8 = vpop.f32.mrf.mxu2 }
 0x1d9   : > { %v804_v9 = vadd.f32 %v1943_v1, %v803_v8  ;;  %v733_v11 = vpop.f32.mrf.mxu0  ;;  %v769_v12 = vpop.f32.mrf.mxu1 }
 0x1da   : > { %v734_v13 = vadd.f32 %v1941_v56, %v733_v11  ;;  %v770_v14 = vadd.f32 %v1942_v57, %v769_v12  ;;  %920 = vrot.lane.b32.xlu2 %v919_v7, %s2229_s9  ;;  %915 = vrot.lane.b32.xlu0 %v914_v6, %s2229_s9 }
 0x1db   : > { %v2472_v15 = vpack.c.bf16 %v804_v9, %v804_v9 }
 0x1dc   : > { %v737_v16 = vpack.c.bf16 %v734_v13, %v734_v13  ;;  %v773_v17 = vpack.c.bf16 %v770_v14, %v770_v14 }
 0x1dd   : > { %v878_v18 = vsel %vm876_vm9, %v2472_v15, 0 }
 0x1de   : > { %v942_v19 = vunpack.c.l.b16 %v737_v16  ;;  %v947_v20 = vunpack.c.l.b16 %v773_v17  ;;  %887 = vmatpush.bf16.msrb.mxu1 %v878_v18  ;;  %1751 = vmatmul.msk.bf16.vlgmr.msra.gmra.mxu3 %vm810_vm8, %v736_v62  ;;  %v834_v21 = vsel %vm810_vm8, %v773_v17, 0 }
 0x1df   : > { %843 = vmatpush.bf16.xpose.msrb.mxu0 %v834_v21 }
 0x1e0   : > { %v943_v22 = vpack.c.b16 %v942_v19, %v942_v19  ;;  %v948_v23 = vpack.c.b16 %v947_v20, %v947_v20  ;;  %v805_v24 = vpop.f32.mrf.mxu2  ;;  %v995_v20 = vunpack.c.l.b16 %v2472_v15 }
 0x1e1   : > { %v806_v25 = vadd.f32 %v1943_v1, %v805_v24 }
 0x1e2   : > { %949 = vrot.lane.b32.xlu2 %v948_v23, %s2229_s9  ;;  %944 = vrot.lane.b32.xlu1 %v943_v22, %s2229_s9  ;;  %v2519_v21 = vpack.c.b16 %v995_v20, %v995_v20 }
 0x1e3   : > { %v2480_v26 = vpack.c.bf16 %v806_v25, %v806_v25  ;;  %1065 = vrot.lane.b32.xlu0 %v943_v22, %s2230_s16 }
 0x1e5   : > { %v897_v27 = vsel %vm876_vm9, %v2480_v26, 0 }
 0x1e6   : > { %906 = vmatpush.bf16.msrb.mxu2 %v897_v27  ;;  %1752 = vmatmul.msk.bf16.vlgmr.msrb.gmra.mxu0 %vm810_vm8, %v737_v16 }
 0x1ea   : > { %1044 = vrot.lane.b32.xlu2 %v919_v7, %s2230_s16  ;;  %1179 = vrot.lane.b32.xlu1 %v948_v23, %s2231_s25 }
 0x1eb   : > { %1154 = vrot.lane.b32.xlu0 %v914_v6, %s2231_s25 }
 0x1f2   : > { %1067 = vrot.lane.b32.xlu2 %v948_v23, %s2230_s16 }
 0x1fa   : > { %1042 = vrot.lane.b32.xlu2 %v914_v6, %s2230_s16 }
 0x202   : > { %1156 = vrot.lane.b32.xlu2 %v919_v7, %s2231_s25 }
 0x20a   : > { %1177 = vrot.lane.b32.xlu2 %v943_v22, %s2231_s25  ;;  %v1019_v22 = vunpack.c.l.b16 %v2480_v26 }
 0x20c   : > { %v1020_v23 = vpack.c.b16 %v1019_v22, %v1019_v22 }
 0x234   : > { %v921_v28 = vpop.permute.xlu2 %920 }
 0x235   : > { %v926_v29 = vsel %vm810_vm8, %v921_v28, 0 }
 0x236   : > { %935 = vmatpush.bf16.xpose.msrb.mxu3 %v926_v29 }
 0x23c   : > { %v950_v30 = vpop.permute.xlu2 %949 }
 0x23d   : > { %v955_v31 = vsel %vm810_vm8, %v950_v30, 0 }
 0x23e   : > { %964 = vmatpush.bf16.xpose.msra.mxu0 %v955_v31 }
 0x244   : > { %v1045_v32 = vpop.permute.xlu2 %1044 }
 0x245   : > { %v1050_v33 = vsel %vm810_vm8, %v1045_v32, 0 }
 0x246   : > { %1059 = vmatpush.bf16.xpose.msra.mxu3 %v1050_v33 }
 0x24c   : > { %v1068_v34 = vpop.permute.xlu2 %1067  ;;  %v916_v35 = vpop.permute.xlu0 %915 }
 0x24d   : > { %v1073_v36 = vsel %vm810_vm8, %v1068_v34, 0  ;;  %1755 = vmatmul.msk.bf16.vlgmr.msrb.gmra.mxu3 %vm810_vm8, %v916_v35 }
 0x24e   : > { %1082 = vmatpush.bf16.xpose.msrb.mxu0 %v1073_v36 }
 0x254   : > { %v945_v37 = vpop.permute.xlu1 %944  ;;  %v1043_v38 = vpop.permute.xlu2 %1042 }
 0x255   : > { %1756 = vmatmul.msk.bf16.vlgmr.msra.gmra.mxu0 %vm810_vm8, %v945_v37  ;;  %v1066_v44 = vpop.permute.xlu0 %1065 }
 0x25c   : > { %v1180_v39 = vpop.permute.xlu1 %1179  ;;  %v1157_v40 = vpop.permute.xlu2 %1156 }
 0x25d   : > { %v1185_v41 = vsel %vm810_vm8, %v1180_v39, 0  ;;  %v1162_v42 = vsel %vm810_vm8, %v1157_v40, 0  ;;  %1759 = vmatmul.msk.bf16.vlgmr.msra.gmra.mxu3 %vm810_vm8, %v1043_v38  ;;  %v1155_v50 = vpop.permute.xlu0 %1154 }
 0x25e   : > { %1171 = vmatpush.bf16.xpose.msrb.mxu3 %v1162_v42  ;;  %1194 = vmatpush.bf16.xpose.msra.mxu0 %v1185_v41 }
 0x261   : > { %v826_v43 = vpop.f32.mrf.mxu3 }
 0x262   : > { %v849_v45 = vsel %vm810_vm8, %v826_v43, -inf }
 0x263   : > { %v845_v46 = vpop.f32.mrf.mxu0  ;;  %850 = vmax.xlane.f32.xlu0 %v849_v45 }
 0x264   : > { %v852_v47 = vsel %vm810_vm8, %v845_v46, -inf  ;;  %v1178_v51 = vpop.permute.xlu2 %1177 }
 0x265   : > { %853 = vmax.xlane.f32.xlu1 %v852_v47  ;;  %1760 = vmatmul.msk.bf16.vlgmr.msrb.gmra.mxu0 %vm810_vm8, %v1066_v44 }
 0x269   : > { %v828_v48 = vpop.f32.mrf.mxu3 }
 0x26b   : > { %v847_v49 = vpop.f32.mrf.mxu0 }
 0x26d   : > { %1763 = vmatmul.msk.bf16.vlgmr.msrb.gmra.mxu3 %vm810_vm8, %v1155_v50 }
 0x275   : > { %1764 = vmatmul.msk.bf16.vlgmr.msra.gmra.mxu0 %vm810_vm8, %v1178_v51 }
 0x2d0   : > { %v937_v52 = vpop.f32.mrf.mxu3 }
 0x2d1   : > { %v970_v53 = vsel %vm810_vm8, %v937_v52, -inf }
 0x2d2   : > { %v966_v54 = vpop.f32.mrf.mxu0  ;;  %971 = vmax.xlane.f32.xlu1 %v970_v53 }
 0x2d3   : > { %v973_v55 = vsel %vm810_vm8, %v966_v54, -inf }
 0x2d4   : > { %974 = vmax.xlane.f32.xlu2 %v973_v55 }
 0x2d6   : > { %v851_v56 = vpop.xlane.xlu0 %850 }
 0x2d7   : > { %v855_v57 = vsub.f32 %v826_v43, %v851_v56 }
 0x2d8   : > { %v854_v58 = vpop.xlane.xlu1 %853  ;;  %v939_v59 = vpop.f32.mrf.mxu3 }
 0x2d9   : > { %v857_v60 = vmul.f32 1.442695, %v855_v57  ;;  %v856_v61 = vsub.f32 %v845_v46, %v854_v58 }
 0x2da   : > { %v968_v62 = vpop.f32.mrf.mxu0 }
 0x2db   : > { %1955 = vpow2.f32 %v857_v60  ;;  %v859_v63 = vmul.f32 1.442695, %v856_v61 }
 0x2dd   : > { %1957 = vpow2.f32 %v859_v63 }
 0x2e0   : > { %v1061_v1 = vpop.f32.mrf.mxu3 }
 0x2e1   : > { %v1956_v3 = vpop.eup %1955  ;;  %v1088_v4 = vsel %vm810_vm8, %v1061_v1, -inf }
 0x2e2   : > { %v1084_v5 = vpop.f32.mrf.mxu0  ;;  %1089 = vmax.xlane.f32.xlu2 %v1088_v4  ;;  %v861_v6 = vsel %vm810_vm8, %v1956_v3, 0.0 }
 0x2e3   : > { %v1958_v7 = vpop.eup %1957  ;;  %862 = vadd.xlane.f32.xlu1 %v861_v6  ;;  %v1091_v12 = vsel %vm810_vm8, %v1084_v5, -inf }
 0x2e4   : > { %v864_v8 = vsel %vm810_vm8, %v1958_v7, 0.0 }
 0x2e5   : > { %865 = vadd.xlane.f32.xlu0 %v864_v8 }
 0x2e8   : > { %v1063_v9 = vpop.f32.mrf.mxu3 }
 0x2ea   : > { %v1086_v11 = vpop.f32.mrf.mxu0 }
 0x2ed   : > { %1092 = vmax.xlane.f32.xlu0 %v1091_v12 }
 0x2f0   : > { %v2513_v13 = vpop.f32.mrf.mxu3 }
 0x2f1   : > { %v1200_v14 = vsel %vm810_vm8, %v2513_v13, -inf }
 0x2f2   : > { %v1196_v16 = vpop.f32.mrf.mxu0  ;;  %1201 = vmax.xlane.f32.xlu2 %v1200_v14 }
 0x2f3   : > { %v1203_v17 = vsel %vm810_vm8, %v1196_v16, -inf }
 0x2f4   : > { %1204 = vmax.xlane.f32.xlu1 %v1203_v17 }
 0x2f8   : > { %v1175_v18 = vpop.f32.mrf.mxu3 }
 0x2fa   : > { %v1198_v19 = vpop.f32.mrf.mxu0 }
 0x301   : > { %997 = vrot.lane.b32.xlu0 %v2519_v21, %s2229_s9 }
 0x30a   : > { %1133 = vrot.lane.b32.xlu2 %v1020_v23, %s2230_s16 }
 0x30d   : > { %1021 = vrot.lane.b32.xlu1 %v1020_v23, %s2229_s9  ;;  %s1591_s9 = scalar_lea.hbm %s2721_s27, %s1823_s5 }
 0x345   : > { %v972_v24 = vpop.xlane.xlu1 %971 }
 0x346   : > { %v976_v25 = vsub.f32 %v937_v52, %v972_v24 }
 0x347   : > { %v975_v27 = vpop.xlane.xlu2 %974 }
 0x348   : > { %v978_v28 = vmul.f32 1.442695, %v976_v25  ;;  %v977_v29 = vsub.f32 %v966_v54, %v975_v27 }
 0x34a   : > { %1959 = vpow2.f32 %v978_v28  ;;  %v980_v30 = vmul.f32 1.442695, %v977_v29 }
 0x34c   : > { %1961 = vpow2.f32 %v980_v30 }
 0x350   : > { %v2526_v15 = vpop.eup %1959 }
 0x351   : > { %v982_v31 = vsel %vm810_vm8, %v2526_v15, 0.0 }
 0x352   : > { %v2530_v32 = vpop.eup %1961  ;;  %983 = vadd.xlane.f32.xlu2 %v982_v31 }
 0x353   : > { %v985_v26 = vsel %vm810_vm8, %v2530_v32, 0.0 }
 0x354   : > { %986 = vadd.xlane.f32.xlu0 %v985_v26 }
 0x355   : > { %v1090_v33 = vpop.xlane.xlu2 %1089 }
 0x356   : > { %v1094_v34 = vsub.f32 %v1061_v1, %v1090_v33  ;;  %v863_v35 = vpop.xlane.xlu1 %862 }
 0x357   : > { %1963 = vrcp.f32 %v863_v35 }
 0x358   : > { %v1096_v36 = vmul.f32 1.442695, %v1094_v34  ;;  %v866_v37 = vpop.xlane.xlu0 %865 }
 0x359   : > { %1965 = vrcp.f32 %v866_v37 }
 0x35a   : > { %1967 = vpow2.f32 %v1096_v36 }
 0x35d   : > { %v1964_v38 = vpop.eup %1963 }
 0x35e   : > { %v869_v39 = vmul.f32 %v1964_v38, %v1956_v3 }
 0x35f   : > { %v1966_v40 = vpop.eup %1965 }
 0x360   : > { %v1968_v41 = vpop.eup %1967  ;;  %v870_v42 = vmul.f32 %v1966_v40, %v1958_v7  ;;  %v1093_v43 = vpop.xlane.xlu0 %1092  ;;  %v871_v44 = vpack.c.bf16 %v869_v39, %v869_v39 }
 0x361   : > { %v1095_v45 = vsub.f32 %v1084_v5, %v1093_v43  ;;  %v1100_v46 = vsel %vm810_vm8, %v1968_v41, 0.0 }
 0x362   : > { %1753 = vmatmul.msk.bf16.vlgmr.msrb.gmra.mxu1 %vm810_vm8, %v871_v44  ;;  %1101 = vadd.xlane.f32.xlu2 %v1100_v46  ;;  %v872_v47 = vpack.c.bf16 %v870_v42, %v870_v42 }
 0x363   : > { %v1098_v48 = vmul.f32 1.442695, %v1095_v45 }
 0x364   : > { %1754 = vmatmul.msk.bf16.vlgmr.msrb.gmra.mxu2 %vm810_vm8, %v872_v47 }
 0x365   : > { %1969 = vpow2.f32 %v1098_v48  ;;  %v1202_v57 = vpop.xlane.xlu2 %1201 }
 0x366   : > { %v1206_v61 = vsub.f32 %v2513_v13, %v1202_v57 }
 0x367   : > { %v1205_v49 = vpop.xlane.xlu1 %1204 }
 0x368   : > { %v1207_v50 = vsub.f32 %v1196_v16, %v1205_v49  ;;  %1112 = vrot.lane.b32.xlu0 %v2519_v21, %s2230_s16  ;;  %v1208_v1 = vmul.f32 1.442695, %v1206_v61 }
 0x36a   : > { %v1210_v51 = vmul.f32 1.442695, %v1207_v50 }
 0x36b   : > { %v1970_v52 = vpop.eup %1969 }
 0x36c   : > { %1971 = vpow2.f32 %v1210_v51  ;;  %v1103_v53 = vsel %vm810_vm8, %v1970_v52, 0.0 }
 0x36d   : > { %1104 = vadd.xlane.f32.xlu2 %v1103_v53  ;;  %v1134_v59 = vpop.permute.xlu2 %1133  ;;  %1973 = vpow2.f32 %v1208_v1 }
 0x36e   : > { %v1139_v63 = vsel %vm876_vm9, %v1134_v59, 0 }
 0x372   : > { %v1972_v54 = vpop.eup %1971 }
 0x373   : > { %v998_v55 = vpop.permute.xlu0 %997  ;;  %v1215_v56 = vsel %vm810_vm8, %v1972_v54, 0.0  ;;  %v1974_v3 = vpop.eup %1973 }
 0x374   : > { %v1003_v58 = vsel %vm876_vm9, %v998_v55, 0  ;;  %1216 = vadd.xlane.f32.xlu1 %v1215_v56  ;;  %v1212_v4 = vsel %vm810_vm8, %v1974_v3, 0.0  ;;  %v1816_v55 = vld [vmem:[#allocation8 + $0x8] sm:$0xff]  ;;  %v1815_v56 = vld [vmem:[#allocation8] sm:$0xff] }
 0x375   : > { %1012 = vmatpush.bf16.msra.mxu1 %v1003_v58  ;;  %1328 = vmatpush.bf16.msra.mxu3 %v1816_v55 }
 0x379   : > { %1329 = vmatpush.bf16.msra.mxu3 %v1815_v56 }
 0x37f   : > { %v1022_v60 = vpop.permute.xlu1 %1021 }
 0x380   : > { %v1027_v62 = vsel %vm876_vm9, %v1022_v60, 0 }
 0x381   : > { %1036 = vmatpush.bf16.msra.mxu2 %v1027_v62 }
 0x385   : > { %1148 = vmatpush.bf16.msrb.mxu2 %v1139_v63  ;;  %1245 = vrot.lane.b32.xlu2 %v1020_v23, %s2231_s25 }
 0x38d   : > { %1224 = vrot.lane.b32.xlu2 %v2519_v21, %s2231_s25  ;;  %s1594_s25 = sshll.u32 %s1591_s9, 4  ;;  %s1595_s25 = int_to_ptr.hbm [resolvable:$true] %s1594_s25 }
 0x392   : > { %1213 = vadd.xlane.f32.xlu0 %v1212_v4 }
 0x3c5   : > { %v984_v5 = vpop.xlane.xlu2 %983 }
 0x3c6   : > { %1975 = vrcp.f32 %v984_v5 }
 0x3c7   : > { %v987_v6 = vpop.xlane.xlu0 %986 }
 0x3c8   : > { %1977 = vrcp.f32 %v987_v6 }
 0x3cc   : > { %v1976_v7 = vpop.eup %1975 }
 0x3cd   : > { %v990_v8 = vmul.f32 %v1976_v7, %v2526_v15 }
 0x3ce   : > { %v1978_v9 = vpop.eup %1977 }
 0x3cf   : > { %v992_v11 = vpack.c.bf16 %v990_v8, %v990_v8  ;;  %v991_v12 = vmul.f32 %v1978_v9, %v2530_v32 }
 0x3d1   : > { %v993_v13 = vpack.c.bf16 %v991_v12, %v991_v12  ;;  %1757 = vmatmul.msk.bf16.vlgmr.msra.gmra.mxu1 %vm810_vm8, %v992_v11  ;;  %v1944_v12 = vld [vmem:[%s2678_s10] ss:$0 sm:$0xff] }
 0x3d3   : > { %1758 = vmatmul.msk.bf16.vlgmr.msra.gmra.mxu2 %vm810_vm8, %v993_v13 }
 0x3d5   : > { %v1102_v14 = vpop.xlane.xlu2 %1101 }
 0x3d6   : > { %1979 = vrcp.f32 %v1102_v14 }
 0x3da   : > { %v1113_v16 = vpop.permute.xlu0 %1112 }
 0x3db   : > { %v1118_v17 = vsel %vm876_vm9, %v1113_v16, 0 }
 0x3dc   : > { %v1980_v18 = vpop.eup %1979  ;;  %1127 = vmatpush.bf16.msrb.mxu1 %v1118_v17 }
 0x3dd   : > { %v1108_v19 = vmul.f32 %v1980_v18, %v1968_v41 }
 0x3df   : > { %v1110_v20 = vpack.c.bf16 %v1108_v19, %v1108_v19  ;;  %v2554_v21 = vpop.f32.mrf.mxu1 }
 0x3e0   : > { %v1105_v22 = vpop.xlane.xlu2 %1104 }
 0x3e1   : > { %1981 = vrcp.f32 %v1105_v22  ;;  %1761 = vmatmul.msk.bf16.vlgmr.msrb.gmra.mxu1 %vm810_vm8, %v1110_v20 }
 0x3e7   : > { %v1982_v23 = vpop.eup %1981  ;;  %v891_v24 = vpop.f32.mrf.mxu1 }
 0x3e8   : > { %v908_v25 = vpop.f32.mrf.mxu2  ;;  %v1109_v27 = vmul.f32 %v1982_v23, %v1970_v52  ;;  %v1246_v28 = vpop.permute.xlu2 %1245 }
 0x3e9   : > { %v1251_v29 = vsel %vm876_vm9, %v1246_v28, 0  ;;  %v1217_v15 = vpop.xlane.xlu1 %1216 }
 0x3ea   : > { %v1111_v30 = vpack.c.bf16 %v1109_v27, %v1109_v27  ;;  %1260 = vmatpush.bf16.msra.mxu2 %v1251_v29  ;;  %1983 = vrcp.f32 %v1217_v15  ;;  %v1818_v15 = vld [vmem:[#allocation10 + $0x8] sm:$0xff] }
 0x3eb   : > { %1424 = vmatpush.bf16.msrb.mxu0 %v1818_v15 }
 0x3ec   : > { %1762 = vmatmul.msk.bf16.vlgmr.msrb.gmra.mxu2 %vm810_vm8, %v1111_v30 }
 0x3f0   : > { %v910_v31 = vpop.f32.mrf.mxu2  ;;  %v1225_v32 = vpop.permute.xlu2 %1224 }
 0x3f1   : > { %v1230_v26 = vsel %vm876_vm9, %v1225_v32, 0  ;;  %v1984_v33 = vpop.eup %1983 }
 0x3f2   : > { %1239 = vmatpush.bf16.msra.mxu1 %v1230_v26  ;;  %v1221_v34 = vmul.f32 %v1984_v33, %v1972_v54  ;;  %v1817_v33 = vld [vmem:[#allocation10] sm:$0xff] }
 0x3f3   : > { %1425 = vmatpush.bf16.msrb.mxu0 %v1817_v33  ;;  %v1820_v33 = vld [vmem:[%s2683_s15 + $0x8] sm:$0xff] }
 0x3f4   : > { %v1223_v35 = vpack.c.bf16 %v1221_v34, %v1221_v34 }
 0x3fc   : > { %1766 = vmatmul.msk.bf16.vlgmr.msra.gmra.mxu2 %vm810_vm8, %v1223_v35 }
 0x405   : > { %v1214_v36 = vpop.xlane.xlu0 %1213 }
 0x406   : > { %1985 = vrcp.f32 %v1214_v36 }
 0x40c   : > { %v1986_v37 = vpop.eup %1985 }
 0x40d   : > { %v1220_v38 = vmul.f32 %v1986_v37, %v1974_v3 }
 0x40f   : > { %v1222_v39 = vpack.c.bf16 %v1220_v38, %v1220_v38 }
 0x411   : > { %1765 = vmatmul.msk.bf16.vlgmr.msra.gmra.mxu1 %vm810_vm8, %v1222_v39 }
 0x44e   : > { %v1014_v40 = vpop.f32.mrf.mxu1 }
 0x456   : > { %v1016_v41 = vpop.f32.mrf.mxu1  ;;  %v1038_v42 = vpop.f32.mrf.mxu2 }
 0x457   : > { %v1924_v43 = vpack.i.bf16 %v1038_v42, %v1014_v40 }
 0x459   : > { %1925 = vrot.lane.b32.xlu2 %v1924_v43, %s2232_s19 }
 0x45e   : > { %v1040_v44 = vpop.f32.mrf.mxu2  ;;  %v1129_v45 = vpop.f32.mrf.mxu1 }
 0x466   : > { %v1131_v46 = vpop.f32.mrf.mxu1 }
 0x46f   : > { %v1150_v47 = vpop.f32.mrf.mxu2 }
 0x470   : > { %v1929_v48 = vpack.i.bf16 %v1150_v47, %v1129_v45 }
 0x472   : > { %1930 = vrot.lane.b32.xlu1 %v1929_v48, %s2233_s1  ;;  %s2159_s1 = sshra.s32 %s1595_s25, 4  ;;  %s2160_s1 = int_to_ptr.hbm [resolvable:$true] %s2159_s1 }
 0x473   : > { %p2166_p3 = scmp.lt.s32.totalorder %s2160_s1, %s2722_s20 }
 0x477   : > { %v1152_v49 = vpop.f32.mrf.mxu2 }
 0x47f   : > { %v1262_v50 = vpop.f32.mrf.mxu2 }
 0x487   : > { %v1264_v51 = vpop.f32.mrf.mxu2 }
 0x48e   : > { %v1241_v52 = vpop.f32.mrf.mxu1 }
 0x48f   : > { %v1934_v53 = vpack.i.bf16 %v1262_v50, %v1241_v52  ;;  %v1946_v52 = vld [vmem:[%s2680_s12] ss:$0 sm:$0xff] }
 0x491   : > { %1935 = vrot.lane.b32.xlu2 %v1934_v53, %s2234_s21  ;;  %s2718_s21 = sld [smem:[#allocation17_spill]] }
 0x496   : > { %v1243_v54 = vpop.f32.mrf.mxu1 }
 0x497   : > { %s621_s22 = sand.u32 1, %s2718_s21   ;;  %s2161_s21 = scalar_lea.hbm %s2160_s1, 16 }
 0x498   : > { %s1721_s0 = sshll.u32 %s621_s22, 4  ;;  %s1580_s28 = scalar_lea.sflag [#allocation4], %s621_s22 }
 0x499   : > { %s623_s29 = scalar_lea.vmem [#allocation11], %s1721_s0  ;;  %p2162_p0 = scmp.ne.s32.totalorder %s2160_s1, %s2161_s21 }
 0x49a   : > { %s1592_s16 = sshll.u32 %s623_s29, 4  ;;  %s1593_s16 = int_to_ptr.vmem [resolvable:$true] %s1592_s16 }
 0x49b   : > { %p2163_p1 = pnand %p2162_p0, %p2364_p5 }
 0x49d   : > { %p2164_p2 = pneg %p2163_p1 }
 0x4b3   : > { %v1926_v57 = vpop.permute.xlu2 %1925 }
 0x4b4   : > { %v1928_v59 = vunpack.i.h.bf16 %v1926_v57  ;;  %v1927_v60 = vunpack.i.l.bf16 %v1926_v57 }
 0x4b6   : > { %v1291_v1 = vsel %vm810_vm8, %v908_v25, %v1928_v59  ;;  %v1290_v3 = vsel %vm810_vm8, %v2554_v21, %v1927_v60  ;;  %v1947_v59 = vld [vmem:[%s2682_s14] ss:$0 sm:$0xff] }
 0x4e4   : > { %v1931_v58 = vpop.permute.xlu1 %1930 }
 0x4e5   : > { %v1933_v61 = vunpack.i.h.bf16 %v1931_v58  ;;  %v1932_v62 = vunpack.i.l.bf16 %v1931_v58 }
 0x4e7   : > { %v1293_v6 = vsel %vm1292_vm10, %v1290_v3, %v1932_v62  ;;  %v1294_v7 = vsel %vm1292_vm10, %v1291_v1, %v1933_v61 }
 0x4eb   : > { %v1936_v63 = vpop.permute.xlu2 %1935 }
 0x4ec   : > { %v1938_v4 = vunpack.i.h.bf16 %v1936_v63  ;;  %v1937_v5 = vunpack.i.l.bf16 %v1936_v63 }
 0x4ee   : > { %v1296_v8 = vsel %vm1295_vm11, %v1293_v6, %v1937_v5  ;;  %v1297_v9 = vsel %vm1295_vm11, %v1294_v7, %v1938_v4  ;;  %vm1557_vm11 = vcmask 523264  }
 0x4ef   : > { %v1298_v11 = vpack.c.bf16 %v1297_v9, %v1296_v8 }
 0x4f1   : > { %1775 = vmatmul.msk.bf16.vlgmr.msra.gmra.mxu3 %vm636_vm0, %v1298_v11 }
 0x574   : > { %v1331_v13 = vpop.f32.mrf.mxu3 }
 0x575   : > { %v1332_v14 = vadd.f32 %v1944_v12, %v1331_v13 }
 0x577   : > { %v2571_v16 = vadd.f32 %v1332_v14, %v2430_v0 }
 0x579   : > { %v1340_v17 = vsel %vm636_vm0, %v2571_v16, 0.0 }
 0x57a   : > { %1341 = vadd.xlane.f32.xlu0 %v1340_v17 }
 0x57c   : > { %v1333_v18 = vpop.f32.mrf.mxu3 }
 0x57d   : > { %v1334_v19 = vadd.f32 %v1944_v12, %v1333_v18 }
 0x57f   : > { %v2576_v20 = vadd.f32 %v1334_v19, %v2434_v2  ;;  %v1822_v19 = vld [vmem:[%s2683_s15 + $0x18] sm:$0xff] }
 0x580   : > { %1565 = vmatpush.bf16.msrb.mxu1 %v1822_v19 }
 0x581   : > { %v1343_v21 = vsel %vm636_vm0, %v2576_v20, 0.0 }
 0x582   : > { %1344 = vadd.xlane.f32.xlu2 %v1343_v21 }
 0x5ed   : > { %v1342_v22 = vpop.xlane.xlu0 %1341 }
 0x5ee   : > { %v1346_v23 = vmul.f32 %v1342_v22, %v2438_v10 }
 0x5f0   : > { %v1348_v24 = vsub.f32 %v2571_v16, %v1346_v23 }
 0x5f2   : > { %v1350_v0 = vmul.f32 %v1348_v24, %v1348_v24 }
 0x5f4   : > { %v1352_v25 = vsel %vm636_vm0, %v1350_v0, 0.0 }
 0x5f5   : > { %v1345_v27 = vpop.xlane.xlu2 %1344  ;;  %1353 = vadd.xlane.f32.xlu0 %v1352_v25 }
 0x5f6   : > { %v1347_v28 = vmul.f32 %v1345_v27, %v2438_v10 }
 0x5f8   : > { %v1349_v29 = vsub.f32 %v2576_v20, %v1347_v28  ;;  %v1821_v28 = vld [vmem:[%s2683_s15 + $0x10] sm:$0xff] }
 0x5f9   : > { %1566 = vmatpush.bf16.msrb.mxu1 %v1821_v28 }
 0x5fa   : > { %v1351_v2 = vmul.f32 %v1349_v29, %v1349_v29 }
 0x5fc   : > { %v1355_v30 = vsel %vm636_vm0, %v1351_v2, 0.0 }
 0x5fd   : > { %1356 = vadd.xlane.f32.xlu0 %v1355_v30  ;;  %1567 = vmatpush.bf16.msrb.mxu1 %v1820_v33 }
 0x668   : > { %v1354_v31 = vpop.xlane.xlu0 %1353 }
 0x669   : > { %v1358_v32 = vmul.f32 %v1354_v31, %v2438_v10 }
 0x66b   : > { %v1360_v26 = vadd.f32 1e-05, %v1358_v32 }
 0x66d   : > { %1987 = vrsqrt.f32 %v1360_v26  ;;  %vm1368_vm13 = vweird.f32 %v1360_v26 }
 0x670   : > { %v1357_v34 = vpop.xlane.xlu0 %1356 }
 0x671   : > { %v1359_v35 = vmul.f32 %v1357_v34, %v2438_v10  ;;  %v1945_v10 = vld [vmem:[%s2679_s11] ss:$0 sm:$0xff] }
 0x673   : > { %v1988_v36 = vpop.eup %1987  ;;  %v1361_v37 = vadd.f32 1e-05, %v1359_v35 }
 0x674   : > { %v1363_v38 = vmul.f32 %v1988_v36, %v1360_v26  ;;  %vm1369_vm12 = vweird.f32 %v1988_v36 }
 0x675   : > { %1989 = vrsqrt.f32 %v1361_v37  ;;  %vm1370_vm14 = vmor %vm1368_vm13, %vm1369_vm12  ;;  %vm1378_vm1 = vweird.f32 %v1361_v37 }
 0x676   : > { %v1364_v39 = vmul.f32 %v1988_v36, %v1363_v38 }
 0x678   : > { %v1365_v40 = vmul.f32 0.5, %v1364_v39  ;;  %v1819_v39 = vld [vmem:[%s2683_s15] sm:$0xff] }
 0x679   : > { %1568 = vmatpush.bf16.msrb.mxu1 %v1819_v39 }
 0x67a   : > { %v1366_v41 = vsub.f32 1.5, %v1365_v40 }
 0x67b   : > { %v1990_v42 = vpop.eup %1989 }
 0x67c   : > { %v1367_v43 = vmul.f32 %v1988_v36, %v1366_v41  ;;  %v1373_v44 = vmul.f32 %v1990_v42, %v1361_v37  ;;  %vm1379_vm15 = vweird.f32 %v1990_v42 }
 0x67d   : > { %vm1380_vm2 = vmor %vm1378_vm1, %vm1379_vm15 }
 0x67e   : > { %v1374_v45 = vmul.f32 %v1990_v42, %v1373_v44  ;;  %v1371_v46 = vsel %vm1370_vm14, %v1988_v36, %v1367_v43 }
 0x67f   : > { %v1382_v49 = vmul.f32 %v1371_v46, %v1348_v24 }
 0x680   : > { %v1375_v47 = vmul.f32 0.5, %v1374_v45 }
 0x681   : > { %v1387_v53 = vmul.f32 %v1945_v10, %v1382_v49 }
 0x682   : > { %v1376_v48 = vsub.f32 1.5, %v1375_v47 }
 0x683   : > { %v1392_v56 = vadd.f32 %v1946_v52, %v1387_v53 }
 0x684   : > { %v1377_v50 = vmul.f32 %v1990_v42, %v1376_v48 }
 0x686   : > { %v1381_v51 = vsel %vm1380_vm2, %v1990_v42, %v1377_v50 }
 0x687   : > { %v1383_v54 = vmul.f32 %v1381_v51, %v1349_v29 }
 0x689   : > { %v1388_v55 = vmul.f32 %v1945_v10, %v1383_v54 }
 0x68b   : > { %v1393_v57 = vadd.f32 %v1946_v52, %v1388_v55 }
 0x68d   : > { %v1394_v58 = vpack.c.bf16 %v1393_v57, %v1392_v56 }
 0x68f   : > { %1784 = vmatmul.msk.bf16.vlgmr.msrb.gmra.mxu0 %vm636_vm0, %v1394_v58 }
 0x70c   : > { %v1427_v60 = vpop.f32.mrf.mxu0 }
 0x70d   : > { %v2598_v61 = vadd.f32 %v1947_v59, %v1427_v60 }
 0x70f   : > { %v2601_v62 = vmul.f32 0.70710677, %v2598_v61 }
 0x711   : > { %v1436_v63 = vmul.f32 %v2601_v62, %v2601_v62 }
 0x713   : > { %v1437_v1 = vmin.f32 %v1436_v63, 16.0 }
 0x714   : > { %v1429_v3 = vpop.f32.mrf.mxu0 }
 0x715   : > { %v1438_v4 = vmul.f32 2.1237322e-06, %v1437_v1  ;;  %v1449_v5 = vmul.f32 3.8918573e-05, %v1437_v1  ;;  %v2605_v6 = vadd.f32 %v1947_v59, %v1429_v3 }
 0x717   : > { %v1439_v7 = vadd.f32 0.00028619796, %v1438_v4  ;;  %v1450_v8 = vadd.f32 0.001143296, %v1449_v5  ;;  %v2608_v9 = vmul.f32 0.70710677, %v2605_v6 }
 0x719   : > { %v1451_v11 = vmul.f32 %v1450_v8, %v1437_v1  ;;  %v1476_v12 = vmul.f32 %v2608_v9, %v2608_v9  ;;  %v1440_v13 = vmul.f32 %v1439_v7, %v1437_v1 }
 0x71b   : > { %v1452_v14 = vadd.f32 0.014752088, %v1451_v11  ;;  %v1477_v17 = vmin.f32 %v1476_v12, 16.0  ;;  %v1441_v23 = vadd.f32 0.0036580483, %v1440_v13 }
 0x71d   : > { %v1453_v18 = vmul.f32 %v1452_v14, %v1437_v1  ;;  %v1478_v21 = vmul.f32 2.1237322e-06, %v1477_v17  ;;  %v1489_v22 = vmul.f32 3.8918573e-05, %v1477_v17  ;;  %v1442_v30 = vmul.f32 %v1441_v23, %v1437_v1 }
 0x71f   : > { %v1454_v24 = vadd.f32 0.112945676, %v1453_v18  ;;  %v1479_v0 = vadd.f32 0.00028619796, %v1478_v21  ;;  %v1490_v25 = vadd.f32 0.001143296, %v1489_v22 }
 0x720   : > { %v1443_v35 = vadd.f32 0.05243302, %v1442_v30 }
 0x721   : > { %v1455_v27 = vmul.f32 %v1454_v24, %v1437_v1  ;;  %v1480_v29 = vmul.f32 %v1479_v0, %v1477_v17  ;;  %v1491_v2 = vmul.f32 %v1490_v25, %v1477_v17  ;;  %v1432_v24 = vmul.f32 0.5, %v2598_v61 }
 0x722   : > { %v1444_v41 = vmul.f32 %v1443_v35, %v1437_v1  ;;  %v1433_v0 = vmul.f32 0.5, %v2605_v6 }
 0x723   : > { %v1456_v15 = vadd.f32 0.4994258, %v1455_v27  ;;  %v1481_v31 = vadd.f32 0.0036580483, %v1480_v29  ;;  %v1492_v32 = vadd.f32 0.014752088, %v1491_v2 }
 0x724   : > { %v1445_v46 = vadd.f32 0.18741608, %v1444_v41 }
 0x725   : > { %v1457_v26 = vmul.f32 %v1456_v15, %v1437_v1  ;;  %v1493_v34 = vmul.f32 %v1492_v32, %v1477_v17  ;;  %v1482_v37 = vmul.f32 %v1481_v31, %v1477_v17 }
 0x726   : > { %v1446_v50 = vmul.f32 %v1445_v46, %v1437_v1 }
 0x727   : > { %v1458_v36 = vadd.f32 1.0, %v1457_v26  ;;  %v1494_v38 = vadd.f32 0.112945676, %v1493_v34  ;;  %v1483_v42 = vadd.f32 0.05243302, %v1482_v37 }
 0x728   : > { %v1447_v56 = vadd.f32 1.1283791, %v1446_v50 }
 0x729   : > { %1991 = vrcp.f32 %v1458_v36  ;;  %v1495_v40 = vmul.f32 %v1494_v38, %v1477_v17  ;;  %v1484_v48 = vmul.f32 %v1483_v42, %v1477_v17  ;;  %v1470_v52 = vand.u32 2147483648, %v1458_v36 }
 0x72a   : > { %v1468_v54 = vand.u32 2147483647, %v1458_v36  ;;  %vm1464_vm4 = vweird.f32 %v1458_v36  ;;  %v1448_v4 = vmul.f32 %v1447_v56, %v2601_v62 }
 0x72b   : > { %v1496_v43 = vadd.f32 0.4994258, %v1495_v40  ;;  %v1485_v53 = vadd.f32 0.18741608, %v1484_v48  ;;  %v1471_v59 = vor.u32 1.1754944e-38, %v1470_v52 }
 0x72c   : > { %vm1469_vm6 = vcmp.eq.f32.partialorder %v1468_v54, 8.507059e+37 }
 0x72d   : > { %v1497_v44 = vmul.f32 %v1496_v43, %v1477_v17  ;;  %v1486_v60 = vmul.f32 %v1485_v53, %v1477_v17 }
 0x72f   : > { %v1992_v45 = vpop.eup %1991  ;;  %v1498_v10 = vadd.f32 1.0, %v1497_v44  ;;  %v1487_v1 = vadd.f32 1.1283791, %v1486_v60 }
 0x730   : > { %v1460_v47 = vmul.f32 %v1992_v45, %v1458_v36  ;;  %vm1465_vm3 = vweird.f32 %v1992_v45 }
 0x731   : > { %1993 = vrcp.f32 %v1498_v10  ;;  %vm1466_vm5 = vmor %vm1464_vm4, %vm1465_vm3  ;;  %v1510_v7 = vand.u32 2147483648, %v1498_v10  ;;  %v1508_v12 = vand.u32 2147483647, %v1498_v10  ;;  %vm1504_vm8 = vweird.f32 %v1498_v10 }
 0x732   : > { %v1461_v49 = vsub.f32 1.0, %v1460_v47  ;;  %v1488_v17 = vmul.f32 %v1487_v1, %v2608_v9  ;;  %v1948_v9 = vld [vmem:[%s2719_s26] ss:$0 sm:$0xff]  ;;  %s2165_s26 = scalar_lea.hbm %s2722_s20, 32 }
 0x733   : > { %v1511_v14 = vor.u32 1.1754944e-38, %v1510_v7  ;;  %vm1509_vm10 = vcmp.eq.f32.partialorder %v1508_v12, 8.507059e+37  ;;  %p2167_p4 = scmp.lt.s32.totalorder %s2165_s26, %s2161_s21 }
 0x734   : > { %v1462_v51 = vmul.f32 %v1992_v45, %v1461_v49 }
 0x735   : > { %p2168_p7 = por %p2167_p4, %p2166_p3 }
 0x736   : > { %v1463_v55 = vadd.f32 %v1992_v45, %v1462_v51 }
 0x737   : > { %v1994_v57 = vpop.eup %1993  ;;  %p2169_p8 = pnand %p2168_p7, %p2164_p2 }
 0x738   : > { %v1467_v58 = vsel %vm1466_vm5, %v1992_v45, %v1463_v55  ;;  %v1500_v63 = vmul.f32 %v1994_v57, %v1498_v10  ;;  %vm1505_vm7 = vweird.f32 %v1994_v57 }
 0x739   : > { %v1472_v3 = vsel %vm1469_vm6, %v1471_v59, %v1467_v58  ;;  %vm1506_vm9 = vmor %vm1504_vm8, %vm1505_vm7 }
 0x73a   : > { %v1501_v5 = vsub.f32 1.0, %v1500_v63  ;;  %v1473_v8 = vmul.f32 %v1472_v3, %v1448_v4 }
 0x73c   : > { %v1502_v11 = vmul.f32 %v1994_v57, %v1501_v5  ;;  %v1785_v18 = vclamps-f32 %v1473_v8, 1.0 }
 0x73e   : > { %v1503_v13 = vadd.f32 %v1994_v57, %v1502_v11  ;;  %v1516_v62 = vadd.f32 1.0, %v1785_v18 }
 0x740   : > { %v1507_v19 = vsel %vm1506_vm9, %v1994_v57, %v1503_v13  ;;  %v1518_v27 = vmul.f32 %v1516_v62, %v1432_v24 }
 0x741   : > { %v1512_v21 = vsel %vm1509_vm10, %v1511_v14, %v1507_v19 }
 0x742   : > { %v1513_v22 = vmul.f32 %v1512_v21, %v1488_v17 }
 0x744   : > { %v1786_v23 = vclamps-f32 %v1513_v22, 1.0 }
 0x746   : > { %v1517_v25 = vadd.f32 1.0, %v1786_v23 }
 0x748   : > { %v1519_v28 = vmul.f32 %v1517_v25, %v1433_v0 }
 0x74a   : > { %v1520_v29 = vpack.c.bf16 %v1519_v28, %v1518_v27 }
 0x74c   : > { %1803 = vmatmul.msk.bf16.vlgmr.msrb.gmra.mxu1 %vm1557_vm11, %v1520_v29 }
 0x7c9   : > { %v1570_v2 = vpop.f32.mrf.mxu1 }
 0x7ca   : > { %v1571_v30 = vadd.f32 %v1948_v9, %v1570_v2 }
 0x7cc   : > { %v1575_v15 = vadd.f32 %v1571_v30, %v2571_v16 }
 0x7ce   : > { %1577 = vst.msk [vmem:[%s623_s29] sm:$0xff] %vm636_vm0, %v1575_v15 }
 0x7d1   : > { %v1572_v61 = vpop.f32.mrf.mxu1 }
 0x7d2   : > { %v1573_v6 = vadd.f32 %v1948_v9, %v1572_v61 }
 0x7d4   : > { %v1576_v31 = vadd.f32 %v1573_v6, %v2576_v20 }
 0x7d6   : > { %1578 = vst.msk [vmem:[%s623_s29 + $0x8] sm:$0xff] %vm636_vm0, %v1576_v31 }
 0x7d7   : > { %2172 = shalt.err (!%p2169_p8)
}
 0x7d8   : > { %s2235_s22 = smov 128  }
 0x7d9   : > { %1844 = dma.vmem_to_hbm [thread:$0]  (%p2364_p5), %s1593_s16, 256, %s1595_s25, %s1580_s28, %s2235_s22, %s2235_s22, %s2232_s19  }
 0x7da PF: > { %s2723_s29 = sld [smem:[#allocation19_spill]] }
 0x7db   : > { %s2724_s24 = sld [smem:[#allocation16_spill]] }
 0x7e0   : > { %p1876_p9 = scmp.ge.s32.totalorder %s2723_s29, 2 }
 0x7e1   : > { %s1609_s27 = sand.u32 1, %s2724_s24  }
 0x7e2   : > { %p1863_p10 = pnand %p1876_p9, %p2368_p6  ;;  %s1610_s9 = scalar_lea.sflag [#allocation4], %s1609_s27 }
 0x7e4   : > { %p1864_p11 = pneg %p1863_p10 }
 0x7e6   : > { %2202 = dma.done.wait (%p1864_p11), %s1610_s9, 256  }
 0x7e7   : > { %2204 = vsyncadd (%p1864_p11), %s1610_s9, 4294967040  ;;  %s2726_s27 = sld [smem:[#allocation20_spill]] }
 0x7e8   : > { %s2727_s24 = sld [smem:[#allocation17_spill]] }
 0x7e9   : > { %s2728_s25 = sld [smem:[#allocation18_spill]] }
 0x7ea   : > { %s2729_s26 = sld [smem:[#allocation21_spill]] }
 0x7ed   : > { %p30_p12 = scmp.ge.s32.totalorder %s2726_s27, 4  }
 0x7ef   :  { %32 = sbr.rel (!%p30_p12) target bundleno = 13 (0xd), region = 144 }
 0x7f4   :  { %1616 = vsyncpa [#allocation3], 1 }
 0x7f5   :  { %1618 = vsyncpa [#allocation3 + $0x1], 1 }
 0x7f6   :  { %1619 = vsyncpa [#allocation6], 1 }
 0x7f7   :  { %1620 = vsyncpa [#allocation9], 1 }
 0x7f8   :  { %1621 = vsyncpa [#allocation4], 1 }
 0x7f9   :  { %1623 = vsyncpa [#allocation4 + $0x1], 1 }

// kernel: tpu_custom_call.1
= control target key start
LH: loop header
LB: loop body
LE: loop exit
PB: predicated region body
PF: predicated region fallthrough
CT: control target
= control target key end

     0   :  { %s2668_s0 = inlined_call_operand.vmem [shape: f32[32,32], index: 0, kind: input, shape index: {}]   ;;  %s2669_s1 = inlined_call_operand.hbm [shape: f32[1,32], index: 1, kind: input, shape index: {}]   ;;  %s2670_s2 = inlined_call_operand.vmem [shape: f32[1,32], index: 2, kind: input, shape index: {}]   ;;  %s2671_s3 = inlined_call_operand.vmem [shape: bf16[32,32], index: 3, kind: input, shape index: {}]   ;;  %s2672_s4 = inlined_call_operand.vmem [shape: f32[1,32], index: 4, kind: input, shape index: {}]   ;;  %s2673_s5 = inlined_call_operand.hbm [shape: bf16[32,32], index: 5, kind: input, shape index: {}]   ;;  %s2674_s6 = inlined_call_operand.vmem [shape: f32[1,32], index: 6, kind: input, shape index: {}]   ;;  %s2675_s7 = inlined_call_operand.hbm [shape: bf16[32,32], index: 7, kind: input, shape index: {}]   ;;  %s2676_s8 = inlined_call_operand.vmem [shape: f32[1,32], index: 8, kind: input, shape index: {}]   ;;  %s2677_s9 = inlined_call_operand.hbm [shape: bf16[32,32], index: 9, kind: input, shape index: {}]   ;;  %s2678_s10 = inlined_call_operand.vmem [shape: f32[1,32], index: 10, kind: input, shape index: {}]   ;;  %s2679_s11 = inlined_call_operand.vmem [shape: f32[1,32], index: 11, kind: input, shape index: {}]   ;;  %s2680_s12 = inlined_call_operand.vmem [shape: f32[1,32], index: 12, kind: input, shape index: {}]   ;;  %s2681_s13 = inlined_call_operand.hbm [shape: bf16[32,64], index: 13, kind: input, shape index: {}]   ;;  %s2682_s14 = inlined_call_operand.vmem [shape: f32[1,64], index: 14, kind: input, shape index: {}]   ;;  %s2683_s15 = inlined_call_operand.vmem [shape: bf16[64,32], index: 15, kind: input, shape index: {}]   ;;  %s2684_s16 = inlined_call_operand.vmem [shape: f32[1,32], index: 16, kind: input, shape index: {}]   ;;  %s2685_s17 = inlined_call_operand.hbm [shape: f32[32,32], index: 17, kind: output, shape index: {}]  }
   0x1   :  { %2696 = sst [smem:[#allocation24_spill]] %s2668_s0 }
   0x2   :  { %2697 = sst [smem:[#allocation25_spill]] %s2669_s1 }
   0x3   :  { %2698 = sst [smem:[#allocation26_spill]] %s2673_s5 }
   0x4   :  { %2699 = sst [smem:[#allocation27_spill]] %s2677_s9 }
   0x5   :  { %2700 = sst [smem:[#allocation28_spill]] %s2684_s16 }
   0x6   :  { %2701 = sst [smem:[#allocation29_spill]] %s2685_s17 }
   0x7   :  { %22 = vsyncpa [#allocation3], 0 }
   0x8   :  { %23 = vsyncpa [#allocation6], 0 }
   0x9   :  { %24 = vsyncpa [#allocation9], 0 }
   0xa   :  { %25 = vsyncpa [#allocation4], 0 }
   0xb   :  { %27 = vsyncpa [#allocation4 + $0x1], 0  ;;  %s2326_s24 = smov 0   ;;  %s2328_s25 = smov 0  }
   0xc   :  { %s2330_s26 = smov 0   ;;  %s2332_s27 = smov 0  }
   0xd LB: > { %2702 = sst [smem:[#allocation16_spill]] %s2207_s24  ;;  %s2347_s28 = sadd.s32 4294967295, %s2219_s27   ;;  %s2219_s27 = sphi %s2332_s27, %s2726_s27   ;;  %s2215_s26 = sphi %s2330_s26, %s2729_s26   ;;  %s2211_s25 = sphi %s2328_s25, %s2728_s25   ;;  %s2207_s24 = sphi %s2326_s24, %s2727_s24  }
   0xe   : > { %2703 = sst [smem:[#allocation17_spill]] %s2211_s25  ;;  %s1707_s29 = sadd.s32 4294967294, %s2219_s27  }
   0xf   : > { %2704 = sst [smem:[#allocation18_spill]] %s2215_s26  ;;  %s2351_s0 = sadd.s32 1, %s2219_s27  }
  0x10   : > { %2705 = sst [smem:[#allocation19_spill]] %s2219_s27  ;;  %s402_s30 = sadd.s32 1, %s2215_s26 }
  0x11   : > { %2706 = sst [smem:[#allocation20_spill]] %s2351_s0  ;;  %s399_s18 = ssub.s32 %s2219_s27, %s2351_s0 }
  0x12   : > { %p412_p0 = scmp.ne.s32.totalorder %s2215_s26, %s2211_s25  ;;  %p400_p1 = scmp.eq.s32.totalorder %s399_s18, 0 }
  0x13   : > { %p413_p2 = scmp.eq.s32.totalorder %s2347_s28, 1  ;;  %p418_p3 = scmp.ne.s32.totalorder %s2211_s25, %s2207_s24 }
  0x14   : > { %p419_p4 = scmp.eq.s32.totalorder %s1707_s29, 1  ;;  %p1708_p7 = scmp.ge.s32.totalorder %s2219_s27, 1 }
  0x15   : > { %s2362_s19 = scalar_select %p400_p1, %s2215_s26, %s402_s30  }
  0x16   : > { %p2364_p5 = por %p413_p2, %p412_p0  ;;  %p2368_p6 = por %p419_p4, %p418_p3 }
  0x17   : > { %2707 = sst [smem:[#allocation21_spill]] %s2362_s19  ;;  %p426_p8 = scmp.lt.s32.totalorder %s2219_s27, 3 }
  0x18   : > { %s2708_s1 = scalar_select %p2364_p5, 1, 0 }
  0x19   : > { %s2710_s20 = scalar_select %p2368_p6, 1, 0 }
  0x1a   : > { %2709 = sst [smem:[#allocation22_spill]] %s2708_s1  ;;  %p1866_p9 = scmp.eq.s32.totalorder %s2347_s28, 0 }
  0x1b   : > { %2711 = sst [smem:[#allocation23_spill]] %s2710_s20  ;;  %p2375_p10 = pnand %p1708_p7, %p426_p8 }
  0x1c   : > { %s2713_s5 = sld [smem:[#allocation26_spill]]  ;;  %s2221_s30 = smov [#allocation5]  }
  0x1d   : > { %p1846_p11 = pneg %p2375_p10  ;;  %s460_s18 = sshll.u32 %s2221_s30, 4  ;;  %s461_s18 = int_to_ptr.vmem [resolvable:$true] %s460_s18 }
  0x1e   : > { %s2715_s9 = sld [smem:[#allocation27_spill]]  ;;  %s2222_s22 = smov 64  }
  0x1f   : > { %p2386_p12 = pnand %p1866_p9, %p1846_p11  ;;  %s2223_s23 = smov 4  }
  0x20   : > { %s2716_s17 = sld [smem:[#allocation25_spill]]  ;;  %s2225_s16 = smov [#allocation2]  }
  0x21   : > { %s440_s25 = sshll.u32 %s2225_s16, 4  ;;  %s2227_s27 = smov [#allocation10]   ;;  %s441_s25 = int_to_ptr.vmem [resolvable:$true] %s440_s25 }
  0x22   : > { %s458_s29 = sshll.u32 %s2713_s5, 4  ;;  %s2224_s5 = smov [#allocation8]   ;;  %s459_s29 = int_to_ptr.hbm [resolvable:$true] %s458_s29 }
  0x23   : > { %1852 = dma.hbm_to_vmem [thread:$0]  (!%p2386_p12), %s459_s29, 256, %s461_s18, [#allocation6], %s2222_s22, %s2222_s22, %s2223_s23  }
  0x24   : > { %s492_s20 = sshll.u32 %s2715_s9, 4  ;;  %s494_s30 = sshll.u32 %s2224_s5, 4  ;;  %s493_s20 = int_to_ptr.hbm [resolvable:$true] %s492_s20  ;;  %s495_s30 = int_to_ptr.vmem [resolvable:$true] %s494_s30 }
  0x25   : > { %1858 = dma.hbm_to_vmem [thread:$0]  (!%p2386_p12), %s493_s20, 256, %s495_s30, [#allocation9], %s2222_s22, %s2222_s22, %s2223_s23  }
  0x26   : > { %s438_s1 = sshll.u32 %s2716_s17, 4  ;;  %s475_s9 = sshll.u32 %s2675_s7, 4  ;;  %s439_s1 = int_to_ptr.hbm [resolvable:$true] %s438_s1  ;;  %s476_s9 = int_to_ptr.hbm [resolvable:$true] %s475_s9 }
  0x27   : > { %1849 = dma.hbm_to_vmem [thread:$0]  (!%p2386_p12), %s439_s1, 16, %s441_s25, [#allocation3]  }
  0x28   : > { %s2226_s5 = smov [#allocation7]   ;;  %s515_s17 = sshll.u32 %s2681_s13, 4  ;;  %s516_s17 = int_to_ptr.hbm [resolvable:$true] %s515_s17 }
  0x29   : > { %s477_s29 = sshll.u32 %s2226_s5, 4  ;;  %s517_s20 = sshll.u32 %s2227_s27, 4  ;;  %s478_s29 = int_to_ptr.vmem [resolvable:$true] %s477_s29  ;;  %s518_s20 = int_to_ptr.vmem [resolvable:$true] %s517_s20 }
  0x2a   : > { %1855 = dma.hbm_to_vmem [thread:$0]  (!%p2386_p12), %s476_s9, 256, %s478_s29, [#allocation6], %s2222_s22, %s2222_s22, %s2223_s23  }
  0x2b   : > { %1861 = dma.hbm_to_vmem [thread:$0]  (!%p2386_p12), %s516_s17, 256, %s518_s20, [#allocation9], %s2222_s22, %s2222_s22, %s2223_s23  }
  0x2c   : > { %551 = sbr.rel (%p2375_p10) target bundleno = 2010 (0x7da), region = 88 }
  0x31   : > { %2190 = dma.done.wait (%p1866_p9), [#allocation3], 16  }
  0x32   : > { %2192 = vsyncadd (%p1866_p9), [#allocation3], 4294967280 }
  0x33   : > { %2194 = dma.done.wait (%p1866_p9), [#allocation6], 512  }
  0x34   : > { %2196 = vsyncadd (%p1866_p9), [#allocation6], 4294966784 }
  0x35   : > { %2198 = dma.done.wait (%p1866_p9), [#allocation9], 512  }
  0x36   : > { %2200 = vsyncadd (%p1866_p9), [#allocation9], 4294966784  ;;  %s1722_s9 = sshll.u32 %s2347_s28, 1  ;;  %vm636_vm0 = vcmask 261120   ;;  %s2717_s1 = sld [smem:[#allocation24_spill]]  ;;  %v2228_v4 = vmov 32.0  }
  0x37   : > { %p625_p13 = scmp.lt.s32.totalorder %s1722_s9, 3  ;;  %1949 = vrcp.f32 %v2228_v4  ;;  %v1810_v21 = vld [vmem:[%s2671_s3 + $0x8] sm:$0xff]  ;;  %v1814_v23 = vld [vmem:[#allocation7 + $0x8] sm:$0xff]  ;;  %v1813_v28 = vld [vmem:[#allocation7] sm:$0xff]  ;;  %vm810_vm8 = vcmask 64512   ;;  %vm876_vm9 = vcmask 1043456  }
  0x38   : > { %v1812_v22 = vld [vmem:[#allocation5 + $0x8] sm:$0xff]  ;;  %728 = vmatpush.bf16.msra.mxu0 %v1810_v21  ;;  %v1809_v25 = vld [vmem:[%s2671_s3] sm:$0xff]  ;;  %800 = vmatpush.bf16.msra.mxu2 %v1814_v23  ;;  %s2231_s25 = smov 104   ;;  %s2232_s19 = smov 8   ;;  %vm1292_vm10 = vcmask 130048   ;;  %vm1295_vm11 = vcmask 195584  }
  0x39   : > { %s2731_s9 = smov (!%p625_p13, %s1722_s9), 3  ;;  %764 = vmatpush.bf16.msra.mxu1 %v1812_v22  ;;  %v1811_v26 = vld [vmem:[#allocation5] sm:$0xff]  ;;  %v1939_v46 = vld [vmem:[#allocation2] ss:$0 sm:$0xff]  ;;  %s2719_s26 = sld [smem:[#allocation28_spill]] }
  0x3a   : > { %s1723_s16 = sshll.u32 %s2731_s9, 3  ;;  %v1940_v51 = vld [vmem:[%s2670_s2] ss:$0 sm:$0xff]  ;;  %s2229_s9 = smov 120  }
  0x3b   : > { %v1941_v56 = vld [vmem:[%s2672_s4] ss:$0 sm:$0xff]  ;;  %s1823_s5 = sshll.u32 %s2347_s28, 4  ;;  %s2721_s27 = sld [smem:[#allocation29_spill]] }
  0x3c   : > { %s628_s21 = scalar_lea.vmem %s2717_s1, %s1723_s16  ;;  %729 = vmatpush.bf16.msra.mxu0 %v1809_v25  ;;  %801 = vmatpush.bf16.msra.mxu2 %v1813_v28  ;;  %v1942_v57 = vld [vmem:[%s2674_s6] ss:$0 sm:$0xff]  ;;  %s2230_s16 = smov 112  }
  0x3d   : > { %v2430_v0 = vld [vmem:[%s628_s21] sm:$0xff]  ;;  %v2434_v2 = vld [vmem:[%s628_s21 + $0x8] sm:$0xff]  ;;  %v1950_v5 = vpop.eup %1949  ;;  %765 = vmatpush.bf16.msra.mxu1 %v1811_v26  ;;  %s2233_s1 = smov 16   ;;  %s2234_s21 = smov 24  }
  0x3e   : > { %v637_v1 = vsel %vm636_vm0, %v2430_v0, 0.0  ;;  %v640_v3 = vsel %vm636_vm0, %v2434_v2, 0.0  ;;  %v644_v6 = vmul.f32 32.0, %v1950_v5  ;;  %vm648_vm1 = vweird.f32 %v1950_v5 }
  0x3f   : > { %638 = vadd.xlane.f32.xlu0 %v637_v1  ;;  %v1943_v1 = vld [vmem:[%s2676_s8] ss:$0 sm:$0xff] }
  0x40   : > { %v645_v7 = vsub.f32 1.0, %v644_v6 }
  0x41   : > { %s2722_s20 = smov %s2721_s27 }
  0x42   : > { %v646_v8 = vmul.f32 %v1950_v5, %v645_v7 }
  0x44   : > { %v647_v9 = vadd.f32 %v1950_v5, %v646_v8 }
  0x46   : > { %v2438_v10 = vsel %vm648_vm1, %v1950_v5, %v647_v9 }
  0x47   : > { %641 = vadd.xlane.f32.xlu0 %v640_v3 }
  0xb2   : > { %v639_v11 = vpop.xlane.xlu0 %638 }
  0xb3   : > { %v650_v12 = vmul.f32 %v2438_v10, %v639_v11 }
  0xb5   : > { %v652_v13 = vsub.f32 %v2430_v0, %v650_v12 }
  0xb7   : > { %v654_v14 = vmul.f32 %v652_v13, %v652_v13 }
  0xb9   : > { %v656_v15 = vsel %vm636_vm0, %v654_v14, 0.0 }
  0xba   : > { %657 = vadd.xlane.f32.xlu1 %v656_v15  ;;  %v642_v16 = vpop.xlane.xlu0 %641 }
  0xbb   : > { %v651_v17 = vmul.f32 %v2438_v10, %v642_v16 }
  0xbd   : > { %v653_v18 = vsub.f32 %v2434_v2, %v651_v17 }
  0xbf   : > { %v655_v19 = vmul.f32 %v653_v18, %v653_v18 }
  0xc1   : > { %v659_v20 = vsel %vm636_vm0, %v655_v19, 0.0 }
  0xc2   : > { %660 = vadd.xlane.f32.xlu1 %v659_v20 }
 0x12d   : > { %v658_v24 = vpop.xlane.xlu1 %657 }
 0x12e   : > { %v662_v27 = vmul.f32 %v658_v24, %v2438_v10 }
 0x130   : > { %v664_v29 = vadd.f32 1e-05, %v662_v27 }
 0x132   : > { %1951 = vrsqrt.f32 %v664_v29  ;;  %vm672_vm3 = vweird.f32 %v664_v29 }
 0x135   : > { %v661_v30 = vpop.xlane.xlu1 %660 }
 0x136   : > { %v663_v31 = vmul.f32 %v661_v30, %v2438_v10 }
 0x138   : > { %v1952_v32 = vpop.eup %1951  ;;  %v665_v33 = vadd.f32 1e-05, %v663_v31 }
 0x139   : > { %v667_v34 = vmul.f32 %v1952_v32, %v664_v29  ;;  %vm673_vm2 = vweird.f32 %v1952_v32 }
 0x13a   : > { %1953 = vrsqrt.f32 %v665_v33  ;;  %vm674_vm4 = vmor %vm672_vm3, %vm673_vm2  ;;  %vm682_vm6 = vweird.f32 %v665_v33 }
 0x13b   : > { %v668_v35 = vmul.f32 %v1952_v32, %v667_v34 }
 0x13d   : > { %v669_v36 = vmul.f32 0.5, %v668_v35 }
 0x13f   : > { %v670_v37 = vsub.f32 1.5, %v669_v36 }
 0x140   : > { %v1954_v38 = vpop.eup %1953 }
 0x141   : > { %v671_v39 = vmul.f32 %v1952_v32, %v670_v37  ;;  %v677_v40 = vmul.f32 %v1954_v38, %v665_v33  ;;  %vm683_vm5 = vweird.f32 %v1954_v38 }
 0x142   : > { %vm684_vm7 = vmor %vm682_vm6, %vm683_vm5 }
 0x143   : > { %v678_v41 = vmul.f32 %v1954_v38, %v677_v40  ;;  %v675_v42 = vsel %vm674_vm4, %v1952_v32, %v671_v39 }
 0x144   : > { %v686_v45 = vmul.f32 %v675_v42, %v652_v13 }
 0x145   : > { %v679_v43 = vmul.f32 0.5, %v678_v41 }
 0x146   : > { %v691_v50 = vmul.f32 %v1939_v46, %v686_v45 }
 0x147   : > { %v680_v44 = vsub.f32 1.5, %v679_v43 }
 0x148   : > { %v696_v53 = vadd.f32 %v1940_v51, %v691_v50 }
 0x149   : > { %v681_v47 = vmul.f32 %v1954_v38, %v680_v44 }
 0x14b   : > { %v685_v48 = vsel %vm684_vm7, %v1954_v38, %v681_v47 }
 0x14c   : > { %v687_v49 = vmul.f32 %v685_v48, %v653_v18 }
 0x14e   : > { %v692_v52 = vmul.f32 %v1939_v46, %v687_v49 }
 0x150   : > { %v697_v54 = vadd.f32 %v1940_v51, %v692_v52 }
 0x152   : > { %v698_v55 = vpack.c.bf16 %v697_v54, %v696_v53 }
 0x154   : > { %1732 = vmatmul.msk.bf16.vlgmr.msra.gmra.mxu0 %vm636_vm0, %v698_v55  ;;  %1741 = vmatmul.msk.bf16.vlgmr.msra.gmra.mxu1 %vm636_vm0, %v698_v55 }
 0x155   : > { %1750 = vmatmul.msk.bf16.vlgmr.msra.gmra.mxu2 %vm636_vm0, %v698_v55 }
 0x1d1   : > { %v731_v58 = vpop.f32.mrf.mxu0  ;;  %v767_v59 = vpop.f32.mrf.mxu1 }
 0x1d2   : > { %v732_v60 = vadd.f32 %v1941_v56, %v731_v58  ;;  %v768_v61 = vadd.f32 %v1942_v57, %v767_v59 }
 0x1d4   : > { %v736_v62 = vpack.c.bf16 %v732_v60, %v732_v60  ;;  %v772_v63 = vpack.c.bf16 %v768_v61, %v768_v61 }
 0x1d6   : > { %v913_v3 = vunpack.c.l.b16 %v736_v62  ;;  %v918_v4 = vunpack.c.l.b16 %v772_v63  ;;  %v815_v5 = vsel %vm810_vm8, %v772_v63, 0 }
 0x1d7   : > { %824 = vmatpush.bf16.xpose.msra.mxu3 %v815_v5 }
 0x1d8   : > { %v914_v6 = vpack.c.b16 %v913_v3, %v913_v3  ;;  %v919_v7 = vpack.c.b16 %v918_v4, %v918_v4  ;;  %v803_v8 = vpop.f32.mrf.mxu2 }
 0x1d9   : > { %v804_v9 = vadd.f32 %v1943_v1, %v803_v8  ;;  %v733_v11 = vpop.f32.mrf.mxu0  ;;  %v769_v12 = vpop.f32.mrf.mxu1 }
 0x1da   : > { %v734_v13 = vadd.f32 %v1941_v56, %v733_v11  ;;  %v770_v14 = vadd.f32 %v1942_v57, %v769_v12  ;;  %920 = vrot.lane.b32.xlu2 %v919_v7, %s2229_s9  ;;  %915 = vrot.lane.b32.xlu0 %v914_v6, %s2229_s9 }
 0x1db   : > { %v2472_v15 = vpack.c.bf16 %v804_v9, %v804_v9 }
 0x1dc   : > { %v737_v16 = vpack.c.bf16 %v734_v13, %v734_v13  ;;  %v773_v17 = vpack.c.bf16 %v770_v14, %v770_v14 }
 0x1dd   : > { %v878_v18 = vsel %vm876_vm9, %v2472_v15, 0 }
 0x1de   : > { %v942_v19 = vunpack.c.l.b16 %v737_v16  ;;  %v947_v20 = vunpack.c.l.b16 %v773_v17  ;;  %887 = vmatpush.bf16.msrb.mxu1 %v878_v18  ;;  %1751 = vmatmul.msk.bf16.vlgmr.msra.gmra.mxu3 %vm810_vm8, %v736_v62  ;;  %v834_v21 = vsel %vm810_vm8, %v773_v17, 0 }
 0x1df   : > { %843 = vmatpush.bf16.xpose.msrb.mxu0 %v834_v21 }
 0x1e0   : > { %v943_v22 = vpack.c.b16 %v942_v19, %v942_v19  ;;  %v948_v23 = vpack.c.b16 %v947_v20, %v947_v20  ;;  %v805_v24 = vpop.f32.mrf.mxu2  ;;  %v995_v20 = vunpack.c.l.b16 %v2472_v15 }
 0x1e1   : > { %v806_v25 = vadd.f32 %v1943_v1, %v805_v24 }
 0x1e2   : > { %949 = vrot.lane.b32.xlu2 %v948_v23, %s2229_s9  ;;  %944 = vrot.lane.b32.xlu1 %v943_v22, %s2229_s9  ;;  %v2519_v21 = vpack.c.b16 %v995_v20, %v995_v20 }
 0x1e3   : > { %v2480_v26 = vpack.c.bf16 %v806_v25, %v806_v25  ;;  %1065 = vrot.lane.b32.xlu0 %v943_v22, %s2230_s16 }
 0x1e5   : > { %v897_v27 = vsel %vm876_vm9, %v2480_v26, 0 }
 0x1e6   : > { %906 = vmatpush.bf16.msrb.mxu2 %v897_v27  ;;  %1752 = vmatmul.msk.bf16.vlgmr.msrb.gmra.mxu0 %vm810_vm8, %v737_v16 }
 0x1ea   : > { %1044 = vrot.lane.b32.xlu2 %v919_v7, %s2230_s16  ;;  %1179 = vrot.lane.b32.xlu1 %v948_v23, %s2231_s25 }
 0x1eb   : > { %1154 = vrot.lane.b32.xlu0 %v914_v6, %s2231_s25 }
 0x1f2   : > { %1067 = vrot.lane.b32.xlu2 %v948_v23, %s2230_s16 }
 0x1fa   : > { %1042 = vrot.lane.b32.xlu2 %v914_v6, %s2230_s16 }
 0x202   : > { %1156 = vrot.lane.b32.xlu2 %v919_v7, %s2231_s25 }
 0x20a   : > { %1177 = vrot.lane.b32.xlu2 %v943_v22, %s2231_s25  ;;  %v1019_v22 = vunpack.c.l.b16 %v2480_v26 }
 0x20c   : > { %v1020_v23 = vpack.c.b16 %v1019_v22, %v1019_v22 }
 0x234   : > { %v921_v28 = vpop.permute.xlu2 %920 }
 0x235   : > { %v926_v29 = vsel %vm810_vm8, %v921_v28, 0 }
 0x236   : > { %935 = vmatpush.bf16.xpose.msrb.mxu3 %v926_v29 }
 0x23c   : > { %v950_v30 = vpop.permute.xlu2 %949 }
 0x23d   : > { %v955_v31 = vsel %vm810_vm8, %v950_v30, 0 }
 0x23e   : > { %964 = vmatpush.bf16.xpose.msra.mxu0 %v955_v31 }
 0x244   : > { %v1045_v32 = vpop.permute.xlu2 %1044 }
 0x245   : > { %v1050_v33 = vsel %vm810_vm8, %v1045_v32, 0 }
 0x246   : > { %1059 = vmatpush.bf16.xpose.msra.mxu3 %v1050_v33 }
 0x24c   : > { %v1068_v34 = vpop.permute.xlu2 %1067  ;;  %v916_v35 = vpop.permute.xlu0 %915 }
 0x24d   : > { %v1073_v36 = vsel %vm810_vm8, %v1068_v34, 0  ;;  %1755 = vmatmul.msk.bf16.vlgmr.msrb.gmra.mxu3 %vm810_vm8, %v916_v35 }
 0x24e   : > { %1082 = vmatpush.bf16.xpose.msrb.mxu0 %v1073_v36 }
 0x254   : > { %v945_v37 = vpop.permute.xlu1 %944  ;;  %v1043_v38 = vpop.permute.xlu2 %1042 }
 0x255   : > { %1756 = vmatmul.msk.bf16.vlgmr.msra.gmra.mxu0 %vm810_vm8, %v945_v37  ;;  %v1066_v44 = vpop.permute.xlu0 %1065 }
 0x25c   : > { %v1180_v39 = vpop.permute.xlu1 %1179  ;;  %v1157_v40 = vpop.permute.xlu2 %1156 }
 0x25d   : > { %v1185_v41 = vsel %vm810_vm8, %v1180_v39, 0  ;;  %v1162_v42 = vsel %vm810_vm8, %v1157_v40, 0  ;;  %1759 = vmatmul.msk.bf16.vlgmr.msra.gmra.mxu3 %vm810_vm8, %v1043_v38  ;;  %v1155_v50 = vpop.permute.xlu0 %1154 }
 0x25e   : > { %1171 = vmatpush.bf16.xpose.msrb.mxu3 %v1162_v42  ;;  %1194 = vmatpush.bf16.xpose.msra.mxu0 %v1185_v41 }
 0x261   : > { %v826_v43 = vpop.f32.mrf.mxu3 }
 0x262   : > { %v849_v45 = vsel %vm810_vm8, %v826_v43, -inf }
 0x263   : > { %v845_v46 = vpop.f32.mrf.mxu0  ;;  %850 = vmax.xlane.f32.xlu0 %v849_v45 }
 0x264   : > { %v852_v47 = vsel %vm810_vm8, %v845_v46, -inf  ;;  %v1178_v51 = vpop.permute.xlu2 %1177 }
 0x265   : > { %853 = vmax.xlane.f32.xlu1 %v852_v47  ;;  %1760 = vmatmul.msk.bf16.vlgmr.msrb.gmra.mxu0 %vm810_vm8, %v1066_v44 }
 0x269   : > { %v828_v48 = vpop.f32.mrf.mxu3 }
 0x26b   : > { %v847_v49 = vpop.f32.mrf.mxu0 }
 0x26d   : > { %1763 = vmatmul.msk.bf16.vlgmr.msrb.gmra.mxu3 %vm810_vm8, %v1155_v50 }
 0x275   : > { %1764 = vmatmul.msk.bf16.vlgmr.msra.gmra.mxu0 %vm810_vm8, %v1178_v51 }
 0x2d0   : > { %v937_v52 = vpop.f32.mrf.mxu3 }
 0x2d1   : > { %v970_v53 = vsel %vm810_vm8, %v937_v52, -inf }
 0x2d2   : > { %v966_v54 = vpop.f32.mrf.mxu0  ;;  %971 = vmax.xlane.f32.xlu1 %v970_v53 }
 0x2d3   : > { %v973_v55 = vsel %vm810_vm8, %v966_v54, -inf }
 0x2d4   : > { %974 = vmax.xlane.f32.xlu2 %v973_v55 }
 0x2d6   : > { %v851_v56 = vpop.xlane.xlu0 %850 }
 0x2d7   : > { %v855_v57 = vsub.f32 %v826_v43, %v851_v56 }
 0x2d8   : > { %v854_v58 = vpop.xlane.xlu1 %853  ;;  %v939_v59 = vpop.f32.mrf.mxu3 }
 0x2d9   : > { %v857_v60 = vmul.f32 1.442695, %v855_v57  ;;  %v856_v61 = vsub.f32 %v845_v46, %v854_v58 }
 0x2da   : > { %v968_v62 = vpop.f32.mrf.mxu0 }
 0x2db   : > { %1955 = vpow2.f32 %v857_v60  ;;  %v859_v63 = vmul.f32 1.442695, %v856_v61 }
 0x2dd   : > { %1957 = vpow2.f32 %v859_v63 }
 0x2e0   : > { %v1061_v1 = vpop.f32.mrf.mxu3 }
 0x2e1   : > { %v1956_v3 = vpop.eup %1955  ;;  %v1088_v4 = vsel %vm810_vm8, %v1061_v1, -inf }
 0x2e2   : > { %v1084_v5 = vpop.f32.mrf.mxu0  ;;  %1089 = vmax.xlane.f32.xlu2 %v1088_v4  ;;  %v861_v6 = vsel %vm810_vm8, %v1956_v3, 0.0 }
 0x2e3   : > { %v1958_v7 = vpop.eup %1957  ;;  %862 = vadd.xlane.f32.xlu1 %v861_v6  ;;  %v1091_v12 = vsel %vm810_vm8, %v1084_v5, -inf }
 0x2e4   : > { %v864_v8 = vsel %vm810_vm8, %v1958_v7, 0.0 }
 0x2e5   : > { %865 = vadd.xlane.f32.xlu0 %v864_v8 }
 0x2e8   : > { %v1063_v9 = vpop.f32.mrf.mxu3 }
 0x2ea   : > { %v1086_v11 = vpop.f32.mrf.mxu0 }
 0x2ed   : > { %1092 = vmax.xlane.f32.xlu0 %v1091_v12 }
 0x2f0   : > { %v2513_v13 = vpop.f32.mrf.mxu3 }
 0x2f1   : > { %v1200_v14 = vsel %vm810_vm8, %v2513_v13, -inf }
 0x2f2   : > { %v1196_v16 = vpop.f32.mrf.mxu0  ;;  %1201 = vmax.xlane.f32.xlu2 %v1200_v14 }
 0x2f3   : > { %v1203_v17 = vsel %vm810_vm8, %v1196_v16, -inf }
 0x2f4   : > { %1204 = vmax.xlane.f32.xlu1 %v1203_v17 }
 0x2f8   : > { %v1175_v18 = vpop.f32.mrf.mxu3 }
 0x2fa   : > { %v1198_v19 = vpop.f32.mrf.mxu0 }
 0x301   : > { %997 = vrot.lane.b32.xlu0 %v2519_v21, %s2229_s9 }
 0x30a   : > { %1133 = vrot.lane.b32.xlu2 %v1020_v23, %s2230_s16 }
 0x30d   : > { %1021 = vrot.lane.b32.xlu1 %v1020_v23, %s2229_s9  ;;  %s1591_s9 = scalar_lea.hbm %s2721_s27, %s1823_s5 }
 0x345   : > { %v972_v24 = vpop.xlane.xlu1 %971 }
 0x346   : > { %v976_v25 = vsub.f32 %v937_v52, %v972_v24 }
 0x347   : > { %v975_v27 = vpop.xlane.xlu2 %974 }
 0x348   : > { %v978_v28 = vmul.f32 1.442695, %v976_v25  ;;  %v977_v29 = vsub.f32 %v966_v54, %v975_v27 }
 0x34a   : > { %1959 = vpow2.f32 %v978_v28  ;;  %v980_v30 = vmul.f32 1.442695, %v977_v29 }
 0x34c   : > { %1961 = vpow2.f32 %v980_v30 }
 0x350   : > { %v2526_v15 = vpop.eup %1959 }
 0x351   : > { %v982_v31 = vsel %vm810_vm8, %v2526_v15, 0.0 }
 0x352   : > { %v2530_v32 = vpop.eup %1961  ;;  %983 = vadd.xlane.f32.xlu2 %v982_v31 }
 0x353   : > { %v985_v26 = vsel %vm810_vm8, %v2530_v32, 0.0 }
 0x354   : > { %986 = vadd.xlane.f32.xlu0 %v985_v26 }
 0x355   : > { %v1090_v33 = vpop.xlane.xlu2 %1089 }
 0x356   : > { %v1094_v34 = vsub.f32 %v1061_v1, %v1090_v33  ;;  %v863_v35 = vpop.xlane.xlu1 %862 }
 0x357   : > { %1963 = vrcp.f32 %v863_v35 }
 0x358   : > { %v1096_v36 = vmul.f32 1.442695, %v1094_v34  ;;  %v866_v37 = vpop.xlane.xlu0 %865 }
 0x359   : > { %1965 = vrcp.f32 %v866_v37 }
 0x35a   : > { %1967 = vpow2.f32 %v1096_v36 }
 0x35d   : > { %v1964_v38 = vpop.eup %1963 }
 0x35e   : > { %v869_v39 = vmul.f32 %v1964_v38, %v1956_v3 }
 0x35f   : > { %v1966_v40 = vpop.eup %1965 }
 0x360   : > { %v1968_v41 = vpop.eup %1967  ;;  %v870_v42 = vmul.f32 %v1966_v40, %v1958_v7  ;;  %v1093_v43 = vpop.xlane.xlu0 %1092  ;;  %v871_v44 = vpack.c.bf16 %v869_v39, %v869_v39 }
 0x361   : > { %v1095_v45 = vsub.f32 %v1084_v5, %v1093_v43  ;;  %v1100_v46 = vsel %vm810_vm8, %v1968_v41, 0.0 }
 0x362   : > { %1753 = vmatmul.msk.bf16.vlgmr.msrb.gmra.mxu1 %vm810_vm8, %v871_v44  ;;  %1101 = vadd.xlane.f32.xlu2 %v1100_v46  ;;  %v872_v47 = vpack.c.bf16 %v870_v42, %v870_v42 }
 0x363   : > { %v1098_v48 = vmul.f32 1.442695, %v1095_v45 }
 0x364   : > { %1754 = vmatmul.msk.bf16.vlgmr.msrb.gmra.mxu2 %vm810_vm8, %v872_v47 }
 0x365   : > { %1969 = vpow2.f32 %v1098_v48  ;;  %v1202_v57 = vpop.xlane.xlu2 %1201 }
 0x366   : > { %v1206_v61 = vsub.f32 %v2513_v13, %v1202_v57 }
 0x367   : > { %v1205_v49 = vpop.xlane.xlu1 %1204 }
 0x368   : > { %v1207_v50 = vsub.f32 %v1196_v16, %v1205_v49  ;;  %1112 = vrot.lane.b32.xlu0 %v2519_v21, %s2230_s16  ;;  %v1208_v1 = vmul.f32 1.442695, %v1206_v61 }
 0x36a   : > { %v1210_v51 = vmul.f32 1.442695, %v1207_v50 }
 0x36b   : > { %v1970_v52 = vpop.eup %1969 }
 0x36c   : > { %1971 = vpow2.f32 %v1210_v51  ;;  %v1103_v53 = vsel %vm810_vm8, %v1970_v52, 0.0 }
 0x36d   : > { %1104 = vadd.xlane.f32.xlu2 %v1103_v53  ;;  %v1134_v59 = vpop.permute.xlu2 %1133  ;;  %1973 = vpow2.f32 %v1208_v1 }
 0x36e   : > { %v1139_v63 = vsel %vm876_vm9, %v1134_v59, 0 }
 0x372   : > { %v1972_v54 = vpop.eup %1971 }
 0x373   : > { %v998_v55 = vpop.permute.xlu0 %997  ;;  %v1215_v56 = vsel %vm810_vm8, %v1972_v54, 0.0  ;;  %v1974_v3 = vpop.eup %1973 }
 0x374   : > { %v1003_v58 = vsel %vm876_vm9, %v998_v55, 0  ;;  %1216 = vadd.xlane.f32.xlu1 %v1215_v56  ;;  %v1212_v4 = vsel %vm810_vm8, %v1974_v3, 0.0  ;;  %v1816_v55 = vld [vmem:[#allocation8 + $0x8] sm:$0xff]  ;;  %v1815_v56 = vld [vmem:[#allocation8] sm:$0xff] }
 0x375   : > { %1012 = vmatpush.bf16.msra.mxu1 %v1003_v58  ;;  %1328 = vmatpush.bf16.msra.mxu3 %v1816_v55 }
 0x379   : > { %1329 = vmatpush.bf16.msra.mxu3 %v1815_v56 }
 0x37f   : > { %v1022_v60 = vpop.permute.xlu1 %1021 }
 0x380   : > { %v1027_v62 = vsel %vm876_vm9, %v1022_v60, 0 }
 0x381   : > { %1036 = vmatpush.bf16.msra.mxu2 %v1027_v62 }
 0x385   : > { %1148 = vmatpush.bf16.msrb.mxu2 %v1139_v63  ;;  %1245 = vrot.lane.b32.xlu2 %v1020_v23, %s2231_s25 }
 0x38d   : > { %1224 = vrot.lane.b32.xlu2 %v2519_v21, %s2231_s25  ;;  %s1594_s25 = sshll.u32 %s1591_s9, 4  ;;  %s1595_s25 = int_to_ptr.hbm [resolvable:$true] %s1594_s25 }
 0x392   : > { %1213 = vadd.xlane.f32.xlu0 %v1212_v4 }
 0x3c5   : > { %v984_v5 = vpop.xlane.xlu2 %983 }
 0x3c6   : > { %1975 = vrcp.f32 %v984_v5 }
 0x3c7   : > { %v987_v6 = vpop.xlane.xlu0 %986 }
 0x3c8   : > { %1977 = vrcp.f32 %v987_v6 }
 0x3cc   : > { %v1976_v7 = vpop.eup %1975 }
 0x3cd   : > { %v990_v8 = vmul.f32 %v1976_v7, %v2526_v15 }
 0x3ce   : > { %v1978_v9 = vpop.eup %1977 }
 0x3cf   : > { %v992_v11 = vpack.c.bf16 %v990_v8, %v990_v8  ;;  %v991_v12 = vmul.f32 %v1978_v9, %v2530_v32 }
 0x3d1   : > { %v993_v13 = vpack.c.bf16 %v991_v12, %v991_v12  ;;  %1757 = vmatmul.msk.bf16.vlgmr.msra.gmra.mxu1 %vm810_vm8, %v992_v11  ;;  %v1944_v12 = vld [vmem:[%s2678_s10] ss:$0 sm:$0xff] }
 0x3d3   : > { %1758 = vmatmul.msk.bf16.vlgmr.msra.gmra.mxu2 %vm810_vm8, %v993_v13 }
 0x3d5   : > { %v1102_v14 = vpop.xlane.xlu2 %1101 }
 0x3d6   : > { %1979 = vrcp.f32 %v1102_v14 }
 0x3da   : > { %v1113_v16 = vpop.permute.xlu0 %1112 }
 0x3db   : > { %v1118_v17 = vsel %vm876_vm9, %v1113_v16, 0 }
 0x3dc   : > { %v1980_v18 = vpop.eup %1979  ;;  %1127 = vmatpush.bf16.msrb.mxu1 %v1118_v17 }
 0x3dd   : > { %v1108_v19 = vmul.f32 %v1980_v18, %v1968_v41 }
 0x3df   : > { %v1110_v20 = vpack.c.bf16 %v1108_v19, %v1108_v19  ;;  %v2554_v21 = vpop.f32.mrf.mxu1 }
 0x3e0   : > { %v1105_v22 = vpop.xlane.xlu2 %1104 }
 0x3e1   : > { %1981 = vrcp.f32 %v1105_v22  ;;  %1761 = vmatmul.msk.bf16.vlgmr.msrb.gmra.mxu1 %vm810_vm8, %v1110_v20 }
 0x3e7   : > { %v1982_v23 = vpop.eup %1981  ;;  %v891_v24 = vpop.f32.mrf.mxu1 }
 0x3e8   : > { %v908_v25 = vpop.f32.mrf.mxu2  ;;  %v1109_v27 = vmul.f32 %v1982_v23, %v1970_v52  ;;  %v1246_v28 = vpop.permute.xlu2 %1245 }
 0x3e9   : > { %v1251_v29 = vsel %vm876_vm9, %v1246_v28, 0  ;;  %v1217_v15 = vpop.xlane.xlu1 %1216 }
 0x3ea   : > { %v1111_v30 = vpack.c.bf16 %v1109_v27, %v1109_v27  ;;  %1260 = vmatpush.bf16.msra.mxu2 %v1251_v29  ;;  %1983 = vrcp.f32 %v1217_v15  ;;  %v1818_v15 = vld [vmem:[#allocation10 + $0x8] sm:$0xff] }
 0x3eb   : > { %1424 = vmatpush.bf16.msrb.mxu0 %v1818_v15 }
 0x3ec   : > { %1762 = vmatmul.msk.bf16.vlgmr.msrb.gmra.mxu2 %vm810_vm8, %v1111_v30 }
 0x3f0   : > { %v910_v31 = vpop.f32.mrf.mxu2  ;;  %v1225_v32 = vpop.permute.xlu2 %1224 }
 0x3f1   : > { %v1230_v26 = vsel %vm876_vm9, %v1225_v32, 0  ;;  %v1984_v33 = vpop.eup %1983 }
 0x3f2   : > { %1239 = vmatpush.bf16.msra.mxu1 %v1230_v26  ;;  %v1221_v34 = vmul.f32 %v1984_v33, %v1972_v54  ;;  %v1817_v33 = vld [vmem:[#allocation10] sm:$0xff] }
 0x3f3   : > { %1425 = vmatpush.bf16.msrb.mxu0 %v1817_v33  ;;  %v1820_v33 = vld [vmem:[%s2683_s15 + $0x8] sm:$0xff] }
 0x3f4   : > { %v1223_v35 = vpack.c.bf16 %v1221_v34, %v1221_v34 }
 0x3fc   : > { %1766 = vmatmul.msk.bf16.vlgmr.msra.gmra.mxu2 %vm810_vm8, %v1223_v35 }
 0x405   : > { %v1214_v36 = vpop.xlane.xlu0 %1213 }
 0x406   : > { %1985 = vrcp.f32 %v1214_v36 }
 0x40c   : > { %v1986_v37 = vpop.eup %1985 }
 0x40d   : > { %v1220_v38 = vmul.f32 %v1986_v37, %v1974_v3 }
 0x40f   : > { %v1222_v39 = vpack.c.bf16 %v1220_v38, %v1220_v38 }
 0x411   : > { %1765 = vmatmul.msk.bf16.vlgmr.msra.gmra.mxu1 %vm810_vm8, %v1222_v39 }
 0x44e   : > { %v1014_v40 = vpop.f32.mrf.mxu1 }
 0x456   : > { %v1016_v41 = vpop.f32.mrf.mxu1  ;;  %v1038_v42 = vpop.f32.mrf.mxu2 }
 0x457   : > { %v1924_v43 = vpack.i.bf16 %v1038_v42, %v1014_v40 }
 0x459   : > { %1925 = vrot.lane.b32.xlu2 %v1924_v43, %s2232_s19 }
 0x45e   : > { %v1040_v44 = vpop.f32.mrf.mxu2  ;;  %v1129_v45 = vpop.f32.mrf.mxu1 }
 0x466   : > { %v1131_v46 = vpop.f32.mrf.mxu1 }
 0x46f   : > { %v1150_v47 = vpop.f32.mrf.mxu2 }
 0x470   : > { %v1929_v48 = vpack.i.bf16 %v1150_v47, %v1129_v45 }
 0x472   : > { %1930 = vrot.lane.b32.xlu1 %v1929_v48, %s2233_s1  ;;  %s2159_s1 = sshra.s32 %s1595_s25, 4  ;;  %s2160_s1 = int_to_ptr.hbm [resolvable:$true] %s2159_s1 }
 0x473   : > { %p2166_p3 = scmp.lt.s32.totalorder %s2160_s1, %s2722_s20 }
 0x477   : > { %v1152_v49 = vpop.f32.mrf.mxu2 }
 0x47f   : > { %v1262_v50 = vpop.f32.mrf.mxu2 }
 0x487   : > { %v1264_v51 = vpop.f32.mrf.mxu2 }
 0x48e   : > { %v1241_v52 = vpop.f32.mrf.mxu1 }
 0x48f   : > { %v1934_v53 = vpack.i.bf16 %v1262_v50, %v1241_v52  ;;  %v1946_v52 = vld [vmem:[%s2680_s12] ss:$0 sm:$0xff] }
 0x491   : > { %1935 = vrot.lane.b32.xlu2 %v1934_v53, %s2234_s21  ;;  %s2718_s21 = sld [smem:[#allocation17_spill]] }
 0x496   : > { %v1243_v54 = vpop.f32.mrf.mxu1 }
 0x497   : > { %s621_s22 = sand.u32 1, %s2718_s21   ;;  %s2161_s21 = scalar_lea.hbm %s2160_s1, 16 }
 0x498   : > { %s1721_s0 = sshll.u32 %s621_s22, 4  ;;  %s1580_s28 = scalar_lea.sflag [#allocation4], %s621_s22 }
 0x499   : > { %s623_s29 = scalar_lea.vmem [#allocation11], %s1721_s0  ;;  %p2162_p0 = scmp.ne.s32.totalorder %s2160_s1, %s2161_s21 }
 0x49a   : > { %s1592_s16 = sshll.u32 %s623_s29, 4  ;;  %s1593_s16 = int_to_ptr.vmem [resolvable:$true] %s1592_s16 }
 0x49b   : > { %p2163_p1 = pnand %p2162_p0, %p2364_p5 }
 0x49d   : > { %p2164_p2 = pneg %p2163_p1 }
 0x4b3   : > { %v1926_v57 = vpop.permute.xlu2 %1925 }
 0x4b4   : > { %v1928_v59 = vunpack.i.h.bf16 %v1926_v57  ;;  %v1927_v60 = vunpack.i.l.bf16 %v1926_v57 }
 0x4b6   : > { %v1291_v1 = vsel %vm810_vm8, %v908_v25, %v1928_v59  ;;  %v1290_v3 = vsel %vm810_vm8, %v2554_v21, %v1927_v60  ;;  %v1947_v59 = vld [vmem:[%s2682_s14] ss:$0 sm:$0xff] }
 0x4e4   : > { %v1931_v58 = vpop.permute.xlu1 %1930 }
 0x4e5   : > { %v1933_v61 = vunpack.i.h.bf16 %v1931_v58  ;;  %v1932_v62 = vunpack.i.l.bf16 %v1931_v58 }
 0x4e7   : > { %v1293_v6 = vsel %vm1292_vm10, %v1290_v3, %v1932_v62  ;;  %v1294_v7 = vsel %vm1292_vm10, %v1291_v1, %v1933_v61 }
 0x4eb   : > { %v1936_v63 = vpop.permute.xlu2 %1935 }
 0x4ec   : > { %v1938_v4 = vunpack.i.h.bf16 %v1936_v63  ;;  %v1937_v5 = vunpack.i.l.bf16 %v1936_v63 }
 0x4ee   : > { %v1296_v8 = vsel %vm1295_vm11, %v1293_v6, %v1937_v5  ;;  %v1297_v9 = vsel %vm1295_vm11, %v1294_v7, %v1938_v4  ;;  %vm1557_vm11 = vcmask 523264  }
 0x4ef   : > { %v1298_v11 = vpack.c.bf16 %v1297_v9, %v1296_v8 }
 0x4f1   : > { %1775 = vmatmul.msk.bf16.vlgmr.msra.gmra.mxu3 %vm636_vm0, %v1298_v11 }
 0x574   : > { %v1331_v13 = vpop.f32.mrf.mxu3 }
 0x575   : > { %v1332_v14 = vadd.f32 %v1944_v12, %v1331_v13 }
 0x577   : > { %v2571_v16 = vadd.f32 %v1332_v14, %v2430_v0 }
 0x579   : > { %v1340_v17 = vsel %vm636_vm0, %v2571_v16, 0.0 }
 0x57a   : > { %1341 = vadd.xlane.f32.xlu0 %v1340_v17 }
 0x57c   : > { %v1333_v18 = vpop.f32.mrf.mxu3 }
 0x57d   : > { %v1334_v19 = vadd.f32 %v1944_v12, %v1333_v18 }
 0x57f   : > { %v2576_v20 = vadd.f32 %v1334_v19, %v2434_v2  ;;  %v1822_v19 = vld [vmem:[%s2683_s15 + $0x18] sm:$0xff] }
 0x580   : > { %1565 = vmatpush.bf16.msrb.mxu1 %v1822_v19 }
 0x581   : > { %v1343_v21 = vsel %vm636_vm0, %v2576_v20, 0.0 }
 0x582   : > { %1344 = vadd.xlane.f32.xlu2 %v1343_v21 }
 0x5ed   : > { %v1342_v22 = vpop.xlane.xlu0 %1341 }
 0x5ee   : > { %v1346_v23 = vmul.f32 %v1342_v22, %v2438_v10 }
 0x5f0   : > { %v1348_v24 = vsub.f32 %v2571_v16, %v1346_v23 }
 0x5f2   : > { %v1350_v0 = vmul.f32 %v1348_v24, %v1348_v24 }
 0x5f4   : > { %v1352_v25 = vsel %vm636_vm0, %v1350_v0, 0.0 }
 0x5f5   : > { %v1345_v27 = vpop.xlane.xlu2 %1344  ;;  %1353 = vadd.xlane.f32.xlu0 %v1352_v25 }
 0x5f6   : > { %v1347_v28 = vmul.f32 %v1345_v27, %v2438_v10 }
 0x5f8   : > { %v1349_v29 = vsub.f32 %v2576_v20, %v1347_v28  ;;  %v1821_v28 = vld [vmem:[%s2683_s15 + $0x10] sm:$0xff] }
 0x5f9   : > { %1566 = vmatpush.bf16.msrb.mxu1 %v1821_v28 }
 0x5fa   : > { %v1351_v2 = vmul.f32 %v1349_v29, %v1349_v29 }
 0x5fc   : > { %v1355_v30 = vsel %vm636_vm0, %v1351_v2, 0.0 }
 0x5fd   : > { %1356 = vadd.xlane.f32.xlu0 %v1355_v30  ;;  %1567 = vmatpush.bf16.msrb.mxu1 %v1820_v33 }
 0x668   : > { %v1354_v31 = vpop.xlane.xlu0 %1353 }
 0x669   : > { %v1358_v32 = vmul.f32 %v1354_v31, %v2438_v10 }
 0x66b   : > { %v1360_v26 = vadd.f32 1e-05, %v1358_v32 }
 0x66d   : > { %1987 = vrsqrt.f32 %v1360_v26  ;;  %vm1368_vm13 = vweird.f32 %v1360_v26 }
 0x670   : > { %v1357_v34 = vpop.xlane.xlu0 %1356 }
 0x671   : > { %v1359_v35 = vmul.f32 %v1357_v34, %v2438_v10  ;;  %v1945_v10 = vld [vmem:[%s2679_s11] ss:$0 sm:$0xff] }
 0x673   : > { %v1988_v36 = vpop.eup %1987  ;;  %v1361_v37 = vadd.f32 1e-05, %v1359_v35 }
 0x674   : > { %v1363_v38 = vmul.f32 %v1988_v36, %v1360_v26  ;;  %vm1369_vm12 = vweird.f32 %v1988_v36 }
 0x675   : > { %1989 = vrsqrt.f32 %v1361_v37  ;;  %vm1370_vm14 = vmor %vm1368_vm13, %vm1369_vm12  ;;  %vm1378_vm1 = vweird.f32 %v1361_v37 }
 0x676   : > { %v1364_v39 = vmul.f32 %v1988_v36, %v1363_v38 }
 0x678   : > { %v1365_v40 = vmul.f32 0.5, %v1364_v39  ;;  %v1819_v39 = vld [vmem:[%s2683_s15] sm:$0xff] }
 0x679   : > { %1568 = vmatpush.bf16.msrb.mxu1 %v1819_v39 }
 0x67a   : > { %v1366_v41 = vsub.f32 1.5, %v1365_v40 }
 0x67b   : > { %v1990_v42 = vpop.eup %1989 }
 0x67c   : > { %v1367_v43 = vmul.f32 %v1988_v36, %v1366_v41  ;;  %v1373_v44 = vmul.f32 %v1990_v42, %v1361_v37  ;;  %vm1379_vm15 = vweird.f32 %v1990_v42 }
 0x67d   : > { %vm1380_vm2 = vmor %vm1378_vm1, %vm1379_vm15 }
 0x67e   : > { %v1374_v45 = vmul.f32 %v1990_v42, %v1373_v44  ;;  %v1371_v46 = vsel %vm1370_vm14, %v1988_v36, %v1367_v43 }
 0x67f   : > { %v1382_v49 = vmul.f32 %v1371_v46, %v1348_v24 }
 0x680   : > { %v1375_v47 = vmul.f32 0.5, %v1374_v45 }
 0x681   : > { %v1387_v53 = vmul.f32 %v1945_v10, %v1382_v49 }
 0x682   : > { %v1376_v48 = vsub.f32 1.5, %v1375_v47 }
 0x683   : > { %v1392_v56 = vadd.f32 %v1946_v52, %v1387_v53 }
 0x684   : > { %v1377_v50 = vmul.f32 %v1990_v42, %v1376_v48 }
 0x686   : > { %v1381_v51 = vsel %vm1380_vm2, %v1990_v42, %v1377_v50 }
 0x687   : > { %v1383_v54 = vmul.f32 %v1381_v51, %v1349_v29 }
 0x689   : > { %v1388_v55 = vmul.f32 %v1945_v10, %v1383_v54 }
 0x68b   : > { %v1393_v57 = vadd.f32 %v1946_v52, %v1388_v55 }
 0x68d   : > { %v1394_v58 = vpack.c.bf16 %v1393_v57, %v1392_v56 }
 0x68f   : > { %1784 = vmatmul.msk.bf16.vlgmr.msrb.gmra.mxu0 %vm636_vm0, %v1394_v58 }
 0x70c   : > { %v1427_v60 = vpop.f32.mrf.mxu0 }
 0x70d   : > { %v2598_v61 = vadd.f32 %v1947_v59, %v1427_v60 }
 0x70f   : > { %v2601_v62 = vmul.f32 0.70710677, %v2598_v61 }
 0x711   : > { %v1436_v63 = vmul.f32 %v2601_v62, %v2601_v62 }
 0x713   : > { %v1437_v1 = vmin.f32 %v1436_v63, 16.0 }
 0x714   : > { %v1429_v3 = vpop.f32.mrf.mxu0 }
 0x715   : > { %v1438_v4 = vmul.f32 2.1237322e-06, %v1437_v1  ;;  %v1449_v5 = vmul.f32 3.8918573e-05, %v1437_v1  ;;  %v2605_v6 = vadd.f32 %v1947_v59, %v1429_v3 }
 0x717   : > { %v1439_v7 = vadd.f32 0.00028619796, %v1438_v4  ;;  %v1450_v8 = vadd.f32 0.001143296, %v1449_v5  ;;  %v2608_v9 = vmul.f32 0.70710677, %v2605_v6 }
 0x719   : > { %v1451_v11 = vmul.f32 %v1450_v8, %v1437_v1  ;;  %v1476_v12 = vmul.f32 %v2608_v9, %v2608_v9  ;;  %v1440_v13 = vmul.f32 %v1439_v7, %v1437_v1 }
 0x71b   : > { %v1452_v14 = vadd.f32 0.014752088, %v1451_v11  ;;  %v1477_v17 = vmin.f32 %v1476_v12, 16.0  ;;  %v1441_v23 = vadd.f32 0.0036580483, %v1440_v13 }
 0x71d   : > { %v1453_v18 = vmul.f32 %v1452_v14, %v1437_v1  ;;  %v1478_v21 = vmul.f32 2.1237322e-06, %v1477_v17  ;;  %v1489_v22 = vmul.f32 3.8918573e-05, %v1477_v17  ;;  %v1442_v30 = vmul.f32 %v1441_v23, %v1437_v1 }
 0x71f   : > { %v1454_v24 = vadd.f32 0.112945676, %v1453_v18  ;;  %v1479_v0 = vadd.f32 0.00028619796, %v1478_v21  ;;  %v1490_v25 = vadd.f32 0.001143296, %v1489_v22 }
 0x720   : > { %v1443_v35 = vadd.f32 0.05243302, %v1442_v30 }
 0x721   : > { %v1455_v27 = vmul.f32 %v1454_v24, %v1437_v1  ;;  %v1480_v29 = vmul.f32 %v1479_v0, %v1477_v17  ;;  %v1491_v2 = vmul.f32 %v1490_v25, %v1477_v17  ;;  %v1432_v24 = vmul.f32 0.5, %v2598_v61 }
 0x722   : > { %v1444_v41 = vmul.f32 %v1443_v35, %v1437_v1  ;;  %v1433_v0 = vmul.f32 0.5, %v2605_v6 }
 0x723   : > { %v1456_v15 = vadd.f32 0.4994258, %v1455_v27  ;;  %v1481_v31 = vadd.f32 0.0036580483, %v1480_v29  ;;  %v1492_v32 = vadd.f32 0.014752088, %v1491_v2 }
 0x724   : > { %v1445_v46 = vadd.f32 0.18741608, %v1444_v41 }
 0x725   : > { %v1457_v26 = vmul.f32 %v1456_v15, %v1437_v1  ;;  %v1493_v34 = vmul.f32 %v1492_v32, %v1477_v17  ;;  %v1482_v37 = vmul.f32 %v1481_v31, %v1477_v17 }
 0x726   : > { %v1446_v50 = vmul.f32 %v1445_v46, %v1437_v1 }
 0x727   : > { %v1458_v36 = vadd.f32 1.0, %v1457_v26  ;;  %v1494_v38 = vadd.f32 0.112945676, %v1493_v34  ;;  %v1483_v42 = vadd.f32 0.05243302, %v1482_v37 }
 0x728   : > { %v1447_v56 = vadd.f32 1.1283791, %v1446_v50 }
 0x729   : > { %1991 = vrcp.f32 %v1458_v36  ;;  %v1495_v40 = vmul.f32 %v1494_v38, %v1477_v17  ;;  %v1484_v48 = vmul.f32 %v1483_v42, %v1477_v17  ;;  %v1470_v52 = vand.u32 2147483648, %v1458_v36 }
 0x72a   : > { %v1468_v54 = vand.u32 2147483647, %v1458_v36  ;;  %vm1464_vm4 = vweird.f32 %v1458_v36  ;;  %v1448_v4 = vmul.f32 %v1447_v56, %v2601_v62 }
 0x72b   : > { %v1496_v43 = vadd.f32 0.4994258, %v1495_v40  ;;  %v1485_v53 = vadd.f32 0.18741608, %v1484_v48  ;;  %v1471_v59 = vor.u32 1.1754944e-38, %v1470_v52 }
 0x72c   : > { %vm1469_vm6 = vcmp.eq.f32.partialorder %v1468_v54, 8.507059e+37 }
 0x72d   : > { %v1497_v44 = vmul.f32 %v1496_v43, %v1477_v17  ;;  %v1486_v60 = vmul.f32 %v1485_v53, %v1477_v17 }
 0x72f   : > { %v1992_v45 = vpop.eup %1991  ;;  %v1498_v10 = vadd.f32 1.0, %v1497_v44  ;;  %v1487_v1 = vadd.f32 1.1283791, %v1486_v60 }
 0x730   : > { %v1460_v47 = vmul.f32 %v1992_v45, %v1458_v36  ;;  %vm1465_vm3 = vweird.f32 %v1992_v45 }
 0x731   : > { %1993 = vrcp.f32 %v1498_v10  ;;  %vm1466_vm5 = vmor %vm1464_vm4, %vm1465_vm3  ;;  %v1510_v7 = vand.u32 2147483648, %v1498_v10  ;;  %v1508_v12 = vand.u32 2147483647, %v1498_v10  ;;  %vm1504_vm8 = vweird.f32 %v1498_v10 }
 0x732   : > { %v1461_v49 = vsub.f32 1.0, %v1460_v47  ;;  %v1488_v17 = vmul.f32 %v1487_v1, %v2608_v9  ;;  %v1948_v9 = vld [vmem:[%s2719_s26] ss:$0 sm:$0xff]  ;;  %s2165_s26 = scalar_lea.hbm %s2722_s20, 32 }
 0x733   : > { %v1511_v14 = vor.u32 1.1754944e-38, %v1510_v7  ;;  %vm1509_vm10 = vcmp.eq.f32.partialorder %v1508_v12, 8.507059e+37  ;;  %p2167_p4 = scmp.lt.s32.totalorder %s2165_s26, %s2161_s21 }
 0x734   : > { %v1462_v51 = vmul.f32 %v1992_v45, %v1461_v49 }
 0x735   : > { %p2168_p7 = por %p2167_p4, %p2166_p3 }
 0x736   : > { %v1463_v55 = vadd.f32 %v1992_v45, %v1462_v51 }
 0x737   : > { %v1994_v57 = vpop.eup %1993  ;;  %p2169_p8 = pnand %p2168_p7, %p2164_p2 }
 0x738   : > { %v1467_v58 = vsel %vm1466_vm5, %v1992_v45, %v1463_v55  ;;  %v1500_v63 = vmul.f32 %v1994_v57, %v1498_v10  ;;  %vm1505_vm7 = vweird.f32 %v1994_v57 }
 0x739   : > { %v1472_v3 = vsel %vm1469_vm6, %v1471_v59, %v1467_v58  ;;  %vm1506_vm9 = vmor %vm1504_vm8, %vm1505_vm7 }
 0x73a   : > { %v1501_v5 = vsub.f32 1.0, %v1500_v63  ;;  %v1473_v8 = vmul.f32 %v1472_v3, %v1448_v4 }
 0x73c   : > { %v1502_v11 = vmul.f32 %v1994_v57, %v1501_v5  ;;  %v1785_v18 = vclamps-f32 %v1473_v8, 1.0 }
 0x73e   : > { %v1503_v13 = vadd.f32 %v1994_v57, %v1502_v11  ;;  %v1516_v62 = vadd.f32 1.0, %v1785_v18 }
 0x740   : > { %v1507_v19 = vsel %vm1506_vm9, %v1994_v57, %v1503_v13  ;;  %v1518_v27 = vmul.f32 %v1516_v62, %v1432_v24 }
 0x741   : > { %v1512_v21 = vsel %vm1509_vm10, %v1511_v14, %v1507_v19 }
 0x742   : > { %v1513_v22 = vmul.f32 %v1512_v21, %v1488_v17 }
 0x744   : > { %v1786_v23 = vclamps-f32 %v1513_v22, 1.0 }
 0x746   : > { %v1517_v25 = vadd.f32 1.0, %v1786_v23 }
 0x748   : > { %v1519_v28 = vmul.f32 %v1517_v25, %v1433_v0 }
 0x74a   : > { %v1520_v29 = vpack.c.bf16 %v1519_v28, %v1518_v27 }
 0x74c   : > { %1803 = vmatmul.msk.bf16.vlgmr.msrb.gmra.mxu1 %vm1557_vm11, %v1520_v29 }
 0x7c9   : > { %v1570_v2 = vpop.f32.mrf.mxu1 }
 0x7ca   : > { %v1571_v30 = vadd.f32 %v1948_v9, %v1570_v2 }
 0x7cc   : > { %v1575_v15 = vadd.f32 %v1571_v30, %v2571_v16 }
 0x7ce   : > { %1577 = vst.msk [vmem:[%s623_s29] sm:$0xff] %vm636_vm0, %v1575_v15 }
 0x7d1   : > { %v1572_v61 = vpop.f32.mrf.mxu1 }
 0x7d2   : > { %v1573_v6 = vadd.f32 %v1948_v9, %v1572_v61 }
 0x7d4   : > { %v1576_v31 = vadd.f32 %v1573_v6, %v2576_v20 }
 0x7d6   : > { %1578 = vst.msk [vmem:[%s623_s29 + $0x8] sm:$0xff] %vm636_vm0, %v1576_v31 }
 0x7d7   : > { %2172 = shalt.err (!%p2169_p8)
}
 0x7d8   : > { %s2235_s22 = smov 128  }
 0x7d9   : > { %1844 = dma.vmem_to_hbm [thread:$0]  (%p2364_p5), %s1593_s16, 256, %s1595_s25, %s1580_s28, %s2235_s22, %s2235_s22, %s2232_s19  }
 0x7da PF: > { %s2723_s29 = sld [smem:[#allocation19_spill]] }
 0x7db   : > { %s2724_s24 = sld [smem:[#allocation16_spill]] }
 0x7e0   : > { %p1876_p9 = scmp.ge.s32.totalorder %s2723_s29, 2 }
 0x7e1   : > { %s1609_s27 = sand.u32 1, %s2724_s24  }
 0x7e2   : > { %p1863_p10 = pnand %p1876_p9, %p2368_p6  ;;  %s1610_s9 = scalar_lea.sflag [#allocation4], %s1609_s27 }
 0x7e4   : > { %p1864_p11 = pneg %p1863_p10 }
 0x7e6   : > { %2202 = dma.done.wait (%p1864_p11), %s1610_s9, 256  }
 0x7e7   : > { %2204 = vsyncadd (%p1864_p11), %s1610_s9, 4294967040  ;;  %s2726_s27 = sld [smem:[#allocation20_spill]] }
 0x7e8   : > { %s2727_s24 = sld [smem:[#allocation17_spill]] }
 0x7e9   : > { %s2728_s25 = sld [smem:[#allocation18_spill]] }
 0x7ea   : > { %s2729_s26 = sld [smem:[#allocation21_spill]] }
 0x7ed   : > { %p30_p12 = scmp.ge.s32.totalorder %s2726_s27, 4  }
 0x7ef   :  { %32 = sbr.rel (!%p30_p12) target bundleno = 13 (0xd), region = 144 }
 0x7f4   :  { %1616 = vsyncpa [#allocation3], 1 }
 0x7f5   :  { %1618 = vsyncpa [#allocation3 + $0x1], 1 }
 0x7f6   :  { %1619 = vsyncpa [#allocation6], 1 }
 0x7f7   :  { %1620 = vsyncpa [#allocation9], 1 }
 0x7f8   :  { %1621 = vsyncpa [#allocation4], 1 }
 0x7f9   :  { %1623 = vsyncpa [#allocation4 + $0x1], 1 }

</bundles_post_ra>
